<compile_context>
chip_gen: v5e
topology: v5e:2x2
jax: 0.10.0
libtpu: 0.0.40
codegen_flags: <defaults>
</compile_context>

<pallas_src>
import functools

import numpy as np
import jax
import jax.numpy as jnp
from jax import lax
from jax.experimental import pallas as pl
from jax.experimental.pallas import tpu as pltpu

NEG_SLOPE = 0.1   # nn.LeakyReLU(0.1)
BN_EPS = 1e-5
LANE = 128


def _leaky(x):
  # LeakyReLU(0.1) == max(x, 0.1*x) for slope < 1.
  return jnp.maximum(x, NEG_SLOPE * x)


def _round_up(n, m=LANE):
  return ((n + m - 1) // m) * m


def _se_bottleneck_kernel(x_ref, w1_ref, b1_ref, w2_ref, b2_ref,
                          w3_ref, b3_ref, wr_ref, we_ref,
                          o_ref, tap_ref, *, H, W):
  """One batch element per grid step.  Activations are (H*W, Cpad) tiles."""
  P = H * W
  Cm = w1_ref.shape[1]
  f32 = jnp.float32
  bf = jnp.bfloat16

  x_bf = x_ref[0]                                              # (P, Cin) bf16

  # ---- conv1 (1x1, BN scale folded into w1) + bias + leakyReLU -------------
  y = jnp.dot(x_bf, w1_ref[...], preferred_element_type=f32)
  y = _leaky(y + b1_ref[...])                                  # (P, Cm) f32

  # ---- conv2 (3x3, padding=1, stride=1) ------------------------------------
  # The 9 shifted taps are XLU rotations of the row-major-flattened feature
  # map; wrapped / out-of-image rows are zeroed with (P, 1) boolean selects.
  # Each tap is cast to bf16 and written to its lane-aligned slice of the
  # VMEM scratch, then a single (P, 9*Cm) @ (9*Cm, Cm) matmul does the conv.
  pidx = lax.broadcasted_iota(jnp.int32, (P, 1), 0)            # (P, 1)
  ww = pidx % W
  vmask = {-1: pidx >= W,      0: None, 1: pidx < P - W}       # row exists
  hmask = {-1: ww >= 1,        0: None, 1: ww <= W - 2}        # col exists

  k = 0
  for dy in (-1, 0, 1):
    for dx in (-1, 0, 1):
      off = dy * W + dx
      t = y if off == 0 else pltpu.roll(y, shift=(-off) % P, axis=0)
      vm, hm = vmask[dy], hmask[dx]
      if vm is None:
        m = hm
      elif hm is None:
        m = vm
      else:
        m = jnp.logical_and(vm, hm)
      if m is not None:
        t = jnp.where(m, t, 0.0)
      tap_ref[:, k * Cm:(k + 1) * Cm] = t.astype(bf)
      k += 1

  y2 = jnp.dot(tap_ref[...], w2_ref[...], preferred_element_type=f32)
  y2 = _leaky(y2 + b2_ref[...]).astype(bf)                     # (P, Cm) bf16

  # ---- conv3 (1x1, BN scale folded into w3) + bias --------------------------
  y3 = jnp.dot(y2, w3_ref[...], preferred_element_type=f32)
  y3 = y3 + b3_ref[...]                                        # (P, Cout) f32

  # ---- SE attention: squeeze (MXU) -> FC -> ReLU -> FC -> sigmoid -----------
  ones_row = jnp.ones((1, P), bf)
  s = jnp.dot(ones_row, y3.astype(bf),
              preferred_element_type=f32) * (1.0 / P)          # (1, Cout)
  h = jnp.maximum(jnp.dot(s.astype(bf), wr_ref[...],
                          preferred_element_type=f32), 0.0)
  g = jax.nn.sigmoid(jnp.dot(h.astype(bf), we_ref[...],
                             preferred_element_type=f32))      # (1, Cout)

  # ---- channel scale + residual add + leakyReLU ------------------------------
  out = _leaky(y3 * g + x_bf.astype(f32))
  o_ref[0] = out.astype(bf)


def se_bottleneck(x_nchw, params):
  """x_nchw: (N, Cin, H, W) float32.  Returns (N, Cout, H, W), Cout == Cin."""
  N, Cin, H, W = x_nchw.shape
  P = H * W
  Cm = params['w1'].shape[1]              # width
  Cout = params['w3'].shape[1]            # planes * expansion
  Chid = params['wr'].shape[1]            # Cout // reduction
  assert Cin == Cout, ("identity shortcut (downsample=None, stride=1) "
                       "requires inplanes == planes * expansion")

  # Pad every channel axis up to a multiple of 128.  Zero padding preserves
  # semantics (padded weight rows/cols, biases and input channels are zero),
  # and padded output channels are sliced off below.
  Cp = _round_up(Cin)
  Cmp = _round_up(Cm)
  Chp = _round_up(Chid)
  bf = jnp.bfloat16

  def pad2(a, r, c):
    return jnp.pad(a, ((0, r - a.shape[0]), (0, c - a.shape[1])))

  def pad_vec(v, c):
    return jnp.pad(v, (0, c - v.shape[0])).reshape(1, c).astype(jnp.float32)

  # NHWC, channel-padded, bf16 (matmul operands are bf16 anyway; residual is
  # upcast in-kernel).  TODO(synk): keep NHWC/bf16 end-to-end in a real model
  # so these transposes/pads don't round-trip HBM around the kernel.
  x = jnp.transpose(x_nchw, (0, 2, 3, 1)).reshape(N, P, Cin)
  x = jnp.pad(x, ((0, 0), (0, 0), (0, Cp - Cin))).astype(bf)

  # Fold BN scales into the output columns of the conv weights in f32, then
  # pad and cast to bf16 once.
  w1 = pad2(params['w1'] * params['s1'][None, :], Cp, Cmp).astype(bf)
  w2 = params['w2'] * params['s2'][None, None, :]
  w2 = jnp.pad(w2, ((0, 0), (0, Cmp - Cm), (0, Cmp - Cm)))
  w2 = w2.reshape(9 * Cmp, Cmp).astype(bf)
  w3 = pad2(params['w3'] * params['s3'][None, :], Cmp, Cp).astype(bf)
  wr = pad2(params['wr'], Cp, Chp).astype(bf)
  we = pad2(params['we'], Chp, Cp).astype(bf)

  args = (x,
          w1, pad_vec(params['b1'], Cmp),
          w2, pad_vec(params['b2'], Cmp),
          w3, pad_vec(params['b3'], Cp),
          wr, we)

  def fixed(shape):
    nd = len(shape)
    return pl.BlockSpec(shape, lambda n, _nd=nd: (0,) * _nd)

  in_specs = [
      pl.BlockSpec((1, P, Cp), lambda n: (n, 0, 0)),
      fixed((Cp, Cmp)), fixed((1, Cmp)),
      fixed((9 * Cmp, Cmp)), fixed((1, Cmp)),
      fixed((Cmp, Cp)), fixed((1, Cp)),
      fixed((Cp, Chp)), fixed((Chp, Cp)),
  ]
  out_specs = pl.BlockSpec((1, P, Cp), lambda n: (n, 0, 0))

  kernel = functools.partial(_se_bottleneck_kernel, H=H, W=W)
  out = pl.pallas_call(
      kernel,
      out_shape=jax.ShapeDtypeStruct((N, P, Cp), bf),
      grid_spec=pltpu.PrefetchScalarGridSpec(
          num_scalar_prefetch=0,
          grid=(N,),
          in_specs=in_specs,
          out_specs=out_specs,
          scratch_shapes=[pltpu.VMEM((P, 9 * Cmp), bf)],   # fused-K tap slab
      ),
      compiler_params=pltpu.CompilerParams(
          dimension_semantics=("parallel",),
          vmem_limit_bytes=48 * 1024 * 1024),
  )(*args)

  out = out[:, :, :Cout].astype(jnp.float32)
  return jnp.transpose(out.reshape(N, H, W, Cout), (0, 3, 1, 2))


# ----------------------------- pure-JAX reference ---------------------------
def ref_forward(x_nchw, params):
  Cm = params['w1'].shape[1]
  x = jnp.transpose(x_nchw, (0, 2, 3, 1))
  dn = ('NHWC', 'HWIO', 'NHWC')
  hp = lax.Precision.HIGHEST
  y = lax.conv_general_dilated(x, params['w1'][None, None], (1, 1), 'VALID',
                               dimension_numbers=dn, precision=hp)
  y = _leaky(y * params['s1'] + params['b1'])
  w2 = params['w2'].reshape(3, 3, Cm, Cm)
  y = lax.conv_general_dilated(y, w2, (1, 1), ((1, 1), (1, 1)),
                               dimension_numbers=dn, precision=hp)
  y = _leaky(y * params['s2'] + params['b2'])
  y = lax.conv_general_dilated(y, params['w3'][None, None], (1, 1), 'VALID',
                               dimension_numbers=dn, precision=hp)
  y = y * params['s3'] + params['b3']
  s = jnp.mean(y, axis=(1, 2))
  h = jnp.maximum(s @ params['wr'], 0.0)
  g = jax.nn.sigmoid(h @ params['we'])
  y = y * g[:, None, None, :]
  y = _leaky(y + x)
  return jnp.transpose(y, (0, 3, 1, 2))


# ----------------------------- parameter setup ------------------------------
def make_params(key, inplanes, planes, *, base_width=64, groups=1,
                reduction=16, expansion=4):
  width = int(planes * (base_width / 64.0)) * groups
  cout = planes * expansion
  chid = max(cout // reduction, 1)
  ks = jax.random.split(key, 8)

  def norm(k, shape, scale):
    return (scale * jax.random.normal(k, shape)).astype(jnp.float32)

  def make_bn(k, c):
    kg, kb, km, kv = jax.random.split(k, 4)
    gamma = 1.0 + 0.1 * jax.random.normal(kg, (c,))
    beta = 0.1 * jax.random.normal(kb, (c,))
    mean = 0.1 * jax.random.normal(km, (c,))
    var = 0.5 + jax.random.uniform(kv, (c,))
    scale = gamma / jnp.sqrt(var + BN_EPS)
    bias = beta - mean * scale
    return scale.astype(jnp.float32), bias.astype(jnp.float32)

  s1, b1 = make_bn(ks[0], width)
  s2, b2 = make_bn(ks[1], width)
  s3, b3 = make_bn(ks[2], cout)

  return dict(
      w1=norm(ks[3], (inplanes, width), 0.2),          # conv1 1x1: Cin->width
      s1=s1, b1=b1,
      w2=norm(ks[4], (9, width, width), 0.2),          # conv2 3x3 taps (HWIO)
      s2=s2, b2=b2,
      w3=norm(ks[5], (width, cout), 0.2),              # conv3 1x1: width->Cout
      s3=s3, b3=b3,
      wr=norm(ks[6], (cout, chid), 0.3),               # SE fc reduce
      we=norm(ks[7], (chid, cout), 0.3),               # SE fc expand
  )


if __name__ == "__main__":
  # Small shapes consistent with the module: inplanes = planes * expansion so
  # the identity shortcut (downsample=None, stride=1) is valid.  N=4 gives the
  # auto-pipeline a few steady-state grid steps.
  N, planes, H, W = 4, 8, 16, 16
  inplanes = planes * 4                                 # 32 channels

  key = jax.random.PRNGKey(0)
  kx, kp = jax.random.split(key)
  x = jax.random.normal(kx, (N, inplanes, H, W), dtype=jnp.float32)
  params = make_params(kp, inplanes, planes)

  out = jax.block_until_ready(se_bottleneck(x, params))
  ref = jax.block_until_ready(ref_forward(x, params))

  # Kernel uses bf16 matmul operands / bf16 I/O (f32 accumulation and f32
  # elementwise math); compare against the pure-f32 reference with a
  # correspondingly relaxed tolerance.
  np.testing.assert_allclose(np.asarray(out), np.asarray(ref),
                             rtol=6e-2, atol=6e-2)
  print("KERNEL_OK")
</pallas_src>

<mosaic_0001>
module attributes {stable_mosaic.version = 11 : i64} {
  func.func @_se_bottleneck_kernel(%arg0: i32, %arg1: memref<1x256x128xbf16, #tpu.memory_space<vmem>>, %arg2: memref<128x128xbf16, #tpu.memory_space<vmem>>, %arg3: memref<1x128xf32, #tpu.memory_space<vmem>>, %arg4: memref<1152x128xbf16, #tpu.memory_space<vmem>>, %arg5: memref<1x128xf32, #tpu.memory_space<vmem>>, %arg6: memref<128x128xbf16, #tpu.memory_space<vmem>>, %arg7: memref<1x128xf32, #tpu.memory_space<vmem>>, %arg8: memref<128x128xbf16, #tpu.memory_space<vmem>>, %arg9: memref<128x128xbf16, #tpu.memory_space<vmem>>, %arg10: memref<1x256x128xbf16, #tpu.memory_space<vmem>>, %arg11: memref<256x1152xbf16, #tpu.memory_space<vmem>>) attributes {dimension_semantics = [#tpu.dimension_semantics<parallel>], iteration_bounds = array<i64: 4>, scalar_prefetch = 0 : i64, scratch_operands = 1 : i64, tpu.core_type = #tpu.core_type<tc>, window_params = [{transform_indices = @transform_0, window_bounds = array<i64: 1, 256, 128>}, {pipeline_mode = #tpu.pipeline_mode<synchronous>, transform_indices = @transform_1, window_bounds = array<i64: 128, 128>}, {pipeline_mode = #tpu.pipeline_mode<synchronous>, transform_indices = @transform_2, window_bounds = array<i64: 1, 128>}, {pipeline_mode = #tpu.pipeline_mode<synchronous>, transform_indices = @transform_3, window_bounds = array<i64: 1152, 128>}, {pipeline_mode = #tpu.pipeline_mode<synchronous>, transform_indices = @transform_4, window_bounds = array<i64: 1, 128>}, {pipeline_mode = #tpu.pipeline_mode<synchronous>, transform_indices = @transform_5, window_bounds = array<i64: 128, 128>}, {pipeline_mode = #tpu.pipeline_mode<synchronous>, transform_indices = @transform_6, window_bounds = array<i64: 1, 128>}, {pipeline_mode = #tpu.pipeline_mode<synchronous>, transform_indices = @transform_7, window_bounds = array<i64: 128, 128>}, {pipeline_mode = #tpu.pipeline_mode<synchronous>, transform_indices = @transform_8, window_bounds = array<i64: 128, 128>}, {transform_indices = @transform_9, window_bounds = array<i64: 1, 256, 128>}]} {
    %c0 = arith.constant 0 : index
    %c0_0 = arith.constant 0 : index
    %c0_1 = arith.constant 0 : index
    %0 = vector.load %arg1[%c0, %c0_0, %c0_1] : memref<1x256x128xbf16, #tpu.memory_space<vmem>>, vector<1x256x128xbf16>
    %1 = vector.shape_cast %0 : vector<1x256x128xbf16> to vector<256x128xbf16>
    %c0_2 = arith.constant 0 : index
    %c0_3 = arith.constant 0 : index
    %2 = vector.load %arg2[%c0_2, %c0_3] : memref<128x128xbf16, #tpu.memory_space<vmem>>, vector<128x128xbf16>
    %cst = arith.constant dense<0.000000e+00> : vector<256x128xf32>
    %3 = tpu.matmul %1, %2, %cst {dimension_numbers = #tpu.dot_dimension_numbers<[1], [0], [0], [1], [0, 0, 1, 1], [], []>} : vector<256x128xbf16>, vector<128x128xbf16>, vector<256x128xf32> -> vector<256x128xf32>
    %c0_4 = arith.constant 0 : index
    %c0_5 = arith.constant 0 : index
    %4 = vector.load %arg3[%c0_4, %c0_5] : memref<1x128xf32, #tpu.memory_space<vmem>>, vector<1x128xf32>
    %5 = vector.broadcast %4 : vector<1x128xf32> to vector<256x128xf32>
    %6 = arith.addf %3, %5 : vector<256x128xf32>
    %cst_6 = arith.constant 1.000000e-01 : f32
    %7 = vector.broadcast %cst_6 : f32 to vector<256x128xf32>
    %8 = arith.mulf %7, %6 : vector<256x128xf32>
    %9 = arith.maximumf %6, %8 : vector<256x128xf32>
    %10 = tpu.iota {dimensions = array<i32: 0>} : vector<256x1xi32>
    %c16_i32 = arith.constant 16 : i32
    %c0_i32 = arith.constant 0 : i32
    %11 = arith.cmpi eq, %c16_i32, %c0_i32 : i32
    %c1_i32 = arith.constant 1 : i32
    %12 = arith.select %11, %c1_i32, %c16_i32 : i32
    %13 = vector.broadcast %12 : i32 to vector<256x1xi32>
    %14 = arith.remsi %10, %13 : vector<256x1xi32>
    %c0_i32_7 = arith.constant 0 : i32
    %15 = vector.broadcast %c0_i32_7 : i32 to vector<256x1xi32>
    %16 = arith.cmpi ne, %14, %15 : vector<256x1xi32>
    %c0_i32_8 = arith.constant 0 : i32
    %17 = vector.broadcast %c0_i32_8 : i32 to vector<256x1xi32>
    %18 = arith.cmpi slt, %14, %17 : vector<256x1xi32>
    %c0_i32_9 = arith.constant 0 : i32
    %19 = arith.cmpi slt, %12, %c0_i32_9 : i32
    %20 = vector.broadcast %19 : i1 to vector<256x1xi1>
    %21 = vector.broadcast %20 : vector<256x1xi1> to vector<256x1xi1>
    %22 = arith.xori %18, %21 : vector<256x1xi1>
    %23 = arith.andi %22, %16 : vector<256x1xi1>
    %24 = vector.broadcast %12 : i32 to vector<256x1xi32>
    %25 = arith.addi %14, %24 : vector<256x1xi32>
    %26 = arith.select %23, %25, %14 : vector<256x1xi1>, vector<256x1xi32>
    %c16_i32_10 = arith.constant 16 : i32
    %27 = vector.broadcast %c16_i32_10 : i32 to vector<256x1xi32>
    %28 = arith.cmpi sge, %10, %27 : vector<256x1xi32>
    %c240_i32 = arith.constant 240 : i32
    %29 = vector.broadcast %c240_i32 : i32 to vector<256x1xi32>
    %30 = arith.cmpi slt, %10, %29 : vector<256x1xi32>
    %c1_i32_11 = arith.constant 1 : i32
    %31 = vector.broadcast %c1_i32_11 : i32 to vector<256x1xi32>
    %32 = arith.cmpi sge, %26, %31 : vector<256x1xi32>
    %c14_i32 = arith.constant 14 : i32
    %33 = vector.broadcast %c14_i32 : i32 to vector<256x1xi32>
    %34 = arith.cmpi sle, %26, %33 : vector<256x1xi32>
    %c17_i32 = arith.constant 17 : i32
    %35 = tpu.dynamic_rotate %9 by %c17_i32 dim 0 : vector<256x128xf32>, i32 -> vector<256x128xf32>
    %36 = arith.andi %28, %32 : vector<256x1xi1>
    %cst_12 = arith.constant 0.000000e+00 : f32
    %37 = vector.shape_cast %36 : vector<256x1xi1> to vector<256x1xi1>
    %38 = vector.broadcast %37 : vector<256x1xi1> to vector<256x128xi1>
    %39 = vector.broadcast %cst_12 : f32 to vector<256x128xf32>
    %40 = arith.select %38, %35, %39 : vector<256x128xi1>, vector<256x128xf32>
    %41 = arith.truncf %40 : vector<256x128xf32> to vector<256x128xbf16>
    %c0_13 = arith.constant 0 : index
    %c0_14 = arith.constant 0 : index
    %42 = vector.load %arg11[%c0_13, %c0_14] : memref<256x1152xbf16, #tpu.memory_space<vmem>>, vector<256x128xbf16>
    tpu.vector_store %arg11[%c0_13, %c0_14], %41 {strides = array<i32>} : memref<256x1152xbf16, #tpu.memory_space<vmem>>, vector<256x128xbf16>,
    %c16_i32_15 = arith.constant 16 : i32
    %43 = tpu.dynamic_rotate %9 by %c16_i32_15 dim 0 : vector<256x128xf32>, i32 -> vector<256x128xf32>
    %cst_16 = arith.constant 0.000000e+00 : f32
    %44 = vector.shape_cast %28 : vector<256x1xi1> to vector<256x1xi1>
    %45 = vector.broadcast %44 : vector<256x1xi1> to vector<256x128xi1>
    %46 = vector.broadcast %cst_16 : f32 to vector<256x128xf32>
    %47 = arith.select %45, %43, %46 : vector<256x128xi1>, vector<256x128xf32>
    %48 = arith.truncf %47 : vector<256x128xf32> to vector<256x128xbf16>
    %c0_17 = arith.constant 0 : index
    %c128 = arith.constant 128 : index
    %49 = vector.load %arg11[%c0_17, %c128] : memref<256x1152xbf16, #tpu.memory_space<vmem>>, vector<256x128xbf16>
    tpu.vector_store %arg11[%c0_17, %c128], %48 {strides = array<i32>} : memref<256x1152xbf16, #tpu.memory_space<vmem>>, vector<256x128xbf16>,
    %c15_i32 = arith.constant 15 : i32
    %50 = tpu.dynamic_rotate %9 by %c15_i32 dim 0 : vector<256x128xf32>, i32 -> vector<256x128xf32>
    %51 = arith.andi %28, %34 : vector<256x1xi1>
    %cst_18 = arith.constant 0.000000e+00 : f32
    %52 = vector.shape_cast %51 : vector<256x1xi1> to vector<256x1xi1>
    %53 = vector.broadcast %52 : vector<256x1xi1> to vector<256x128xi1>
    %54 = vector.broadcast %cst_18 : f32 to vector<256x128xf32>
    %55 = arith.select %53, %50, %54 : vector<256x128xi1>, vector<256x128xf32>
    %56 = arith.truncf %55 : vector<256x128xf32> to vector<256x128xbf16>
    %c0_19 = arith.constant 0 : index
    %c256 = arith.constant 256 : index
    %57 = vector.load %arg11[%c0_19, %c256] : memref<256x1152xbf16, #tpu.memory_space<vmem>>, vector<256x128xbf16>
    tpu.vector_store %arg11[%c0_19, %c256], %56 {strides = array<i32>} : memref<256x1152xbf16, #tpu.memory_space<vmem>>, vector<256x128xbf16>,
    %c1_i32_20 = arith.constant 1 : i32
    %58 = tpu.dynamic_rotate %9 by %c1_i32_20 dim 0 : vector<256x128xf32>, i32 -> vector<256x128xf32>
    %cst_21 = arith.constant 0.000000e+00 : f32
    %59 = vector.shape_cast %32 : vector<256x1xi1> to vector<256x1xi1>
    %60 = vector.broadcast %59 : vector<256x1xi1> to vector<256x128xi1>
    %61 = vector.broadcast %cst_21 : f32 to vector<256x128xf32>
    %62 = arith.select %60, %58, %61 : vector<256x128xi1>, vector<256x128xf32>
    %63 = arith.truncf %62 : vector<256x128xf32> to vector<256x128xbf16>
    %c0_22 = arith.constant 0 : index
    %c384 = arith.constant 384 : index
    %64 = vector.load %arg11[%c0_22, %c384] : memref<256x1152xbf16, #tpu.memory_space<vmem>>, vector<256x128xbf16>
    tpu.vector_store %arg11[%c0_22, %c384], %63 {strides = array<i32>} : memref<256x1152xbf16, #tpu.memory_space<vmem>>, vector<256x128xbf16>,
    %65 = arith.truncf %9 : vector<256x128xf32> to vector<256x128xbf16>
    %c0_23 = arith.constant 0 : index
    %c512 = arith.constant 512 : index
    %66 = vector.load %arg11[%c0_23, %c512] : memref<256x1152xbf16, #tpu.memory_space<vmem>>, vector<256x128xbf16>
    tpu.vector_store %arg11[%c0_23, %c512], %65 {strides = array<i32>} : memref<256x1152xbf16, #tpu.memory_space<vmem>>, vector<256x128xbf16>,
    %c255_i32 = arith.constant 255 : i32
    %67 = tpu.dynamic_rotate %9 by %c255_i32 dim 0 : vector<256x128xf32>, i32 -> vector<256x128xf32>
    %cst_24 = arith.constant 0.000000e+00 : f32
    %68 = vector.shape_cast %34 : vector<256x1xi1> to vector<256x1xi1>
    %69 = vector.broadcast %68 : vector<256x1xi1> to vector<256x128xi1>
    %70 = vector.broadcast %cst_24 : f32 to vector<256x128xf32>
    %71 = arith.select %69, %67, %70 : vector<256x128xi1>, vector<256x128xf32>
    %72 = arith.truncf %71 : vector<256x128xf32> to vector<256x128xbf16>
    %c0_25 = arith.constant 0 : index
    %c640 = arith.constant 640 : index
    %73 = vector.load %arg11[%c0_25, %c640] : memref<256x1152xbf16, #tpu.memory_space<vmem>>, vector<256x128xbf16>
    tpu.vector_store %arg11[%c0_25, %c640], %72 {strides = array<i32>} : memref<256x1152xbf16, #tpu.memory_space<vmem>>, vector<256x128xbf16>,
    %c241_i32 = arith.constant 241 : i32
    %74 = tpu.dynamic_rotate %9 by %c241_i32 dim 0 : vector<256x128xf32>, i32 -> vector<256x128xf32>
    %75 = arith.andi %30, %32 : vector<256x1xi1>
    %cst_26 = arith.constant 0.000000e+00 : f32
    %76 = vector.shape_cast %75 : vector<256x1xi1> to vector<256x1xi1>
    %77 = vector.broadcast %76 : vector<256x1xi1> to vector<256x128xi1>
    %78 = vector.broadcast %cst_26 : f32 to vector<256x128xf32>
    %79 = arith.select %77, %74, %78 : vector<256x128xi1>, vector<256x128xf32>
    %80 = arith.truncf %79 : vector<256x128xf32> to vector<256x128xbf16>
    %c0_27 = arith.constant 0 : index
    %c768 = arith.constant 768 : index
    %81 = vector.load %arg11[%c0_27, %c768] : memref<256x1152xbf16, #tpu.memory_space<vmem>>, vector<256x128xbf16>
    tpu.vector_store %arg11[%c0_27, %c768], %80 {strides = array<i32>} : memref<256x1152xbf16, #tpu.memory_space<vmem>>, vector<256x128xbf16>,
    %c240_i32_28 = arith.constant 240 : i32
    %82 = tpu.dynamic_rotate %9 by %c240_i32_28 dim 0 : vector<256x128xf32>, i32 -> vector<256x128xf32>
    %cst_29 = arith.constant 0.000000e+00 : f32
    %83 = vector.shape_cast %30 : vector<256x1xi1> to vector<256x1xi1>
    %84 = vector.broadcast %83 : vector<256x1xi1> to vector<256x128xi1>
    %85 = vector.broadcast %cst_29 : f32 to vector<256x128xf32>
    %86 = arith.select %84, %82, %85 : vector<256x128xi1>, vector<256x128xf32>
    %87 = arith.truncf %86 : vector<256x128xf32> to vector<256x128xbf16>
    %c0_30 = arith.constant 0 : index
    %c896 = arith.constant 896 : index
    %88 = vector.load %arg11[%c0_30, %c896] : memref<256x1152xbf16, #tpu.memory_space<vmem>>, vector<256x128xbf16>
    tpu.vector_store %arg11[%c0_30, %c896], %87 {strides = array<i32>} : memref<256x1152xbf16, #tpu.memory_space<vmem>>, vector<256x128xbf16>,
    %c239_i32 = arith.constant 239 : i32
    %89 = tpu.dynamic_rotate %9 by %c239_i32 dim 0 : vector<256x128xf32>, i32 -> vector<256x128xf32>
    %90 = arith.andi %30, %34 : vector<256x1xi1>
    %cst_31 = arith.constant 0.000000e+00 : f32
    %91 = vector.shape_cast %90 : vector<256x1xi1> to vector<256x1xi1>
    %92 = vector.broadcast %91 : vector<256x1xi1> to vector<256x128xi1>
    %93 = vector.broadcast %cst_31 : f32 to vector<256x128xf32>
    %94 = arith.select %92, %89, %93 : vector<256x128xi1>, vector<256x128xf32>
    %95 = arith.truncf %94 : vector<256x128xf32> to vector<256x128xbf16>
    %c0_32 = arith.constant 0 : index
    %c1024 = arith.constant 1024 : index
    %96 = vector.load %arg11[%c0_32, %c1024] : memref<256x1152xbf16, #tpu.memory_space<vmem>>, vector<256x128xbf16>
    tpu.vector_store %arg11[%c0_32, %c1024], %95 {strides = array<i32>} : memref<256x1152xbf16, #tpu.memory_space<vmem>>, vector<256x128xbf16>,
    %c0_33 = arith.constant 0 : index
    %c0_34 = arith.constant 0 : index
    %97 = vector.load %arg11[%c0_33, %c0_34] : memref<256x1152xbf16, #tpu.memory_space<vmem>>, vector<256x1152xbf16>
    %c0_35 = arith.constant 0 : index
    %c0_36 = arith.constant 0 : index
    %98 = vector.load %arg4[%c0_35, %c0_36] : memref<1152x128xbf16, #tpu.memory_space<vmem>>, vector<1152x128xbf16>
    %cst_37 = arith.constant dense<0.000000e+00> : vector<256x128xf32>
    %99 = tpu.matmul %97, %98, %cst_37 {dimension_numbers = #tpu.dot_dimension_numbers<[1], [0], [0], [1], [0, 0, 1, 1], [], []>} : vector<256x1152xbf16>, vector<1152x128xbf16>, vector<256x128xf32> -> vector<256x128xf32>
    %c0_38 = arith.constant 0 : index
    %c0_39 = arith.constant 0 : index
    %100 = vector.load %arg5[%c0_38, %c0_39] : memref<1x128xf32, #tpu.memory_space<vmem>>, vector<1x128xf32>
    %101 = vector.broadcast %100 : vector<1x128xf32> to vector<256x128xf32>
    %102 = arith.addf %99, %101 : vector<256x128xf32>
    %cst_40 = arith.constant 1.000000e-01 : f32
    %103 = vector.broadcast %cst_40 : f32 to vector<256x128xf32>
    %104 = arith.mulf %103, %102 : vector<256x128xf32>
    %105 = arith.maximumf %102, %104 : vector<256x128xf32>
    %106 = arith.truncf %105 : vector<256x128xf32> to vector<256x128xbf16>
    %c0_41 = arith.constant 0 : index
    %c0_42 = arith.constant 0 : index
    %107 = vector.load %arg6[%c0_41, %c0_42] : memref<128x128xbf16, #tpu.memory_space<vmem>>, vector<128x128xbf16>
    %cst_43 = arith.constant dense<0.000000e+00> : vector<256x128xf32>
    %108 = tpu.matmul %106, %107, %cst_43 {dimension_numbers = #tpu.dot_dimension_numbers<[1], [0], [0], [1], [0, 0, 1, 1], [], []>} : vector<256x128xbf16>, vector<128x128xbf16>, vector<256x128xf32> -> vector<256x128xf32>
    %c0_44 = arith.constant 0 : index
    %c0_45 = arith.constant 0 : index
    %109 = vector.load %arg7[%c0_44, %c0_45] : memref<1x128xf32, #tpu.memory_space<vmem>>, vector<1x128xf32>
    %110 = vector.broadcast %109 : vector<1x128xf32> to vector<256x128xf32>
    %111 = arith.addf %108, %110 : vector<256x128xf32>
    %cst_46 = arith.constant 1.000000e+00 : bf16
    %112 = vector.broadcast %cst_46 : bf16 to vector<1x256xbf16>
    %113 = arith.truncf %111 : vector<256x128xf32> to vector<256x128xbf16>
    %cst_47 = arith.constant dense<0.000000e+00> : vector<1x128xf32>
    %114 = tpu.matmul %112, %113, %cst_47 {dimension_numbers = #tpu.dot_dimension_numbers<[1], [0], [0], [1], [0, 0, 1, 1], [], []>} : vector<1x256xbf16>, vector<256x128xbf16>, vector<1x128xf32> -> vector<1x128xf32>
    %cst_48 = arith.constant 3.906250e-03 : f32
    %115 = vector.broadcast %cst_48 : f32 to vector<1x128xf32>
    %116 = arith.mulf %114, %115 : vector<1x128xf32>
    %117 = arith.truncf %116 : vector<1x128xf32> to vector<1x128xbf16>
    %c0_49 = arith.constant 0 : index
    %c0_50 = arith.constant 0 : index
    %118 = vector.load %arg8[%c0_49, %c0_50] : memref<128x128xbf16, #tpu.memory_space<vmem>>, vector<128x128xbf16>
    %cst_51 = arith.constant dense<0.000000e+00> : vector<1x128xf32>
    %119 = tpu.matmul %117, %118, %cst_51 {dimension_numbers = #tpu.dot_dimension_numbers<[1], [0], [0], [1], [0, 0, 1, 1], [], []>} : vector<1x128xbf16>, vector<128x128xbf16>, vector<1x128xf32> -> vector<1x128xf32>
    %cst_52 = arith.constant 0.000000e+00 : f32
    %120 = vector.broadcast %cst_52 : f32 to vector<1x128xf32>
    %121 = arith.maximumf %119, %120 : vector<1x128xf32>
    %122 = arith.truncf %121 : vector<1x128xf32> to vector<1x128xbf16>
    %c0_53 = arith.constant 0 : index
    %c0_54 = arith.constant 0 : index
    %123 = vector.load %arg9[%c0_53, %c0_54] : memref<128x128xbf16, #tpu.memory_space<vmem>>, vector<128x128xbf16>
    %cst_55 = arith.constant dense<0.000000e+00> : vector<1x128xf32>
    %124 = tpu.matmul %122, %123, %cst_55 {dimension_numbers = #tpu.dot_dimension_numbers<[1], [0], [0], [1], [0, 0, 1, 1], [], []>} : vector<1x128xbf16>, vector<128x128xbf16>, vector<1x128xf32> -> vector<1x128xf32>
    %125 = arith.negf %124 : vector<1x128xf32>
    %126 = math.exp %125 : vector<1x128xf32>
    %cst_56 = arith.constant 1.000000e+00 : f32
    %127 = vector.broadcast %cst_56 : f32 to vector<1x128xf32>
    %128 = arith.addf %127, %126 : vector<1x128xf32>
    %129 = arith.divf %127, %128 : vector<1x128xf32>
    %130 = vector.broadcast %129 : vector<1x128xf32> to vector<256x128xf32>
    %131 = arith.mulf %111, %130 : vector<256x128xf32>
    %132 = arith.extf %1 : vector<256x128xbf16> to vector<256x128xf32>
    %133 = arith.addf %131, %132 : vector<256x128xf32>
    %cst_57 = arith.constant 1.000000e-01 : f32
    %134 = vector.broadcast %cst_57 : f32 to vector<256x128xf32>
    %135 = arith.mulf %134, %133 : vector<256x128xf32>
    %136 = arith.maximumf %133, %135 : vector<256x128xf32>
    %137 = arith.truncf %136 : vector<256x128xf32> to vector<256x128xbf16>
    %c0_58 = arith.constant 0 : index
    %c0_59 = arith.constant 0 : index
    %c0_60 = arith.constant 0 : index
    %138 = vector.load %arg10[%c0_58, %c0_59, %c0_60] : memref<1x256x128xbf16, #tpu.memory_space<vmem>>, vector<1x256x128xbf16>
    %139 = vector.shape_cast %138 : vector<1x256x128xbf16> to vector<256x128xbf16>
    %140 = vector.shape_cast %137 : vector<256x128xbf16> to vector<1x256x128xbf16>
    tpu.vector_store %arg10[%c0_58, %c0_59, %c0_60], %140 {strides = array<i32>} : memref<1x256x128xbf16, #tpu.memory_space<vmem>>, vector<1x256x128xbf16>,
    return
  }
  func.func @transform_0(%arg0: i32) -> (i32, i32, i32) {
    %c0_i32 = arith.constant 0 : i32
    %c0_i32_0 = arith.constant 0 : i32
    %c0_i32_1 = arith.constant 0 : i32
    return %arg0, %c0_i32, %c0_i32_0 : i32, i32, i32
  }
  func.func @transform_1(%arg0: i32) -> (i32, i32) {
    %c0_i32 = arith.constant 0 : i32
    %c0_i32_0 = arith.constant 0 : i32
    %c0_i32_1 = arith.constant 0 : i32
    return %c0_i32, %c0_i32_0 : i32, i32
  }
  func.func @transform_2(%arg0: i32) -> (i32, i32) {
    %c0_i32 = arith.constant 0 : i32
    %c0_i32_0 = arith.constant 0 : i32
    %c0_i32_1 = arith.constant 0 : i32
    return %c0_i32, %c0_i32_0 : i32, i32
  }
  func.func @transform_3(%arg0: i32) -> (i32, i32) {
    %c0_i32 = arith.constant 0 : i32
    %c0_i32_0 = arith.constant 0 : i32
    %c0_i32_1 = arith.constant 0 : i32
    return %c0_i32, %c0_i32_0 : i32, i32
  }
  func.func @transform_4(%arg0: i32) -> (i32, i32) {
    %c0_i32 = arith.constant 0 : i32
    %c0_i32_0 = arith.constant 0 : i32
    %c0_i32_1 = arith.constant 0 : i32
    return %c0_i32, %c0_i32_0 : i32, i32
  }
  func.func @transform_5(%arg0: i32) -> (i32, i32) {
    %c0_i32 = arith.constant 0 : i32
    %c0_i32_0 = arith.constant 0 : i32
    %c0_i32_1 = arith.constant 0 : i32
    return %c0_i32, %c0_i32_0 : i32, i32
  }
  func.func @transform_6(%arg0: i32) -> (i32, i32) {
    %c0_i32 = arith.constant 0 : i32
    %c0_i32_0 = arith.constant 0 : i32
    %c0_i32_1 = arith.constant 0 : i32
    return %c0_i32, %c0_i32_0 : i32, i32
  }
  func.func @transform_7(%arg0: i32) -> (i32, i32) {
    %c0_i32 = arith.constant 0 : i32
    %c0_i32_0 = arith.constant 0 : i32
    %c0_i32_1 = arith.constant 0 : i32
    return %c0_i32, %c0_i32_0 : i32, i32
  }
  func.func @transform_8(%arg0: i32) -> (i32, i32) {
    %c0_i32 = arith.constant 0 : i32
    %c0_i32_0 = arith.constant 0 : i32
    %c0_i32_1 = arith.constant 0 : i32
    return %c0_i32, %c0_i32_0 : i32, i32
  }
  func.func @transform_9(%arg0: i32) -> (i32, i32, i32) {
    %c0_i32 = arith.constant 0 : i32
    %c0_i32_0 = arith.constant 0 : i32
    %c0_i32_1 = arith.constant 0 : i32
    return %arg0, %c0_i32, %c0_i32_0 : i32, i32, i32
  }
}

</mosaic_0001>

<bundles_post_ra>
// kernel: tpu_custom_call.1
= control target key start
LH: loop header
LB: loop body
LE: loop exit
PB: predicated region body
PF: predicated region fallthrough
CT: control target
= control target key end

     0   :  { %s10130_s0 = inlined_call_operand.hbm [shape: bf16[4,256,128], index: 0, kind: input, shape index: {}]   ;;  %s10131_s1 = inlined_call_operand.hbm [shape: bf16[128,128], index: 1, kind: input, shape index: {}]   ;;  %s10132_s2 = inlined_call_operand.vmem [shape: f32[1,128], index: 2, kind: input, shape index: {}]   ;;  %s10133_s3 = inlined_call_operand.hbm [shape: bf16[1152,128], index: 3, kind: input, shape index: {}]   ;;  %s10134_s4 = inlined_call_operand.vmem [shape: f32[1,128], index: 4, kind: input, shape index: {}]   ;;  %s10135_s5 = inlined_call_operand.hbm [shape: bf16[128,128], index: 5, kind: input, shape index: {}]   ;;  %s10136_s6 = inlined_call_operand.vmem [shape: f32[1,128], index: 6, kind: input, shape index: {}]   ;;  %s10137_s7 = inlined_call_operand.hbm [shape: bf16[128,128], index: 7, kind: input, shape index: {}]   ;;  %s10138_s8 = inlined_call_operand.hbm [shape: bf16[128,128], index: 8, kind: input, shape index: {}]   ;;  %s10139_s9 = inlined_call_operand.hbm [shape: bf16[4,256,128], index: 9, kind: output, shape index: {}]  }
   0x1   :  { %10142 = sst [smem:[#allocation80_spill]] %s10131_s1 }
   0x2   :  { %10143 = sst [smem:[#allocation81_spill]] %s10133_s3 }
   0x3   :  { %10144 = sst [smem:[#allocation82_spill]] %s10135_s5 }
   0x4   :  { %14 = vsyncpa [#allocation4], 0 }
   0x5   :  { %16 = vsyncpa [#allocation4 + $0x1], 0 }
   0x6   :  { %17 = vsyncpa [#allocation7], 0 }
   0x7   :  { %18 = vsyncpa [#allocation10], 0 }
   0x8   :  { %19 = vsyncpa [#allocation13], 0 }
   0x9   :  { %20 = vsyncpa [#allocation5], 0 }
   0xa   :  { %22 = vsyncpa [#allocation5 + $0x1], 0  ;;  %s7927_s30 = smov 0   ;;  %s7929_s10 = smov 0  }
   0xb   :  { %s7931_s11 = smov 0   ;;  %s7933_s12 = smov 0  }
   0xc LB: > { %s10145_s1 = sld [smem:[#allocation80_spill]]  ;;  %s7951_s16 = sadd.s32 4294967295, %s7864_s12   ;;  %s7864_s12 = sphi %s7933_s12, %s10384_s12   ;;  %s7860_s11 = sphi %s7931_s11, %s10383_s11   ;;  %s7856_s10 = sphi %s7929_s10, %s10382_s10   ;;  %s7852_s30 = sphi %s7927_s30, %s10381_s30  }
   0xd   : > { %p6029_p0 = scmp.ge.s32.totalorder %s7864_s12, 1  ;;  %p49_p1 = scmp.eq.s32.totalorder %s7951_s16, 0 }
   0xe   : > { %p253_p2 = scmp.lt.s32.totalorder %s7864_s12, 5  ;;  %s7866_s18 = smov [#allocation6]  }
   0xf   : > { %s266_s19 = sshll.u32 %s7866_s18, 4  ;;  %s10147_s5 = sld [smem:[#allocation82_spill]]  ;;  %s267_s19 = int_to_ptr.vmem [resolvable:$true] %s266_s19 }
  0x10   : > { %p7956_p3 = pnand %p6029_p0, %p253_p2  ;;  %s10149_s3 = sld [smem:[#allocation81_spill]] }
  0x11   : > { %s7867_s27 = smov [#allocation9]   ;;  %s10140_s29 = smov 64  }
  0x12   : > { %s264_s15 = sshll.u32 %s10145_s1, 4  ;;  %p7518_p4 = pneg %p7956_p3  ;;  %s265_s15 = int_to_ptr.hbm [resolvable:$true] %s264_s15 }
  0x13   : > { %s300_s28 = sshll.u32 %s7867_s27, 4  ;;  %s10141_s13 = smov 4   ;;  %s301_s28 = int_to_ptr.vmem [resolvable:$true] %s300_s28 }
  0x14   : > { %p7967_p5 = pnand %p7518_p4, %p49_p1  ;;  %s315_s20 = sshll.u32 %s10137_s7, 4  ;;  %s316_s20 = int_to_ptr.hbm [resolvable:$true] %s315_s20 }
  0x15   : > { %s298_s22 = sshll.u32 %s10147_s5, 4  ;;  %s7870_s21 = smov [#allocation8]   ;;  %s299_s22 = int_to_ptr.hbm [resolvable:$true] %s298_s22 }
  0x16   : > { %s281_s26 = sshll.u32 %s10149_s3, 4  ;;  %s283_s24 = sshll.u32 %s7870_s21, 4  ;;  %s282_s26 = int_to_ptr.hbm [resolvable:$true] %s281_s26  ;;  %s284_s24 = int_to_ptr.vmem [resolvable:$true] %s283_s24 }
  0x17   : > { %7521 = dma.hbm_to_vmem [thread:$0]  (!%p7967_p5), %s265_s15, 1024, %s267_s19, [#allocation7], %s10140_s29, %s10140_s29, %s10141_s13  }
  0x18   : > { %7527 = dma.hbm_to_vmem [thread:$0]  (!%p7967_p5), %s299_s22, 1024, %s301_s28, [#allocation10], %s10140_s29, %s10140_s29, %s10141_s13  }
  0x19   : > { %7524 = dma.hbm_to_vmem [thread:$0]  (!%p7967_p5), %s282_s26, 9216, %s284_s24, [#allocation7], %s10140_s29, %s10140_s29, %s10141_s13  }
  0x1a   : > { %s7871_s15 = smov [#allocation11]   ;;  %s329_s27 = sshll.u32 %s10138_s8, 4  ;;  %s330_s27 = int_to_ptr.hbm [resolvable:$true] %s329_s27 }
  0x1b   : > { %s317_s19 = sshll.u32 %s7871_s15, 4  ;;  %s7872_s26 = smov [#allocation12]   ;;  %s318_s19 = int_to_ptr.vmem [resolvable:$true] %s317_s19 }
  0x1c   : > { %7530 = dma.hbm_to_vmem [thread:$0]  (!%p7967_p5), %s316_s20, 1024, %s318_s19, [#allocation10], %s10140_s29, %s10140_s29, %s10141_s13  }
  0x1d   : > { %s331_s28 = sshll.u32 %s7872_s26, 4  ;;  %s6028_s14 = sadd.s32 4294967294, %s7864_s12   ;;  %s332_s28 = int_to_ptr.vmem [resolvable:$true] %s331_s28 }
  0x1e   : > { %7533 = dma.hbm_to_vmem [thread:$0]  (!%p7967_p5), %s330_s27, 1024, %s332_s28, [#allocation13], %s10140_s29, %s10140_s29, %s10141_s13  }
  0x1f   : > { %s8007_s18 = sadd.s32 1, %s7864_s12   ;;  %s35_s21 = sadd.s32 1, %s7860_s11 }
  0x20   : > { %s32_s24 = ssub.s32 %s7864_s12, %s8007_s18  ;;  %p42_p6 = scmp.ne.s32.totalorder %s7860_s11, %s7856_s10 }
  0x21   : > { %p33_p7 = scmp.eq.s32.totalorder %s32_s24, 0  ;;  %p43_p8 = scmp.eq.s32.totalorder %s7864_s12, 0 }
  0x22   : > { %p48_p9 = scmp.ne.s32.totalorder %s7856_s10, %s7852_s30  ;;  %p240_p10 = scmp.eq.s32.totalorder %s7951_s16, 3 }
  0x23   : > { %s8019_s20 = scalar_select %p33_p7, %s7860_s11, %s35_s21  }
  0x24   : > { %p8023_p11 = por %p49_p1, %p48_p9  ;;  %p8027_p12 = por %p240_p10, %p42_p6 }
  0x25   : > { %p246_p13 = scmp.eq.s32.totalorder %s6028_s14, 3  ;;  %p44_p0 = por %p43_p8, %p42_p6 }
  0x26   : > { %s345_s19 = sand.u32 1, %s7860_s11   ;;  %p7547_p4 = scmp.lt.s32.totalorder %s7864_s12, 4 }
  0x27   : > { %p8032_p2 = por %p246_p13, %p48_p9  ;;  %s6036_s25 = sshll.u32 %s345_s19, 7 }
  0x28   : > { %s7109_s27 = sshll.u32 %s7864_s12, 7  ;;  %s349_s29 = scalar_lea.vmem [#allocation3], %s6036_s25 }
  0x29   : > { %s354_s21 = scalar_lea.hbm %s10130_s0, %s7109_s27  ;;  %s357_s13 = sshll.u32 %s349_s29, 4  ;;  %s358_s13 = int_to_ptr.vmem [resolvable:$true] %s357_s13 }
  0x2a   : > { %s355_s24 = sshll.u32 %s354_s21, 4  ;;  %p8041_p5 = pnand %p7547_p4, %p44_p0  ;;  %s356_s24 = int_to_ptr.hbm [resolvable:$true] %s355_s24 }
  0x2b   : > { %s346_s1 = scalar_lea.sflag [#allocation4], %s345_s19  ;;  %s7756_s3 = sshra.s32 %s356_s24, 4  ;;  %s7757_s3 = int_to_ptr.hbm [resolvable:$true] %s7756_s3 }
  0x2c   : > { %s7758_s5 = scalar_lea.hbm %s7757_s3, 128  ;;  %p7760_p7 = pneg %p8041_p5 }
  0x2d   : > { %p7759_p6 = scmp.ne.s32.totalorder %s7757_s3, %s7758_s5  ;;  %s7763_s29 = scalar_lea.hbm %s10130_s0, 512 }
  0x2e   : > { %p7764_p10 = scmp.lt.s32.totalorder %s7757_s3, %s10130_s0  ;;  %p7765_p13 = scmp.lt.s32.totalorder %s7763_s29, %s7758_s5 }
  0x2f   : > { %p7761_p8 = pnand %p7760_p7, %p7759_p6 }
  0x30   : > { %p7766_p0 = por %p7765_p13, %p7764_p10 }
  0x31   : > { %p7762_p9 = pneg %p7761_p8 }
  0x33   : > { %p7767_p4 = pnand %p7766_p0, %p7762_p9 }
  0x35   : > { %7770 = shalt.err (!%p7767_p4)
}
  0x36   : > { %s10154_s19 = smov 4   ;;  %s10155_s21 = smov 64  }
  0x37   : > { %7537 = dma.hbm_to_vmem [thread:$0]  (!%p8041_p5), %s356_s24, 2048, %s358_s13, %s346_s1, %s10155_s21, %s10155_s21, %s10154_s19  }
  0x38   : > { %369 = sbr.rel (%p7956_p3) target bundleno = 1889 (0x761), region = 56 }
  0x3d   : > { %s8061_s27 = sand.u32 1, %s7856_s10  }
  0x3e   : > { %s6040_s3 = sshll.u32 %s8061_s27, 7  ;;  %s372_s5 = scalar_lea.sflag [#allocation4], %s8061_s27 }
  0x3f   : > { %s8067_s26 = scalar_lea.vmem [#allocation3], %s6040_s3 }
  0x40   : > { %7831 = dma.done.wait (%p8023_p11), %s372_s5, 2048  }
  0x41   : > { %7833 = vsyncadd (%p8023_p11), %s372_s5, 4294965248 }
  0x42   : > { %7835 = dma.done.wait (%p49_p1), [#allocation7], 10240  }
  0x43   : > { %7837 = vsyncadd (%p49_p1), [#allocation7], 4294957056 }
  0x44   : > { %7839 = dma.done.wait (%p49_p1), [#allocation10], 2048  }
  0x45   : > { %7841 = vsyncadd (%p49_p1), [#allocation10], 4294965248 }
  0x46   : > { %7843 = dma.done.wait (%p49_p1), [#allocation13], 1024  }
  0x47   : > { %7845 = vsyncadd (%p49_p1), [#allocation13], 4294966272  ;;  %v7133_v0 = vld [vmem:[#allocation6 + $0x38] sm:$0xff]  ;;  %v7132_v1 = vld [vmem:[#allocation6 + $0x30] sm:$0xff]  ;;  %v7873_v24 = vmov 0.0|0.0   ;;  %v786_v41 = vlaneseq  ;;  %s10062_s21 = scalar_lea.vmem [#allocation14], %s6040_s3 }
  0x48   : > { %633 = vmatpush.bf16.msra.mxu0 %v7133_v0  ;;  %7470 = vmatpush.bf16.msra.mxu3 %v7133_v0  ;;  %v7131_v2 = vld [vmem:[#allocation6 + $0x28] sm:$0xff]  ;;  %v7130_v3 = vld [vmem:[#allocation6 + $0x20] sm:$0xff]  ;;  %v7129_v4 = vld [vmem:[#allocation6 + $0x18] sm:$0xff]  ;;  %1716 = vst [vmem:[#allocation2 + $0x4] sm:$0xf] %v7873_v24  ;;  %s7374_s3 = sshll.u32 %s7951_s16, 7 }
  0x49   : > { %v7128_v5 = vld [vmem:[#allocation6 + $0x10] sm:$0xff]  ;;  %v7127_v6 = vld [vmem:[#allocation6 + $0x8] sm:$0xff]  ;;  %v7126_v7 = vld [vmem:[#allocation6] sm:$0xff]  ;;  %1717 = vst [vmem:[#allocation2 + $0x28] sm:$0xf] %v7873_v24  ;;  %v8132_v48 = vshrl.u32 %v786_v41, 7 }
  0x4a   : > { %v7110_v8 = vld [vmem:[%s8067_s26] sm:$0xff]  ;;  %v7124_v9 = vld [vmem:[%s8067_s26 + $0x70] sm:$0xff]  ;;  %v7111_v10 = vld [vmem:[%s8067_s26 + $0x8] sm:$0xff]  ;;  %1556 = vst [vmem:[#allocation2] sm:$0xf] %v7873_v24  ;;  %s5904_s1 = sshll.u32 %s10062_s21, 4  ;;  %s5905_s1 = int_to_ptr.vmem [resolvable:$true] %s5904_s1 }
  0x4b   : > { %v7125_v11 = vld [vmem:[%s8067_s26 + $0x78] sm:$0xff]  ;;  %v7112_v12 = vld [vmem:[%s8067_s26 + $0x10] sm:$0xff]  ;;  %v7114_v14 = vld [vmem:[%s8067_s26 + $0x20] sm:$0xff]  ;;  %1557 = vst [vmem:[#allocation2 + $0x24] sm:$0xf] %v7873_v24  ;;  %v788_v51 = vadd.s32 8, %v8132_v48 }
  0x4c   : > { %634 = vmatpush.bf16.msra.mxu0 %v7132_v1  ;;  %7471 = vmatpush.bf16.msra.mxu3 %v7132_v1  ;;  %v7113_v13 = vld [vmem:[%s8067_s26 + $0x18] sm:$0xff]  ;;  %v8095_v16 = vld [vmem:[#allocation8 + $0x70] sm:$0xff]  ;;  %v7115_v17 = vld [vmem:[%s8067_s26 + $0x28] sm:$0xff]  ;;  %1973 = vst [vmem:[#allocation2 + $0x8] sm:$0xf] %v7873_v24  ;;  %v789_v52 = vadd.s32 16, %v8132_v48 }
  0x4d   : > { %v8092_v15 = vld [vmem:[#allocation8 + $0x78] sm:$0xff]  ;;  %v8099_v18 = vld [vmem:[#allocation8 + $0x68] sm:$0xff]  ;;  %v8102_v19 = vld [vmem:[#allocation8 + $0x60] sm:$0xff]  ;;  %1974 = vst [vmem:[#allocation2 + $0x2c] sm:$0xf] %v7873_v24  ;;  %vm1363_vm0 = vcmp.lt.s32.totalorder %v8132_v48, 1 }
  0x4e   : > { %4498 = vmatpush.bf16.msra.mxu2 %v8092_v15  ;;  %v8105_v20 = vld [vmem:[#allocation8 + $0x58] sm:$0xff]  ;;  %v7116_v21 = vld [vmem:[%s8067_s26 + $0x30] sm:$0xff]  ;;  %v8112_v23 = vld [vmem:[#allocation8 + $0x48] sm:$0xff]  ;;  %2579 = vst [vmem:[#allocation2 + $0x450] sm:$0xf] %v7873_v24  ;;  %vm1780_vm1 = vcmp.lt.s32.totalorder %v8132_v48, 7 }
  0x4f   : > { %v8109_v22 = vld [vmem:[#allocation8 + $0x50] sm:$0xff]  ;;  %v7285_v25 = vld [vmem:[#allocation8 + $0x38] sm:$0xff]  ;;  %v8115_v26 = vld [vmem:[#allocation8 + $0x40] sm:$0xff]  ;;  %2580 = vst [vmem:[#allocation2 + $0x474] sm:$0xf] %v7873_v24  ;;  %v791_v58 = vadd.s32 32, %v8132_v48 }
  0x50   : > { %635 = vmatpush.bf16.msra.mxu0 %v7131_v2  ;;  %7472 = vmatpush.bf16.msra.mxu3 %v7131_v2  ;;  %v7284_v27 = vld [vmem:[#allocation8 + $0x30] sm:$0xff]  ;;  %v7134_v28 = vld [vmem:[#allocation2 + $0x4] sm:$0xf]  ;;  %v6147_v29 = vld [vmem:[#allocation2 + $0x24] sm:$0xf0]  ;;  %v790_v2 = vadd.s32 24, %v8132_v48 }
  0x51   : > { %4409 = vmatpush.bf16.msra.mxu1 %v7285_v25  ;;  %2739 = vst [vmem:[#allocation2 + $0x454] sm:$0xf] %v7873_v24  ;;  %v6150_v30 = vor.u32 %v7134_v28, %v6147_v29  ;;  %v7117_v31 = vld [vmem:[%s8067_s26 + $0x38] sm:$0xff]  ;;  %v7283_v32 = vld [vmem:[#allocation8 + $0x28] sm:$0xff]  ;;  %v8122_v33 = vld [vmem:[%s10132_s2] ss:$0 sm:$0xff] }
  0x52   : > { %4499 = vmatpush.bf16.msra.mxu2 %v8095_v16  ;;  %2740 = vst [vmem:[#allocation2 + $0x478] sm:$0xf] %v7873_v24  ;;  %v7118_v34 = vld [vmem:[%s8067_s26 + $0x40] sm:$0xff]  ;;  %v7281_v39 = vld [vmem:[#allocation8 + $0x18] sm:$0xff]  ;;  %v7280_v59 = vld [vmem:[#allocation8 + $0x10] sm:$0xff]  ;;  %v794_v29 = vadd.s32 56, %v8132_v48 }
  0x53   : > { %2931 = vst [vmem:[#allocation2 + $0x458] sm:$0xf] %v7873_v24  ;;  %v7282_v35 = vld [vmem:[#allocation8 + $0x20] sm:$0xff]  ;;  %v7119_v0 = vld [vmem:[%s8067_s26 + $0x48] sm:$0xff]  ;;  %s5892_s13 = scalar_lea.sflag [#allocation5], %s8061_s27  ;;  %s7806_s25 = scalar_lea.hbm %s10139_s9, 512 }
  0x54   : > { %636 = vmatpush.bf16.msra.mxu0 %v7130_v3  ;;  %7473 = vmatpush.bf16.msra.mxu3 %v7130_v3  ;;  %2932 = vst [vmem:[#allocation2 + $0x47c] sm:$0xf] %v7873_v24  ;;  %v823_v3 = vand.u32 15, %v8132_v48  ;;  %v7279_v24 = vld [vmem:[#allocation8 + $0x8] sm:$0xff] }
  0x55   : > { %4410 = vmatpush.bf16.msra.mxu1 %v7284_v27 }
  0x56   : > { %4500 = vmatpush.bf16.msra.mxu2 %v8099_v18  ;;  %vm8170_vm2 = vcmp.ge.s32.totalorder %v823_v3, 1 }
  0x58   : > { %637 = vmatpush.bf16.msra.mxu0 %v7129_v4  ;;  %7474 = vmatpush.bf16.msra.mxu3 %v7129_v4  ;;  %v830_v4 = vand.u32 15, %v788_v51 }
  0x59   : > { %4411 = vmatpush.bf16.msra.mxu1 %v7283_v32 }
  0x5a   : > { %4501 = vmatpush.bf16.msra.mxu2 %v8102_v19  ;;  %vm8178_vm4 = vcmp.le.s32.totalorder %v830_v4, 14 }
  0x5c   : > { %638 = vmatpush.bf16.msra.mxu0 %v7128_v5  ;;  %7475 = vmatpush.bf16.msra.mxu3 %v7128_v5  ;;  %v837_v5 = vand.u32 15, %v789_v52 }
  0x5d   : > { %4412 = vmatpush.bf16.msra.mxu1 %v7282_v35 }
  0x5e   : > { %4502 = vmatpush.bf16.msra.mxu2 %v8105_v20  ;;  %vm8174_vm3 = vcmp.ge.s32.totalorder %v837_v5, 1 }
  0x60   : > { %639 = vmatpush.bf16.msra.mxu0 %v7127_v6  ;;  %7476 = vmatpush.bf16.msra.mxu3 %v7127_v6 }
  0x61   : > { %4413 = vmatpush.bf16.msra.mxu1 %v7281_v39 }
  0x62   : > { %4503 = vmatpush.bf16.msra.mxu2 %v8109_v22 }
  0x64   : > { %640 = vmatpush.bf16.msra.mxu0 %v7126_v7  ;;  %7477 = vmatpush.bf16.msra.mxu3 %v7126_v7 }
  0x65   : > { %4414 = vmatpush.bf16.msra.mxu1 %v7280_v59 }
  0x66   : > { %4504 = vmatpush.bf16.msra.mxu2 %v8112_v23 }
  0x67   : > { %641 = vmatmul.bf16.vlgmr.msra.gmra.mxu0 %v7110_v8  ;;  %711 = vmatmul.bf16.vlgmr.msra.gmra.mxu3 %v7124_v9 }
  0x68   : > { %7478 = vmatpush.bf16.msrb.mxu3 %v7285_v25  ;;  %v844_v25 = vand.u32 15, %v790_v2 }
  0x69   : > { %4415 = vmatpush.bf16.msra.mxu1 %v7279_v24 }
  0x6a   : > { %4505 = vmatpush.bf16.msra.mxu2 %v8115_v26  ;;  %vm8213_vm6 = vcmp.le.s32.totalorder %v844_v25, 14 }
  0x6c   : > { %7479 = vmatpush.bf16.msrb.mxu3 %v7284_v27 }
  0x6d   : > { %4506 = vmatmul.bf16.vlgmr.msra.gmra.mxu2 %v6150_v30 }
  0x70   : > { %7480 = vmatpush.bf16.msrb.mxu3 %v7283_v32 }
  0x74   : > { %7481 = vmatpush.bf16.msrb.mxu3 %v7282_v35  ;;  %v797_v35 = vadd.s32 80, %v8132_v48 }
  0x77   : > { %646 = vmatmul.bf16.gmra.mxu0 %v7111_v10  ;;  %716 = vmatmul.bf16.gmra.mxu3 %v7125_v11 }
  0x78   : > { %7482 = vmatpush.bf16.msrb.mxu3 %v7281_v39  ;;  %v817_v39 = vadd.s32 240, %v8132_v48 }
  0x7c   : > { %7483 = vmatpush.bf16.msrb.mxu3 %v7280_v59 }
  0x80   : > { %7484 = vmatpush.bf16.msrb.mxu3 %v7279_v24 }
  0x87   : > { %651 = vmatmul.bf16.gmra.mxu0 %v7112_v12 }
  0x97   : > { %656 = vmatmul.bf16.gmra.mxu0 %v7113_v13  ;;  %v851_v13 = vand.u32 15, %v791_v58 }
  0x99   : > { %vm8188_vm5 = vcmp.ge.s32.totalorder %v851_v13, 1 }
  0xa7   : > { %661 = vmatmul.bf16.gmra.mxu0 %v7114_v14 }
  0xb7   : > { %666 = vmatmul.bf16.gmra.mxu0 %v7115_v17 }
  0xc7   : > { %671 = vmatmul.bf16.gmra.mxu0 %v7116_v21 }
  0xd7   : > { %676 = vmatmul.bf16.gmra.mxu0 %v7117_v31 }
  0xe4   : > { %v642_v36 = vpop.f32.mrf.mxu0 }
  0xe5   : > { %v643_v37 = vadd.f32 %v8122_v33, %v642_v36 }
  0xe7   : > { %v722_v38 = vmul.f32 0.1, %v643_v37  ;;  %681 = vmatmul.bf16.gmra.mxu0 %v7118_v34 }
  0xe9   : > { %v8126_v40 = vmax.f32 %v643_v37, %v722_v38  ;;  %v8193_v37 = vadd.s32 216, %v8132_v48  ;;  %v815_v38 = vadd.s32 224, %v8132_v48 }
  0xea   : > { %v712_v42 = vpop.f32.mrf.mxu3 }
  0xeb   : > { %v1686_v43 = vpack.c.bf16 %v8126_v40, %v8126_v40  ;;  %v713_v44 = vadd.f32 %v8122_v33, %v712_v42  ;;  %v1331_v55 = vrot.slane %v8126_v40, 7  ;;  %v1748_v56 = vrot.slane %v8126_v40, 1 }
  0xec   : > { %v644_v45 = vpop.f32.mrf.mxu0 }
  0xed   : > { %1718 = vst [vmem:[#allocation2 + $0x4c] sm:$0xf] %v1686_v43  ;;  %v750_v46 = vmul.f32 0.1, %v713_v44  ;;  %v645_v47 = vadd.f32 %v8122_v33, %v644_v45 }
  0xee   : > { %2197 = vst [vmem:[#allocation2 + $0x10] sm:$0xf] %v1686_v43 }
  0xef   : > { %v8134_v49 = vmax.f32 %v713_v44, %v750_v46  ;;  %v723_v50 = vmul.f32 0.1, %v645_v47  ;;  %v816_v44 = vadd.s32 232, %v8132_v48 }
  0xf1   : > { %v1714_v53 = vpack.c.bf16 %v8134_v49, %v8134_v49  ;;  %v8140_v54 = vmax.f32 %v645_v47, %v723_v50  ;;  %v1359_v10 = vrot.slane %v8134_v49, 7  ;;  %v1776_v14 = vrot.slane %v8134_v49, 1 }
  0xf2   : > { %v714_v57 = vpop.f32.mrf.mxu3  ;;  %v1026_v5 = vand.u32 15, %v816_v44 }
  0xf3   : > { %1746 = vst [vmem:[#allocation2 + $0x43c] sm:$0xf] %v1714_v53  ;;  %v1332_v60 = vrot.slane %v8140_v54, 7  ;;  %v1687_v61 = vpack.c.bf16 %v8140_v54, %v8140_v54  ;;  %v1749_v62 = vrot.slane %v8140_v54, 1  ;;  %v715_v63 = vadd.f32 %v8122_v33, %v714_v57 }
  0xf4   : > { %2225 = vst [vmem:[#allocation2 + $0x400] sm:$0xf] %v1714_v53  ;;  %v647_v1 = vpop.f32.mrf.mxu0  ;;  %v818_v57 = vadd.s32 248, %v8132_v48  ;;  %v7143_v2 = vld [vmem:[#allocation2 + $0x4c] sm:$0xf]  ;;  %vm8257_vm9 = vcmp.le.s32.totalorder %v1026_v5, 14 }
  0xf5   : > { %2735 = vst [vmem:[#allocation2 + $0x3c4] sm:$0xf] %v1714_v53  ;;  %v1394_v6 = vsel %vm1363_vm0, %v1331_v55, %v1332_v60  ;;  %v1811_v7 = vsel %vm1780_vm1, %v1748_v56, %v1749_v62  ;;  %v751_v8 = vmul.f32 0.1, %v715_v63  ;;  %v648_v9 = vadd.f32 %v8122_v33, %v647_v1 }
  0xf6   : > { %v1527_v11 = vpack.c.bf16 %v1394_v6, %v1394_v6  ;;  %1719 = vst [vmem:[#allocation2 + $0x70] sm:$0xf] %v1687_v61  ;;  %v1943_v12 = vpack.c.bf16 %v1811_v7, %v1811_v7  ;;  %v1019_v1 = vand.u32 15, %v815_v38 }
  0xf7   : > { %2198 = vst [vmem:[#allocation2 + $0x34] sm:$0xf] %v1687_v61  ;;  %v8168_v17 = vmax.f32 %v715_v63, %v751_v8  ;;  %v724_v21 = vmul.f32 0.1, %v648_v9  ;;  %686 = vmatmul.bf16.gmra.mxu0 %v7119_v0  ;;  %v1033_v63 = vand.u32 15, %v817_v39 }
  0xf8   : > { %1559 = vst [vmem:[#allocation2 + $0x6c] sm:$0xf] %v1527_v11  ;;  %vm8253_vm8 = vcmp.ge.s32.totalorder %v1019_v1, 1  ;;  %v6145_v1 = vld [vmem:[#allocation2] sm:$0xf] }
  0xf9   : > { %1975 = vst [vmem:[#allocation2 + $0x50] sm:$0xf] %v1943_v12  ;;  %v1360_v30 = vrot.slane %v8168_v17, 7  ;;  %v1715_v31 = vpack.c.bf16 %v8168_v17, %v8168_v17  ;;  %v1777_v32 = vrot.slane %v8168_v17, 1  ;;  %v8186_v34 = vmax.f32 %v648_v9, %v724_v21 }
  0xfa   : > { %2134 = vst [vmem:[#allocation2 + $0x30] sm:$0xf] %v1527_v11  ;;  %v717_v36 = vpop.f32.mrf.mxu3  ;;  %v1040_v11 = vand.u32 15, %v818_v57  ;;  %vm8240_vm7 = vcmp.ge.s32.totalorder %v1033_v63, 1  ;;  %v7120_v57 = vld [vmem:[%s8067_s26 + $0x50] sm:$0xff] }
  0xfb   : > { %2357 = vst [vmem:[#allocation2 + $0x14] sm:$0xf] %v1943_v12  ;;  %v1366_v41 = vsel %vm1363_vm0, %v1359_v10, %v1360_v30  ;;  %v1783_v42 = vsel %vm1780_vm1, %v1776_v14, %v1777_v32  ;;  %v1333_v43 = vrot.slane %v8186_v34, 7  ;;  %v1750_v47 = vrot.slane %v8186_v34, 1  ;;  %v7312_v12 = vld [vmem:[#allocation8 + $0x110] sm:$0xff] }
  0xfc   : > { %v1555_v45 = vpack.c.bf16 %v1366_v41, %v1366_v41  ;;  %1747 = vst [vmem:[#allocation2 + $0x460] sm:$0xf] %v1715_v31  ;;  %v1971_v46 = vpack.c.bf16 %v1783_v42, %v1783_v42  ;;  %v718_v50 = vadd.f32 %v8122_v33, %v717_v36  ;;  %v649_v51 = vpop.f32.mrf.mxu0  ;;  %v1688_v8 = vpack.c.bf16 %v8186_v34, %v8186_v34 }
  0xfd   : > { %2226 = vst [vmem:[#allocation2 + $0x424] sm:$0xf] %v1715_v31  ;;  %v1393_v53 = vsel %vm1363_vm0, %v1332_v60, %v1333_v43  ;;  %v650_v58 = vadd.f32 %v8122_v33, %v649_v51  ;;  %v1810_v61 = vsel %vm1780_vm1, %v1749_v62, %v1750_v47  ;;  %v6183_v0 = vld [vmem:[#allocation2 + $0x6c] sm:$0xf0]  ;;  %v1012_v60 = vand.u32 15, %v8193_v37 }
  0xfe   : > { %1587 = vst [vmem:[#allocation2 + $0x45c] sm:$0xf] %v1555_v45  ;;  %v1496_v59 = vsel %vm8188_vm5, %v1393_v53, 0.0  ;;  %v1912_v3 = vsel %vm8213_vm6, %v1810_v61, 0.0  ;;  %v752_v4 = vmul.f32 0.1, %v718_v50  ;;  %v6186_v62 = vor.u32 %v7143_v2, %v6183_v0 }
  0xff   : > { %2003 = vst [vmem:[#allocation2 + $0x440] sm:$0xf] %v1971_v46  ;;  %v1528_v6 = vpack.c.bf16 %v1496_v59, %v1496_v59  ;;  %v2071_v54 = vsel %vm8174_vm3, %v1393_v53, 0.0  ;;  %v725_v7 = vmul.f32 0.1, %v650_v58  ;;  %v1944_v21 = vpack.c.bf16 %v1912_v3, %v1912_v3 }
 0x100   : > { %2162 = vst [vmem:[#allocation2 + $0x420] sm:$0xf] %v1555_v45  ;;  %v8238_v9 = vmax.f32 %v718_v50, %v752_v4  ;;  %v2294_v24 = vsel %vm8178_vm4, %v1810_v61, 0.0  ;;  %v2485_v25 = vsel %vm8170_vm2, %v1393_v53, 0.0  ;;  %4511 = vmatmul.bf16.gmra.mxu2 %v6186_v62  ;;  %v2103_v37 = vpack.c.bf16 %v2071_v54, %v2071_v54  ;;  %v7278_v53 = vld [vmem:[#allocation8] sm:$0xff] }
 0x101   : > { %2385 = vst [vmem:[#allocation2 + $0x404] sm:$0xf] %v1971_v46  ;;  %v8251_v41 = vmax.f32 %v650_v58, %v725_v7  ;;  %vm8261_vm10 = vcmp.le.s32.totalorder %v1040_v11, 14  ;;  %v2517_v58 = vpack.c.bf16 %v2485_v25, %v2485_v25  ;;  %vm8282_vm11 = vcmp.le.s32.totalorder %v1012_v60, 14  ;;  %4416 = vmatpush.bf16.msra.mxu1 %v7278_v53  ;;  %v7138_v2 = vld [vmem:[#allocation2 + $0x20] sm:$0xf0]  ;;  %7485 = vmatpush.bf16.msrb.mxu3 %v7278_v53 }
 0x102   : > { %2576 = vst [vmem:[#allocation2 + $0x3e4] sm:$0xf] %v1555_v45  ;;  %v719_v13 = vpop.f32.mrf.mxu3  ;;  %v1361_v38 = vrot.slane %v8238_v9, 7  ;;  %v1778_v39 = vrot.slane %v8238_v9, 1  ;;  %v2326_v45 = vpack.c.bf16 %v2294_v24, %v2294_v24  ;;  %v2195_v60 = vpack.c.bf16 %v8238_v9, %v8238_v9 }
 0x103   : > { %2736 = vst [vmem:[#allocation2 + $0x3e8] sm:$0xf] %v1715_v31  ;;  %v720_v36 = vadd.f32 %v8122_v33, %v719_v13  ;;  %v1751_v5 = vrot.slane %v8251_v41, 1  ;;  %v6146_v62 = vor.u32 %v7138_v2, %v6145_v1 }
 0x104   : > { %2927 = vst [vmem:[#allocation2 + $0x3c8] sm:$0xf] %v1971_v46  ;;  %v652_v31 = vpop.f32.mrf.mxu0  ;;  %v1365_v50 = vsel %vm1363_vm0, %v1360_v30, %v1361_v38  ;;  %v1782_v51 = vsel %vm1780_vm1, %v1777_v32, %v1778_v39  ;;  %v1334_v32 = vrot.slane %v8251_v41, 7 }
 0x105   : > { %1560 = vst [vmem:[#allocation2 + $0x90] sm:$0xf] %v1528_v6  ;;  %v1940_v59 = vsel %vm8261_vm10, %v1782_v51, 0.0  ;;  %v2099_v61 = vsel %vm8240_vm7, %v1365_v50, 0.0  ;;  %v753_v63 = vmul.f32 0.1, %v720_v36  ;;  %7486 = vmatpush.bf16.msra.mxu3 %v8092_v15  ;;  %4417 = vmatmul.bf16.vlgmr.msra.gmra.mxu1 %v6146_v62  ;;  %v1809_v15 = vsel %vm1780_vm1, %v1750_v47, %v1751_v5 }
 0x106   : > { %1720 = vst [vmem:[#allocation2 + $0x94] sm:$0xf] %v1688_v8  ;;  %v2322_v17 = vsel %vm8257_vm9, %v1782_v51, 0.0  ;;  %v1972_v0 = vpack.c.bf16 %v1940_v59, %v1940_v59  ;;  %v2131_v3 = vpack.c.bf16 %v2099_v61, %v2099_v61  ;;  %v2513_v4 = vsel %vm8253_vm8, %v1365_v50, 0.0  ;;  %v7121_v59 = vld [vmem:[%s8067_s26 + $0x58] sm:$0xff] }
 0x107   : > { %1976 = vst [vmem:[#allocation2 + $0x74] sm:$0xf] %v1944_v21  ;;  %691 = vmatmul.bf16.gmra.mxu0 %v7120_v57  ;;  %v785_v6 = vmax.f32 %v720_v36, %v753_v63  ;;  %v2354_v54 = vpack.c.bf16 %v2322_v17, %v2322_v17  ;;  %v2864_v7 = vsel %vm8282_vm11, %v1782_v51, 0.0  ;;  %v2545_v11 = vpack.c.bf16 %v2513_v4, %v2513_v4 }
 0x108   : > { %2135 = vst [vmem:[#allocation2 + $0x54] sm:$0xf] %v2103_v37  ;;  %v1392_v13 = vsel %vm1363_vm0, %v1333_v43, %v1334_v32  ;;  %v653_v21 = vadd.f32 %v8122_v33, %v652_v31  ;;  %v1689_v43 = vpack.c.bf16 %v8251_v41, %v8251_v41  ;;  %v1945_v31 = vpack.c.bf16 %v1809_v15, %v1809_v15 }
 0x109   : > { %2199 = vst [vmem:[#allocation2 + $0x58] sm:$0xf] %v1688_v8  ;;  %v1362_v25 = vrot.slane %v785_v6, 7  ;;  %v1529_v36 = vpack.c.bf16 %v1392_v13, %v1392_v13  ;;  %7487 = vmatpush.bf16.msra.mxu3 %v8095_v16  ;;  %v793_v47 = vadd.s32 48, %v8132_v48  ;;  %v792_v51 = vadd.s32 40, %v8132_v48 }
 0x10a   : > { %2358 = vst [vmem:[#allocation2 + $0x38] sm:$0xf] %v2326_v45  ;;  %v726_v37 = vmul.f32 0.1, %v653_v21  ;;  %v1779_v45 = vrot.slane %v785_v6, 1  ;;  %v2196_v2 = vpack.c.bf16 %v785_v6, %v785_v6 }
 0x10b   : > { %2549 = vst [vmem:[#allocation2 + $0x18] sm:$0xf] %v2517_v58  ;;  %v1395_v34 = vsel %vm1363_vm0, %v1362_v25, %v1331_v55  ;;  %v865_v57 = vand.u32 15, %v793_v47  ;;  %v1364_v58 = vsel %vm1363_vm0, %v1361_v38, %v1362_v25  ;;  %v858_v40 = vand.u32 15, %v792_v51 }
 0x10c   : > { %2709 = vst [vmem:[#allocation2 + $0x1c] sm:$0xf] %v1688_v8  ;;  %v654_v24 = vpop.f32.mrf.mxu0  ;;  %v2896_v8 = vpack.c.bf16 %v2864_v7, %v2864_v7  ;;  %v8318_v16 = vmax.f32 %v653_v21, %v726_v37  ;;  %v1494_v50 = vsel %vm8174_vm3, %v1395_v34, 0.0  ;;  %v2069_v55 = vsel %vm8170_vm2, %v1395_v34, 0.0 }
 0x10d   : > { %2004 = vst [vmem:[#allocation2 + $0x464] sm:$0xf] %v1972_v0  ;;  %7488 = vmatpush.bf16.msra.mxu3 %v8099_v18  ;;  %v1812_v18 = vsel %vm1780_vm1, %v1779_v45, %v1748_v56  ;;  %v1526_v61 = vpack.c.bf16 %v1494_v50, %v1494_v50  ;;  %v655_v27 = vadd.f32 %v8122_v33, %v654_v24  ;;  %vm8344_vm12 = vcmp.ge.s32.totalorder %v865_v57, 1  ;;  %v7152_v9 = vld [vmem:[#allocation2 + $0x94] sm:$0xf] }
 0x10e   : > { %2163 = vst [vmem:[#allocation2 + $0x444] sm:$0xf] %v2131_v3  ;;  %v1335_v63 = vrot.slane %v8318_v16, 7  ;;  %v1781_v38 = vsel %vm1780_vm1, %v1778_v39, %v1779_v45  ;;  %v2101_v17 = vpack.c.bf16 %v2069_v55, %v2069_v55  ;;  %v2132_v56 = vpack.c.bf16 %v1364_v58, %v1364_v58 }
 0x10f   : > { %2227 = vst [vmem:[#allocation2 + $0x448] sm:$0xf] %v2195_v60  ;;  %v2324_v0 = vsel %vm8261_vm10, %v1812_v18, 0.0  ;;  %v2355_v39 = vpack.c.bf16 %v1781_v38, %v1781_v38  ;;  %v727_v4 = vmul.f32 0.1, %v655_v27  ;;  %v2866_v6 = vsel %vm8257_vm9, %v1812_v18, 0.0 }
 0x110   : > { %2386 = vst [vmem:[#allocation2 + $0x428] sm:$0xf] %v2354_v54  ;;  %v1391_v46 = vsel %vm1363_vm0, %v1334_v32, %v1335_v63  ;;  %v2356_v54 = vpack.c.bf16 %v2324_v0, %v2324_v0  ;;  %vm8358_vm13 = vcmp.le.s32.totalorder %v858_v40, 14  ;;  %v2898_v21 = vpack.c.bf16 %v2866_v6, %v2866_v6  ;;  %v7122_v18 = vld [vmem:[%s8067_s26 + $0x60] sm:$0xff] }
 0x111   : > { %2577 = vst [vmem:[#allocation2 + $0x408] sm:$0xf] %v2545_v11  ;;  %7489 = vmatpush.bf16.msra.mxu3 %v8102_v19  ;;  %v1752_v19 = vrot.slane %v8318_v16, 1  ;;  %v1498_v11 = vsel %vm8344_vm12, %v1391_v46, 0.0  ;;  %v8371_v13 = vmax.f32 %v655_v27, %v727_v4  ;;  %v1690_v15 = vpack.c.bf16 %v8318_v16, %v8318_v16 }
 0x112   : > { %2737 = vst [vmem:[#allocation2 + $0x40c] sm:$0xf] %v2195_v60  ;;  %v1530_v41 = vpack.c.bf16 %v1498_v11, %v1498_v11  ;;  %v2487_v47 = vsel %vm8174_vm3, %v1391_v46, 0.0 }
 0x113   : > { %2928 = vst [vmem:[#allocation2 + $0x3ec] sm:$0xf] %v2896_v8  ;;  %v1808_v32 = vsel %vm1780_vm1, %v1751_v5, %v1752_v19  ;;  %v2073_v5 = vsel %vm8188_vm5, %v1391_v46, 0.0  ;;  %v1753_v50 = vrot.slane %v8371_v13, 1  ;;  %v2519_v28 = vpack.c.bf16 %v2487_v47, %v2487_v47 }
 0x114   : > { %1561 = vst [vmem:[#allocation2 + $0xb4] sm:$0xf] %v1529_v36  ;;  %v657_v53 = vpop.f32.mrf.mxu0  ;;  %v1914_v24 = vsel %vm8358_vm13, %v1808_v32, 0.0  ;;  %v2296_v37 = vsel %vm8213_vm6, %v1808_v32, 0.0  ;;  %v2105_v34 = vpack.c.bf16 %v2073_v5, %v2073_v5  ;;  %v2838_v45 = vsel %vm8178_vm4, %v1808_v32, 0.0 }
 0x115   : > { %1721 = vst [vmem:[#allocation2 + $0xb8] sm:$0xf] %v1689_v43  ;;  %7490 = vmatpush.bf16.msra.mxu3 %v8105_v20  ;;  %v658_v20 = vadd.f32 %v8122_v33, %v657_v53  ;;  %v795_v53 = vadd.s32 64, %v8132_v48  ;;  %v2328_v55 = vpack.c.bf16 %v2296_v37, %v2296_v37  ;;  %v2870_v58 = vpack.c.bf16 %v2838_v45, %v2838_v45  ;;  %v7306_v45 = vld [vmem:[#allocation8 + $0xe0] sm:$0xff] }
 0x116   : > { %1977 = vst [vmem:[#allocation2 + $0x98] sm:$0xf] %v1945_v31  ;;  %v1691_v40 = vpack.c.bf16 %v8371_v13, %v8371_v13 }
 0x117   : > { %2136 = vst [vmem:[#allocation2 + $0x78] sm:$0xf] %v1529_v36  ;;  %696 = vmatmul.bf16.gmra.mxu0 %v7121_v59  ;;  %v728_v8 = vmul.f32 0.1, %v658_v20  ;;  %v1807_v59 = vsel %vm1780_vm1, %v1752_v19, %v1753_v50 }
 0x118   : > { %2200 = vst [vmem:[#allocation2 + $0x7c] sm:$0xf] %v1689_v43  ;;  %v1947_v16 = vpack.c.bf16 %v1807_v59, %v1807_v59 }
 0x119   : > { %2359 = vst [vmem:[#allocation2 + $0x5c] sm:$0xf] %v1945_v31  ;;  %7491 = vmatpush.bf16.msra.mxu3 %v8109_v22  ;;  %v8389_v51 = vmax.f32 %v658_v20, %v728_v8  ;;  %v6217_v20 = vld [vmem:[#allocation2 + $0x90] sm:$0xf] }
 0x11a   : > { %2550 = vst [vmem:[#allocation2 + $0x3c] sm:$0xf] %v1529_v36  ;;  %v7147_v36 = vld [vmem:[#allocation2 + $0x68] sm:$0xf0] }
 0x11b   : > { %2710 = vst [vmem:[#allocation2 + $0x40] sm:$0xf] %v1689_v43  ;;  %v1946_v43 = vpack.c.bf16 %v1914_v24, %v1914_v24  ;;  %v1337_v27 = vrot.slane %v8389_v51, 7 }
 0x11c   : > { %2901 = vst [vmem:[#allocation2 + $0x20] sm:$0xf] %v1945_v31  ;;  %v6219_v3 = vld [vmem:[#allocation2 + $0xb4] sm:$0xf0]  ;;  %v659_v62 = vpop.f32.mrf.mxu0  ;;  %v1336_v31 = vrot.slane %v8371_v13, 7 }
 0x11d   : > { %1558 = vst [vmem:[#allocation2 + $0x48] sm:$0xf] %v1526_v61  ;;  %v6222_v60 = vor.u32 %v7152_v9, %v6219_v3  ;;  %7492 = vmatpush.bf16.msra.mxu3 %v8112_v23  ;;  %v879_v61 = vand.u32 15, %v795_v53  ;;  %v660_v38 = vadd.f32 %v8122_v33, %v659_v62  ;;  %v7308_v9 = vld [vmem:[#allocation8 + $0xf0] sm:$0xff]  ;;  %v7307_v62 = vld [vmem:[#allocation8 + $0xe8] sm:$0xff] }
 0x11e   : > { %2133 = vst [vmem:[#allocation2 + $0xc] sm:$0xf] %v2101_v17  ;;  %v1390_v23 = vsel %vm1363_vm0, %v1335_v63, %v1336_v31  ;;  %v7309_v17 = vld [vmem:[#allocation8 + $0xf8] sm:$0xff]  ;;  %v1389_v19 = vsel %vm1363_vm0, %v1336_v31, %v1337_v27 }
 0x11f   : > { %2164 = vst [vmem:[#allocation2 + $0x468] sm:$0xf] %v2132_v56  ;;  %4516 = vmatmul.bf16.gmra.mxu2 %v6222_v60  ;;  %v1531_v63 = vpack.c.bf16 %v1390_v23, %v1390_v23  ;;  %4676 = vmatpush.bf16.msrb.mxu0 %v7309_v17  ;;  %vm8408_vm14 = vcmp.ge.s32.totalorder %v879_v61, 1  ;;  %v2075_v13 = vsel %vm8344_vm12, %v1389_v19, 0.0  ;;  %v7123_v23 = vld [vmem:[%s8067_s26 + $0x68] sm:$0xff]  ;;  %v7305_v61 = vld [vmem:[#allocation8 + $0xd8] sm:$0xff] }
 0x120   : > { %2228 = vst [vmem:[#allocation2 + $0x46c] sm:$0xf] %v2196_v2  ;;  %v1500_v60 = vsel %vm8408_vm14, %v1389_v19, 0.0 }
 0x121   : > { %2387 = vst [vmem:[#allocation2 + $0x44c] sm:$0xf] %v2355_v39  ;;  %7493 = vmatpush.bf16.msra.mxu3 %v8115_v26  ;;  %v872_v26 = vand.u32 15, %v794_v29  ;;  %v1532_v11 = vpack.c.bf16 %v1500_v60, %v1500_v60 }
 0x122   : > { %2388 = vst [vmem:[#allocation2 + $0x470] sm:$0xf] %v2356_v54  ;;  %v7156_v54 = vld [vmem:[#allocation2 + $0xb0] sm:$0xf0] }
 0x123   : > { %2578 = vst [vmem:[#allocation2 + $0x42c] sm:$0xf] %v2132_v56  ;;  %v1754_v56 = vrot.slane %v8389_v51, 1  ;;  %vm8416_vm15 = vcmp.le.s32.totalorder %v872_v26, 14  ;;  %4677 = vmatpush.bf16.msrb.mxu0 %v7308_v9  ;;  %v6218_v24 = vor.u32 %v7156_v54, %v6217_v20  ;;  %v7303_v20 = vld [vmem:[#allocation8 + $0xc8] sm:$0xff] }
 0x124   : > { %2738 = vst [vmem:[#allocation2 + $0x430] sm:$0xf] %v2196_v2  ;;  %v6181_v25 = vld [vmem:[#allocation2 + $0x48] sm:$0xf]  ;;  %v662_v57 = vpop.f32.mrf.mxu0  ;;  %v729_v2 = vmul.f32 0.1, %v660_v38 }
 0x125   : > { %2929 = vst [vmem:[#allocation2 + $0x410] sm:$0xf] %v2355_v39  ;;  %v6182_v22 = vor.u32 %v7147_v36, %v6181_v25  ;;  %v1806_v39 = vsel %vm1780_vm1, %v1753_v50, %v1754_v56  ;;  %v663_v46 = vadd.f32 %v8122_v33, %v662_v57  ;;  %v796_v57 = vadd.s32 72, %v8132_v48 }
 0x126   : > { %2930 = vst [vmem:[#allocation2 + $0x434] sm:$0xf] %v2898_v21  ;;  %v8427_v6 = vmax.f32 %v660_v38, %v729_v2  ;;  %v1916_v32 = vsel %vm8416_vm15, %v1806_v39, 0.0  ;;  %v2298_v5 = vsel %vm8358_vm13, %v1806_v39, 0.0  ;;  %v2840_v25 = vsel %vm8213_vm6, %v1806_v39, 0.0 }
 0x127   : > { %1562 = vst [vmem:[#allocation2 + $0xd8] sm:$0xf] %v1530_v41  ;;  %4422 = vmatmul.bf16.gmra.mxu1 %v6182_v22  ;;  %701 = vmatmul.bf16.gmra.mxu0 %v7122_v18  ;;  %v730_v21 = vmul.f32 0.1, %v663_v46  ;;  %v1692_v41 = vpack.c.bf16 %v8389_v51, %v8389_v51  ;;  %v1948_v8 = vpack.c.bf16 %v1916_v32, %v1916_v32  ;;  %v886_v17 = vand.u32 15, %v796_v57 }
 0x128   : > { %1722 = vst [vmem:[#allocation2 + $0xdc] sm:$0xf] %v1690_v15  ;;  %4678 = vmatpush.bf16.msrb.mxu0 %v7307_v62  ;;  %v1338_v36 = vrot.slane %v8427_v6, 7  ;;  %v1755_v22 = vrot.slane %v8427_v6, 1  ;;  %v2330_v52 = vpack.c.bf16 %v2298_v5, %v2298_v5  ;;  %v1693_v38 = vpack.c.bf16 %v8427_v6, %v8427_v6  ;;  %v6155_v57 = vld [vmem:[#allocation2 + $0x2c] sm:$0xf0] }
 0x129   : > { %1978 = vst [vmem:[#allocation2 + $0xbc] sm:$0xf] %v1946_v43  ;;  %v2107_v43 = vpack.c.bf16 %v2075_v13, %v2075_v13  ;;  %v8443_v47 = vmax.f32 %v663_v46, %v730_v21  ;;  %vm8469_vm3 = vcmp.le.s32.totalorder %v886_v17, 14 }
 0x12a   : > { %2137 = vst [vmem:[#allocation2 + $0x9c] sm:$0xf] %v2105_v34  ;;  %v1805_v29 = vsel %vm1780_vm1, %v1754_v56, %v1755_v22 }
 0x12b   : > { %2201 = vst [vmem:[#allocation2 + $0xa0] sm:$0xf] %v1690_v15  ;;  %v1339_v18 = vrot.slane %v8443_v47, 7  ;;  %v1949_v51 = vpack.c.bf16 %v1805_v29, %v1805_v29  ;;  %v1694_v21 = vpack.c.bf16 %v8443_v47, %v8443_v47 }
 0x12c   : > { %2360 = vst [vmem:[#allocation2 + $0x80] sm:$0xf] %v2328_v55  ;;  %v664_v4 = vpop.f32.mrf.mxu0  ;;  %v1388_v55 = vsel %vm1363_vm0, %v1337_v27, %v1338_v36  ;;  %4679 = vmatpush.bf16.msrb.mxu0 %v7306_v45 }
 0x12d   : > { %2551 = vst [vmem:[#allocation2 + $0x60] sm:$0xf] %v2519_v28  ;;  %v2872_v28 = vpack.c.bf16 %v2840_v25, %v2840_v25  ;;  %v665_v59 = vadd.f32 %v8122_v33, %v664_v4  ;;  %v1533_v27 = vpack.c.bf16 %v1388_v55, %v1388_v55  ;;  %v1387_v26 = vsel %vm1363_vm0, %v1338_v36, %v1339_v18 }
 0x12e   : > { %2711 = vst [vmem:[#allocation2 + $0x64] sm:$0xf] %v1690_v15  ;;  %v2489_v15 = vsel %vm8188_vm5, %v1389_v19, 0.0  ;;  %v7304_v19 = vld [vmem:[#allocation8 + $0xd0] sm:$0xff]  ;;  %v6253_v60 = vld [vmem:[#allocation2 + $0xd8] sm:$0xf] }
 0x12f   : > { %2902 = vst [vmem:[#allocation2 + $0x44] sm:$0xf] %v2870_v58  ;;  %v7161_v37 = vld [vmem:[#allocation2 + $0xdc] sm:$0xf]  ;;  %v2521_v53 = vpack.c.bf16 %v2489_v15, %v2489_v15  ;;  %v893_v58 = vand.u32 15, %v797_v35  ;;  %v2491_v5 = vsel %vm8344_vm12, %v1387_v26, 0.0 }
 0x130   : > { %1563 = vst [vmem:[#allocation2 + $0xfc] sm:$0xf] %v1531_v63  ;;  %4680 = vmatpush.bf16.msrb.mxu0 %v7305_v61  ;;  %v731_v56 = vmul.f32 0.1, %v665_v59  ;;  %v799_v15 = vadd.s32 96, %v8132_v48  ;;  %v798_v55 = vadd.s32 88, %v8132_v48 }
 0x131   : > { %1723 = vst [vmem:[#allocation2 + $0x100] sm:$0xf] %v1691_v40  ;;  %vm8461_vm2 = vcmp.ge.s32.totalorder %v893_v58, 1  ;;  %v7135_v35 = vld [vmem:[#allocation2 + $0xc] sm:$0xf] }
 0x132   : > { %1979 = vst [vmem:[#allocation2 + $0xe0] sm:$0xf] %v1947_v16  ;;  %v1502_v4 = vsel %vm8461_vm2, %v1387_v26, 0.0  ;;  %v8480_v54 = vmax.f32 %v665_v59, %v731_v56 }
 0x133   : > { %2138 = vst [vmem:[#allocation2 + $0xc0] sm:$0xf] %v1531_v63  ;;  %v1534_v62 = vpack.c.bf16 %v1502_v4, %v1502_v4 }
 0x134   : > { %2202 = vst [vmem:[#allocation2 + $0xc4] sm:$0xf] %v1691_v40  ;;  %v667_v50 = vpop.f32.mrf.mxu0  ;;  %4681 = vmatpush.bf16.msrb.mxu0 %v7304_v19  ;;  %v1695_v61 = vpack.c.bf16 %v8480_v54, %v8480_v54 }
 0x135   : > { %2361 = vst [vmem:[#allocation2 + $0xa4] sm:$0xf] %v1947_v16  ;;  %v668_v39 = vadd.f32 %v8122_v33, %v667_v50  ;;  %v2523_v50 = vpack.c.bf16 %v2491_v5, %v2491_v5  ;;  %v801_v5 = vadd.s32 112, %v8132_v48 }
 0x136   : > { %2552 = vst [vmem:[#allocation2 + $0x84] sm:$0xf] %v1531_v63  ;;  %v1756_v63 = vrot.slane %v8443_v47, 1 }
 0x137   : > { %2712 = vst [vmem:[#allocation2 + $0x88] sm:$0xf] %v1691_v40  ;;  %4427 = vmatmul.bf16.gmra.mxu1 %v6218_v24  ;;  %706 = vmatmul.bf16.gmra.mxu0 %v7123_v23  ;;  %v732_v13 = vmul.f32 0.1, %v668_v39  ;;  %v6158_v23 = vor.u32 %v7135_v35, %v6155_v57 }
 0x138   : > { %2903 = vst [vmem:[#allocation2 + $0x68] sm:$0xf] %v1947_v16  ;;  %v6255_v31 = vld [vmem:[#allocation2 + $0xfc] sm:$0xf0]  ;;  %v7165_v16 = vld [vmem:[#allocation2 + $0xf8] sm:$0xf0]  ;;  %v1804_v9 = vsel %vm1780_vm1, %v1755_v22, %v1756_v63  ;;  %4682 = vmatpush.bf16.msrb.mxu0 %v7303_v20 }
 0x139   : > { %1564 = vst [vmem:[#allocation2 + $0x120] sm:$0xf] %v1532_v11  ;;  %v6258_v34 = vor.u32 %v7161_v37, %v6255_v31  ;;  %v6254_v6 = vor.u32 %v7165_v16, %v6253_v60  ;;  %v1918_v32 = vsel %vm8469_vm3, %v1804_v9, 0.0  ;;  %v2077_v11 = vsel %vm8408_vm14, %v1387_v26, 0.0 }
 0x13a   : > { %1724 = vst [vmem:[#allocation2 + $0x124] sm:$0xf] %v1692_v41  ;;  %v2300_v24 = vsel %vm8416_vm15, %v1804_v9, 0.0  ;;  %v2109_v25 = vpack.c.bf16 %v2077_v11, %v2077_v11  ;;  %v1757_v37 = vrot.slane %v8480_v54, 1  ;;  %v8495_v22 = vmax.f32 %v668_v39, %v732_v13  ;;  %v6191_v13 = vld [vmem:[#allocation2 + $0x74] sm:$0xf0] }
 0x13b   : > { %1980 = vst [vmem:[#allocation2 + $0x104] sm:$0xf] %v1948_v8  ;;  %4521 = vmatmul.bf16.gmra.mxu2 %v6258_v34  ;;  %v1340_v8 = vrot.slane %v8480_v54, 7  ;;  %v7302_v34 = vld [vmem:[#allocation8 + $0xc0] sm:$0xff]  ;;  %v2332_v45 = vpack.c.bf16 %v2300_v24, %v2300_v24  ;;  %v2842_v1 = vsel %vm8358_vm13, %v1804_v9, 0.0 }
 0x13c   : > { %2139 = vst [vmem:[#allocation2 + $0xe4] sm:$0xf] %v2107_v43  ;;  %v669_v46 = vpop.f32.mrf.mxu0  ;;  %4683 = vmatpush.bf16.msrb.mxu0 %v7302_v34  ;;  %v2874_v29 = vpack.c.bf16 %v2842_v1, %v2842_v1  ;;  %v1803_v7 = vsel %vm1780_vm1, %v1756_v63, %v1757_v37  ;;  %v1341_v58 = vrot.slane %v8495_v22, 7 }
 0x13d   : > { %2203 = vst [vmem:[#allocation2 + $0xe8] sm:$0xf] %v1692_v41  ;;  %v670_v59 = vadd.f32 %v8122_v33, %v669_v46  ;;  %v1951_v17 = vpack.c.bf16 %v1803_v7, %v1803_v7 }
 0x13e   : > { %2362 = vst [vmem:[#allocation2 + $0xc8] sm:$0xf] %v2330_v52  ;;  %v1385_v63 = vsel %vm1363_vm0, %v1340_v8, %v1341_v58 }
 0x13f   : > { %2553 = vst [vmem:[#allocation2 + $0xa8] sm:$0xf] %v2521_v53  ;;  %v1386_v53 = vsel %vm1363_vm0, %v1339_v18, %v1340_v8  ;;  %v2493_v24 = vsel %vm8408_vm14, %v1385_v63, 0.0 }
 0x140   : > { %2713 = vst [vmem:[#allocation2 + $0xac] sm:$0xf] %v1692_v41  ;;  %v1950_v41 = vpack.c.bf16 %v1918_v32, %v1918_v32  ;;  %v1535_v18 = vpack.c.bf16 %v1386_v53, %v1386_v53  ;;  %v6289_v9 = vld [vmem:[#allocation2 + $0x120] sm:$0xf]  ;;  %v2079_v32 = vsel %vm8461_vm2, %v1385_v63, 0.0 }
 0x141   : > { %2904 = vst [vmem:[#allocation2 + $0x8c] sm:$0xf] %v2872_v28  ;;  %v7170_v36 = vld [vmem:[#allocation2 + $0x124] sm:$0xf]  ;;  %v907_v28 = vand.u32 15, %v799_v15  ;;  %v2111_v8 = vpack.c.bf16 %v2079_v32, %v2079_v32 }
 0x142   : > { %1565 = vst [vmem:[#allocation2 + $0x144] sm:$0xf] %v1533_v27 }
 0x143   : > { %1725 = vst [vmem:[#allocation2 + $0x148] sm:$0xf] %v1693_v38  ;;  %vm8513_vm4 = vcmp.ge.s32.totalorder %v907_v28, 1 }
 0x144   : > { %1981 = vst [vmem:[#allocation2 + $0x128] sm:$0xf] %v1949_v51  ;;  %v672_v52 = vpop.f32.mrf.mxu0  ;;  %v1504_v46 = vsel %vm8513_vm4, %v1385_v63, 0.0 }
 0x145   : > { %2140 = vst [vmem:[#allocation2 + $0x108] sm:$0xf] %v1533_v27  ;;  %v673_v19 = vadd.f32 %v8122_v33, %v672_v52  ;;  %v800_v52 = vadd.s32 104, %v8132_v48 }
 0x146   : > { %2204 = vst [vmem:[#allocation2 + $0x10c] sm:$0xf] %v1693_v38 }
 0x147   : > { %2363 = vst [vmem:[#allocation2 + $0xec] sm:$0xf] %v1949_v51  ;;  %4432 = vmatmul.bf16.gmra.mxu1 %v6254_v6  ;;  %4684 = vmatmul.bf16.vlgmr.msrb.gmra.mxu0 %v6158_v23  ;;  %v1536_v6 = vpack.c.bf16 %v1504_v46, %v1504_v46  ;;  %v734_v20 = vmul.f32 0.1, %v673_v19  ;;  %v6227_v46 = vld [vmem:[#allocation2 + $0xbc] sm:$0xf0] }
 0x148   : > { %2554 = vst [vmem:[#allocation2 + $0xcc] sm:$0xf] %v1533_v27  ;;  %v900_v27 = vand.u32 15, %v798_v55 }
 0x149   : > { %2714 = vst [vmem:[#allocation2 + $0xd0] sm:$0xf] %v1693_v38  ;;  %v1758_v38 = vrot.slane %v8495_v22, 1  ;;  %v7174_v26 = vld [vmem:[#allocation2 + $0x140] sm:$0xf0] }
 0x14a   : > { %2905 = vst [vmem:[#allocation2 + $0xb0] sm:$0xf] %v1949_v51  ;;  %v6291_v43 = vld [vmem:[#allocation2 + $0x144] sm:$0xf0]  ;;  %v733_v51 = vmul.f32 0.1, %v670_v59  ;;  %v6290_v4 = vor.u32 %v7174_v26, %v6289_v9 }
 0x14b   : > { %1566 = vst [vmem:[#allocation2 + $0x168] sm:$0xf] %v1534_v62  ;;  %v6294_v31 = vor.u32 %v7170_v36, %v6291_v43  ;;  %vm8519_vm5 = vcmp.le.s32.totalorder %v900_v27, 14  ;;  %v1802_v16 = vsel %vm1780_vm1, %v1757_v37, %v1758_v38  ;;  %v1696_v62 = vpack.c.bf16 %v8495_v22, %v8495_v22 }
 0x14c   : > { %1726 = vst [vmem:[#allocation2 + $0x16c] sm:$0xf] %v1694_v21  ;;  %v674_v39 = vpop.f32.mrf.mxu0  ;;  %v8528_v60 = vmax.f32 %v670_v59, %v733_v51  ;;  %v1920_v54 = vsel %vm8519_vm5, %v1802_v16, 0.0  ;;  %v2302_v11 = vsel %vm8469_vm3, %v1802_v16, 0.0  ;;  %v8543_v37 = vmax.f32 %v673_v19, %v734_v20  ;;  %v8572_v51 = vld [vmem:[%s10132_s2] ss:$0 sm:$0xff] }
 0x14d   : > { %1982 = vst [vmem:[#allocation2 + $0x14c] sm:$0xf] %v1950_v41  ;;  %4526 = vmatmul.bf16.gmra.mxu2 %v6294_v31  ;;  %v7144_v31 = vld [vmem:[#allocation2 + $0x54] sm:$0xf]  ;;  %v2334_v22 = vpack.c.bf16 %v2302_v11, %v2302_v11  ;;  %v2844_v0 = vsel %vm8416_vm15, %v1802_v16, 0.0  ;;  %v675_v57 = vadd.f32 %v8122_v33, %v674_v39 }
 0x14e   : > { %2141 = vst [vmem:[#allocation2 + $0x12c] sm:$0xf] %v2109_v25  ;;  %v1342_v41 = vrot.slane %v8528_v60, 7  ;;  %v1759_v36 = vrot.slane %v8528_v60, 1  ;;  %v6194_v35 = vor.u32 %v7144_v31, %v6191_v13  ;;  %v2876_v53 = vpack.c.bf16 %v2844_v0, %v2844_v0  ;;  %v7153_v20 = vld [vmem:[#allocation2 + $0x9c] sm:$0xf] }
 0x14f   : > { %2205 = vst [vmem:[#allocation2 + $0x130] sm:$0xf] %v1694_v21  ;;  %v1343_v3 = vrot.slane %v8543_v37, 7  ;;  %v1697_v23 = vpack.c.bf16 %v8528_v60, %v8528_v60  ;;  %v1760_v7 = vrot.slane %v8543_v37, 1 }
 0x150   : > { %2364 = vst [vmem:[#allocation2 + $0x110] sm:$0xf] %v2332_v45  ;;  %v2525_v45 = vpack.c.bf16 %v2493_v24, %v2493_v24  ;;  %v1384_v1 = vsel %vm1363_vm0, %v1341_v58, %v1342_v41  ;;  %v1801_v55 = vsel %vm1780_vm1, %v1758_v38, %v1759_v36 }
 0x151   : > { %2555 = vst [vmem:[#allocation2 + $0xf0] sm:$0xf] %v2523_v50  ;;  %v921_v50 = vand.u32 15, %v801_v5  ;;  %v1537_v28 = vpack.c.bf16 %v1384_v1, %v1384_v1  ;;  %v1953_v59 = vpack.c.bf16 %v1801_v55, %v1801_v55  ;;  %v1383_v33 = vsel %vm1363_vm0, %v1342_v41, %v1343_v3 }
 0x152   : > { %2715 = vst [vmem:[#allocation2 + $0xf4] sm:$0xf] %v1694_v21  ;;  %v1952_v21 = vpack.c.bf16 %v1920_v54, %v1920_v54  ;;  %v6325_v27 = vld [vmem:[#allocation2 + $0x168] sm:$0xf]  ;;  %v1800_v63 = vsel %vm1780_vm1, %v1759_v36, %v1760_v7  ;;  %v2081_v60 = vsel %vm8513_vm4, %v1383_v33, 0.0  ;;  %v2495_v11 = vsel %vm8461_vm2, %v1383_v33, 0.0 }
 0x153   : > { %2906 = vst [vmem:[#allocation2 + $0xd4] sm:$0xf] %v2874_v29  ;;  %v7179_v15 = vld [vmem:[#allocation2 + $0x16c] sm:$0xf]  ;;  %v914_v29 = vand.u32 15, %v800_v52  ;;  %vm8557_vm6 = vcmp.ge.s32.totalorder %v921_v50, 1  ;;  %v2113_v24 = vpack.c.bf16 %v2081_v60, %v2081_v60  ;;  %v2527_v2 = vpack.c.bf16 %v2495_v11, %v2495_v11 }
 0x154   : > { %1567 = vst [vmem:[#allocation2 + $0x18c] sm:$0xf] %v1535_v18  ;;  %v677_v34 = vpop.f32.mrf.mxu0  ;;  %v1506_v19 = vsel %vm8557_vm6, %v1383_v33, 0.0  ;;  %v2304_v32 = vsel %vm8519_vm5, %v1800_v63, 0.0  ;;  %v2846_v13 = vsel %vm8469_vm3, %v1800_v63, 0.0 }
 0x155   : > { %1727 = vst [vmem:[#allocation2 + $0x190] sm:$0xf] %v1695_v61  ;;  %vm8563_vm10 = vcmp.le.s32.totalorder %v914_v29, 14  ;;  %v678_v26 = vadd.f32 %v8572_v51, %v677_v34  ;;  %v2336_v40 = vpack.c.bf16 %v2304_v32, %v2304_v32  ;;  %v2878_v0 = vpack.c.bf16 %v2846_v13, %v2846_v13 }
 0x156   : > { %1983 = vst [vmem:[#allocation2 + $0x170] sm:$0xf] %v1951_v17  ;;  %v1922_v39 = vsel %vm8563_vm10, %v1800_v63, 0.0 }
 0x157   : > { %2142 = vst [vmem:[#allocation2 + $0x150] sm:$0xf] %v1535_v18  ;;  %4437 = vmatmul.bf16.gmra.mxu1 %v6290_v4  ;;  %4689 = vmatmul.bf16.gmra.mxu0 %v6194_v35  ;;  %v1538_v4 = vpack.c.bf16 %v1506_v19, %v1506_v19  ;;  %v736_v54 = vmul.f32 0.1, %v678_v26  ;;  %v7162_v19 = vld [vmem:[#allocation2 + $0xe4] sm:$0xf] }
 0x158   : > { %2206 = vst [vmem:[#allocation2 + $0x154] sm:$0xf] %v1695_v61 }
 0x159   : > { %2365 = vst [vmem:[#allocation2 + $0x134] sm:$0xf] %v1951_v17  ;;  %v8593_v36 = vmax.f32 %v678_v26, %v736_v54  ;;  %v6263_v26 = vld [vmem:[#allocation2 + $0x104] sm:$0xf0] }
 0x15a   : > { %2556 = vst [vmem:[#allocation2 + $0x114] sm:$0xf] %v1535_v18  ;;  %v6266_v54 = vor.u32 %v7162_v19, %v6263_v26 }
 0x15b   : > { %2716 = vst [vmem:[#allocation2 + $0x118] sm:$0xf] %v1695_v61  ;;  %v7183_v58 = vld [vmem:[#allocation2 + $0x188] sm:$0xf0]  ;;  %v735_v61 = vmul.f32 0.1, %v675_v57 }
 0x15c   : > { %2907 = vst [vmem:[#allocation2 + $0xf8] sm:$0xf] %v1951_v17  ;;  %v6327_v25 = vld [vmem:[#allocation2 + $0x18c] sm:$0xf0]  ;;  %v6326_v38 = vor.u32 %v7183_v58, %v6325_v27  ;;  %v679_v16 = vpop.f32.mrf.mxu0 }
 0x15d   : > { %1568 = vst [vmem:[#allocation2 + $0x1b0] sm:$0xf] %v1536_v6  ;;  %v6330_v43 = vor.u32 %v7179_v15, %v6327_v25  ;;  %v8577_v9 = vmax.f32 %v675_v57, %v735_v61  ;;  %v1698_v6 = vpack.c.bf16 %v8543_v37, %v8543_v37  ;;  %v680_v1 = vadd.f32 %v8572_v51, %v679_v16 }
 0x15e   : > { %1728 = vst [vmem:[#allocation2 + $0x1b4] sm:$0xf] %v1696_v62 }
 0x15f   : > { %1984 = vst [vmem:[#allocation2 + $0x194] sm:$0xf] %v1952_v21  ;;  %4531 = vmatmul.bf16.gmra.mxu2 %v6330_v43  ;;  %v1344_v21 = vrot.slane %v8577_v9, 7  ;;  %v1761_v15 = vrot.slane %v8577_v9, 1  ;;  %v803_v43 = vadd.s32 128, %v8132_v48 }
 0x160   : > { %2143 = vst [vmem:[#allocation2 + $0x174] sm:$0xf] %v2111_v8  ;;  %v6230_v8 = vor.u32 %v7153_v20, %v6227_v46  ;;  %v737_v58 = vmul.f32 0.1, %v680_v1 }
 0x161   : > { %2207 = vst [vmem:[#allocation2 + $0x178] sm:$0xf] %v1696_v62  ;;  %v1382_v31 = vsel %vm1363_vm0, %v1343_v3, %v1344_v21  ;;  %v1799_v34 = vsel %vm1780_vm1, %v1760_v7, %v1761_v15  ;;  %v935_v35 = vand.u32 15, %v803_v43  ;;  %v1762_v3 = vrot.slane %v8593_v36, 1 }
 0x162   : > { %2366 = vst [vmem:[#allocation2 + $0x158] sm:$0xf] %v2334_v22  ;;  %v802_v22 = vadd.s32 120, %v8132_v48  ;;  %v1539_v50 = vpack.c.bf16 %v1382_v31, %v1382_v31  ;;  %v8621_v63 = vmax.f32 %v680_v1, %v737_v58  ;;  %v804_v43 = vadd.s32 136, %v8132_v48 }
 0x163   : > { %2557 = vst [vmem:[#allocation2 + $0x138] sm:$0xf] %v2525_v45  ;;  %v1345_v45 = vrot.slane %v8593_v36, 7  ;;  %vm8606_vm12 = vcmp.ge.s32.totalorder %v935_v35, 1  ;;  %v1798_v33 = vsel %vm1780_vm1, %v1761_v15, %v1762_v3  ;;  %v8640_v15 = vpop.f32.mrf.mxu2 }
 0x164   : > { %2717 = vst [vmem:[#allocation2 + $0x13c] sm:$0xf] %v1696_v62  ;;  %v1954_v62 = vpack.c.bf16 %v1922_v39, %v1922_v39  ;;  %v682_v37 = vpop.f32.mrf.mxu0  ;;  %v928_v55 = vand.u32 15, %v802_v22  ;;  %v6361_v57 = vld [vmem:[#allocation2 + $0x1b0] sm:$0xf]  ;;  %v2306_v60 = vsel %vm8563_vm10, %v1798_v33, 0.0 }
 0x165   : > { %2908 = vst [vmem:[#allocation2 + $0x11c] sm:$0xf] %v2876_v53  ;;  %v7188_v41 = vld [vmem:[#allocation2 + $0x1b4] sm:$0xf]  ;;  %v1699_v53 = vpack.c.bf16 %v8577_v9, %v8577_v9  ;;  %v1381_v7 = vsel %vm1363_vm0, %v1344_v21, %v1345_v45  ;;  %v683_v61 = vadd.f32 %v8572_v51, %v682_v37  ;;  %v2848_v20 = vsel %vm8519_vm5, %v1798_v33, 0.0 }
 0x166   : > { %1569 = vst [vmem:[#allocation2 + $0x1d4] sm:$0xf] %v1537_v28  ;;  %vm8612_vm13 = vcmp.le.s32.totalorder %v928_v55, 14  ;;  %v2083_v39 = vsel %vm8557_vm6, %v1381_v7, 0.0  ;;  %v2497_v32 = vsel %vm8513_vm4, %v1381_v7, 0.0  ;;  %v2338_v47 = vpack.c.bf16 %v2306_v60, %v2306_v60 }
 0x167   : > { %1729 = vst [vmem:[#allocation2 + $0x1d8] sm:$0xf] %v1697_v23  ;;  %4442 = vmatmul.bf16.gmra.mxu1 %v6326_v38  ;;  %4694 = vmatmul.bf16.gmra.mxu0 %v6230_v8  ;;  %v1508_v38 = vsel %vm8606_vm12, %v1381_v7, 0.0  ;;  %v1924_v16 = vsel %vm8612_vm13, %v1798_v33, 0.0  ;;  %v738_v46 = vmul.f32 0.1, %v683_v61  ;;  %v2115_v11 = vpack.c.bf16 %v2083_v39, %v2083_v39 }
 0x168   : > { %1985 = vst [vmem:[#allocation2 + $0x1b8] sm:$0xf] %v1953_v59  ;;  %v1540_v9 = vpack.c.bf16 %v1508_v38, %v1508_v38  ;;  %v805_v8 = vadd.s32 144, %v8132_v48  ;;  %v2880_v37 = vpack.c.bf16 %v2848_v20, %v2848_v20  ;;  %v6299_v33 = vld [vmem:[#allocation2 + $0x14c] sm:$0xf0] }
 0x169   : > { %2144 = vst [vmem:[#allocation2 + $0x198] sm:$0xf] %v1537_v28 }
 0x16a   : > { %2208 = vst [vmem:[#allocation2 + $0x19c] sm:$0xf] %v1697_v23  ;;  %v949_v31 = vand.u32 15, %v805_v8 }
 0x16b   : > { %2367 = vst [vmem:[#allocation2 + $0x17c] sm:$0xf] %v1953_v59 }
 0x16c   : > { %2558 = vst [vmem:[#allocation2 + $0x15c] sm:$0xf] %v1537_v28  ;;  %v1955_v28 = vpack.c.bf16 %v1799_v34, %v1799_v34  ;;  %v684_v27 = vpop.f32.mrf.mxu0  ;;  %vm8652_vm14 = vcmp.ge.s32.totalorder %v949_v31, 1 }
 0x16d   : > { %2718 = vst [vmem:[#allocation2 + $0x160] sm:$0xf] %v1697_v23  ;;  %v7192_v52 = vld [vmem:[#allocation2 + $0x1d0] sm:$0xf0] }
 0x16e   : > { %2909 = vst [vmem:[#allocation2 + $0x140] sm:$0xf] %v1953_v59  ;;  %v6363_v5 = vld [vmem:[#allocation2 + $0x1d4] sm:$0xf0]  ;;  %v6362_v23 = vor.u32 %v7192_v52, %v6361_v57  ;;  %v942_v52 = vand.u32 15, %v804_v43 }
 0x16f   : > { %1570 = vst [vmem:[#allocation2 + $0x1f8] sm:$0xf] %v1538_v4  ;;  %v6366_v25 = vor.u32 %v7188_v41, %v6363_v5  ;;  %v1700_v4 = vpack.c.bf16 %v8593_v36, %v8593_v36  ;;  %v8637_v5 = vmax.f32 %v683_v61, %v738_v46 }
 0x170   : > { %1730 = vst [vmem:[#allocation2 + $0x1fc] sm:$0xf] %v1698_v6  ;;  %vm8658_vm15 = vcmp.le.s32.totalorder %v942_v52, 14 }
 0x171   : > { %1986 = vst [vmem:[#allocation2 + $0x1dc] sm:$0xf] %v1954_v62  ;;  %4536 = vmatmul.bf16.gmra.mxu2 %v6366_v25  ;;  %v1346_v62 = vrot.slane %v8621_v63, 7  ;;  %v2529_v25 = vpack.c.bf16 %v2497_v32, %v2497_v32  ;;  %v1347_v22 = vrot.slane %v8637_v5, 7  ;;  %v1702_v46 = vpack.c.bf16 %v8637_v5, %v8637_v5 }
 0x172   : > { %2145 = vst [vmem:[#allocation2 + $0x1bc] sm:$0xf] %v2113_v24  ;;  %v1763_v24 = vrot.slane %v8621_v63, 1 }
 0x173   : > { %2209 = vst [vmem:[#allocation2 + $0x1c0] sm:$0xf] %v1698_v6  ;;  %v1380_v36 = vsel %vm1363_vm0, %v1345_v45, %v1346_v62  ;;  %v1701_v45 = vpack.c.bf16 %v8621_v63, %v8621_v63  ;;  %v7171_v63 = vld [vmem:[#allocation2 + $0x12c] sm:$0xf] }
 0x174   : > { %2368 = vst [vmem:[#allocation2 + $0x1a0] sm:$0xf] %v2336_v40  ;;  %v687_v56 = vpop.f32.mrf.mxu0  ;;  %v1541_v35 = vpack.c.bf16 %v1380_v36, %v1380_v36 }
 0x175   : > { %2559 = vst [vmem:[#allocation2 + $0x180] sm:$0xf] %v2527_v2  ;;  %v1797_v2 = vsel %vm1780_vm1, %v1762_v3, %v1763_v24  ;;  %v1379_v3 = vsel %vm1363_vm0, %v1346_v62, %v1347_v22  ;;  %v688_v7 = vadd.f32 %v8572_v51, %v687_v56  ;;  %v806_v56 = vadd.s32 152, %v8132_v48 }
 0x176   : > { %2719 = vst [vmem:[#allocation2 + $0x184] sm:$0xf] %v1698_v6  ;;  %v1956_v6 = vpack.c.bf16 %v1924_v16, %v1924_v16  ;;  %v6397_v34 = vld [vmem:[#allocation2 + $0x1f8] sm:$0xf]  ;;  %v1510_v61 = vsel %vm8652_vm14, %v1379_v3, 0.0  ;;  %v6302_v16 = vor.u32 %v7171_v63, %v6299_v33 }
 0x177   : > { %2910 = vst [vmem:[#allocation2 + $0x164] sm:$0xf] %v2878_v0  ;;  %4447 = vmatmul.bf16.gmra.mxu1 %v6362_v23  ;;  %v7197_v13 = vld [vmem:[#allocation2 + $0x1fc] sm:$0xf]  ;;  %4699 = vmatmul.bf16.gmra.mxu0 %v6266_v54  ;;  %v685_v0 = vadd.f32 %v8572_v51, %v684_v27  ;;  %v8667_v27 = vpop.f32.mrf.mxu2  ;;  %v1542_v19 = vpack.c.bf16 %v1510_v61, %v1510_v61  ;;  %v740_v39 = vmul.f32 0.1, %v688_v7 }
 0x178   : > { %1571 = vst [vmem:[#allocation2 + $0x21c] sm:$0xf] %v1539_v50  ;;  %v2499_v54 = vsel %vm8557_vm6, %v1379_v3, 0.0  ;;  %v7180_v61 = vld [vmem:[#allocation2 + $0x174] sm:$0xf] }
 0x179   : > { %1731 = vst [vmem:[#allocation2 + $0x220] sm:$0xf] %v1699_v53  ;;  %v739_v57 = vmul.f32 0.1, %v685_v0  ;;  %v2531_v17 = vpack.c.bf16 %v2499_v54, %v2499_v54 }
 0x17a   : > { %1987 = vst [vmem:[#allocation2 + $0x200] sm:$0xf] %v1955_v28 }
 0x17b   : > { %2146 = vst [vmem:[#allocation2 + $0x1e0] sm:$0xf] %v1539_v50  ;;  %v8669_v38 = vmax.f32 %v685_v0, %v739_v57 }
 0x17c   : > { %2210 = vst [vmem:[#allocation2 + $0x1e4] sm:$0xf] %v1699_v53  ;;  %v689_v58 = vpop.f32.mrf.mxu0 }
 0x17d   : > { %2369 = vst [vmem:[#allocation2 + $0x1c4] sm:$0xf] %v1955_v28  ;;  %v1348_v32 = vrot.slane %v8669_v38, 7  ;;  %v690_v0 = vadd.f32 %v8572_v51, %v689_v58 }
 0x17e   : > { %2560 = vst [vmem:[#allocation2 + $0x1a4] sm:$0xf] %v1539_v50  ;;  %v1764_v50 = vrot.slane %v8637_v5, 1 }
 0x17f   : > { %2720 = vst [vmem:[#allocation2 + $0x1a8] sm:$0xf] %v1699_v53  ;;  %v7201_v40 = vld [vmem:[#allocation2 + $0x218] sm:$0xf0]  ;;  %v1957_v53 = vpack.c.bf16 %v1797_v2, %v1797_v2  ;;  %v741_v57 = vmul.f32 0.1, %v690_v0 }
 0x180   : > { %2911 = vst [vmem:[#allocation2 + $0x188] sm:$0xf] %v1955_v28  ;;  %v6399_v21 = vld [vmem:[#allocation2 + $0x21c] sm:$0xf0]  ;;  %v6398_v1 = vor.u32 %v7201_v40, %v6397_v34  ;;  %v1796_v23 = vsel %vm1780_vm1, %v1763_v24, %v1764_v50  ;;  %v8685_v24 = vmax.f32 %v688_v7, %v740_v39 }
 0x181   : > { %1572 = vst [vmem:[#allocation2 + $0x240] sm:$0xf] %v1540_v9  ;;  %v6402_v41 = vor.u32 %v7197_v13, %v6399_v21  ;;  %v1926_v26 = vsel %vm8658_vm15, %v1796_v23, 0.0  ;;  %v2085_v9 = vsel %vm8606_vm12, %v1379_v3, 0.0  ;;  %v1765_v13 = vrot.slane %v8669_v38, 1 }
 0x182   : > { %1732 = vst [vmem:[#allocation2 + $0x244] sm:$0xf] %v1700_v4  ;;  %v1958_v60 = vpack.c.bf16 %v1926_v26, %v1926_v26  ;;  %v2117_v20 = vpack.c.bf16 %v2085_v9, %v2085_v9  ;;  %v1349_v31 = vrot.slane %v8685_v24, 7  ;;  %v8697_v34 = vpop.f32.mrf.mxu1  ;;  %v8721_v26 = vmax.f32 %v690_v0, %v741_v57 }
 0x183   : > { %1988 = vst [vmem:[#allocation2 + $0x224] sm:$0xf] %v1956_v6  ;;  %4541 = vmatmul.bf16.gmra.mxu2 %v6402_v41  ;;  %v2850_v6 = vsel %vm8563_vm10, %v1796_v23, 0.0  ;;  %v807_v41 = vadd.s32 160, %v8132_v48  ;;  %v8691_v43 = vpop.f32.mrf.mxu2 }
 0x184   : > { %2147 = vst [vmem:[#allocation2 + $0x204] sm:$0xf] %v2115_v11  ;;  %v692_v8 = vpop.f32.mrf.mxu0  ;;  %v2882_v36 = vpack.c.bf16 %v2850_v6, %v2850_v6  ;;  %v1377_v3 = vsel %vm1363_vm0, %v1348_v32, %v1349_v31 }
 0x185   : > { %2211 = vst [vmem:[#allocation2 + $0x208] sm:$0xf] %v1700_v4  ;;  %v963_v2 = vand.u32 15, %v807_v41  ;;  %v693_v58 = vadd.f32 %v8572_v51, %v692_v8  ;;  %v1767_v41 = vrot.slane %v8721_v26, 1  ;;  %v809_v8 = vadd.s32 176, %v8132_v48 }
 0x186   : > { %2370 = vst [vmem:[#allocation2 + $0x1e8] sm:$0xf] %v2338_v47  ;;  %v1378_v47 = vsel %vm1363_vm0, %v1347_v22, %v1348_v32  ;;  %v2501_v32 = vsel %vm8606_vm12, %v1377_v3, 0.0 }
 0x187   : > { %2561 = vst [vmem:[#allocation2 + $0x1c8] sm:$0xf] %v2529_v25  ;;  %4452 = vmatmul.bf16.gmra.mxu1 %v6398_v1  ;;  %4704 = vmatmul.bf16.gmra.mxu0 %v6302_v16  ;;  %v1543_v22 = vpack.c.bf16 %v1378_v47, %v1378_v47  ;;  %v956_v1 = vand.u32 15, %v806_v56  ;;  %vm8702_vm2 = vcmp.ge.s32.totalorder %v963_v2, 1 }
 0x188   : > { %2721 = vst [vmem:[#allocation2 + $0x1cc] sm:$0xf] %v1700_v4  ;;  %v2308_v4 = vsel %vm8612_vm13, %v1796_v23, 0.0  ;;  %v6433_v25 = vld [vmem:[#allocation2 + $0x240] sm:$0xf] }
 0x189   : > { %2912 = vst [vmem:[#allocation2 + $0x1ac] sm:$0xf] %v2880_v37  ;;  %v7206_v62 = vld [vmem:[#allocation2 + $0x244] sm:$0xf]  ;;  %v2340_v18 = vpack.c.bf16 %v2308_v4, %v2308_v4  ;;  %v1795_v37 = vsel %vm1780_vm1, %v1764_v50, %v1765_v13  ;;  %v6335_v50 = vld [vmem:[#allocation2 + $0x194] sm:$0xf0] }
 0x18a   : > { %1573 = vst [vmem:[#allocation2 + $0x264] sm:$0xf] %v1541_v35  ;;  %v1959_v52 = vpack.c.bf16 %v1795_v37, %v1795_v37  ;;  %vm8710_vm3 = vcmp.le.s32.totalorder %v956_v1, 14  ;;  %v6338_v63 = vor.u32 %v7180_v61, %v6335_v50  ;;  %v8727_v9 = vpop.f32.mrf.mxu1  ;;  %v742_v4 = vmul.f32 0.1, %v693_v58 }
 0x18b   : > { %1733 = vst [vmem:[#allocation2 + $0x268] sm:$0xf] %v1701_v45  ;;  %v808_v37 = vadd.s32 168, %v8132_v48  ;;  %v1705_v50 = vpack.c.bf16 %v8721_v26, %v8721_v26  ;;  %v7189_v61 = vld [vmem:[#allocation2 + $0x1bc] sm:$0xf] }
 0x18c   : > { %1989 = vst [vmem:[#allocation2 + $0x248] sm:$0xf] %v1957_v53  ;;  %v694_v33 = vpop.f32.mrf.mxu0 }
 0x18d   : > { %2148 = vst [vmem:[#allocation2 + $0x228] sm:$0xf] %v1541_v35  ;;  %v695_v2 = vadd.f32 %v8572_v51, %v694_v33 }
 0x18e   : > { %2212 = vst [vmem:[#allocation2 + $0x22c] sm:$0xf] %v1701_v45 }
 0x18f   : > { %2371 = vst [vmem:[#allocation2 + $0x20c] sm:$0xf] %v1957_v53 }
 0x190   : > { %2562 = vst [vmem:[#allocation2 + $0x1ec] sm:$0xf] %v1541_v35  ;;  %v1703_v35 = vpack.c.bf16 %v8669_v38, %v8669_v38  ;;  %v1512_v38 = vsel %vm8702_vm2, %v1377_v3, 0.0 }
 0x191   : > { %2722 = vst [vmem:[#allocation2 + $0x1f0] sm:$0xf] %v1701_v45  ;;  %v7210_v5 = vld [vmem:[#allocation2 + $0x260] sm:$0xf0]  ;;  %v1766_v45 = vrot.slane %v8685_v24, 1  ;;  %v1544_v39 = vpack.c.bf16 %v1512_v38, %v1512_v38 }
 0x192   : > { %2913 = vst [vmem:[#allocation2 + $0x1d0] sm:$0xf] %v1957_v53  ;;  %v6435_v11 = vld [vmem:[#allocation2 + $0x264] sm:$0xf0]  ;;  %v6434_v40 = vor.u32 %v7210_v5, %v6433_v25  ;;  %v8771_v38 = vld [vmem:[%s10134_s4] ss:$0 sm:$0xff] }
 0x193   : > { %1574 = vst [vmem:[#allocation2 + $0x288] sm:$0xf] %v1542_v19  ;;  %v6438_v21 = vor.u32 %v7206_v62, %v6435_v11  ;;  %v1794_v7 = vsel %vm1780_vm1, %v1765_v13, %v1766_v45  ;;  %v8725_v19 = vpop.f32.mrf.mxu2  ;;  %v1793_v59 = vsel %vm1780_vm1, %v1766_v45, %v1767_v41 }
 0x194   : > { %1734 = vst [vmem:[#allocation2 + $0x28c] sm:$0xf] %v1702_v46  ;;  %v1928_v16 = vsel %vm8710_vm3, %v1794_v7, 0.0  ;;  %v2310_v54 = vsel %vm8658_vm15, %v1794_v7, 0.0  ;;  %v2852_v29 = vsel %vm8612_vm13, %v1794_v7, 0.0  ;;  %v697_v56 = vpop.f32.mrf.mxu0 }
 0x195   : > { %1990 = vst [vmem:[#allocation2 + $0x26c] sm:$0xf] %v1958_v60  ;;  %4546 = vmatmul.bf16.gmra.mxu2 %v6438_v21  ;;  %v1704_v60 = vpack.c.bf16 %v8685_v24, %v8685_v24  ;;  %v1960_v6 = vpack.c.bf16 %v1928_v16, %v1928_v16  ;;  %v2342_v47 = vpack.c.bf16 %v2310_v54, %v2310_v54  ;;  %v6371_v7 = vld [vmem:[#allocation2 + $0x1dc] sm:$0xf0] }
 0x196   : > { %2149 = vst [vmem:[#allocation2 + $0x24c] sm:$0xf] %v2117_v20  ;;  %v1350_v20 = vrot.slane %v8721_v26, 7  ;;  %v2884_v0 = vpack.c.bf16 %v2852_v29, %v2852_v29  ;;  %v1961_v24 = vpack.c.bf16 %v1793_v59, %v1793_v59  ;;  %v811_v59 = vadd.s32 192, %v8132_v48 }
 0x197   : > { %2213 = vst [vmem:[#allocation2 + $0x250] sm:$0xf] %v1702_v46  ;;  %4457 = vmatmul.bf16.gmra.mxu1 %v6434_v40  ;;  %4709 = vmatmul.bf16.gmra.mxu0 %v6338_v63  ;;  %v6374_v63 = vor.u32 %v7189_v61, %v6371_v7  ;;  %v6407_v61 = vld [vmem:[#allocation2 + $0x224] sm:$0xf0] }
 0x198   : > { %2372 = vst [vmem:[#allocation2 + $0x230] sm:$0xf] %v2340_v18  ;;  %v8739_v18 = vmax.f32 %v693_v58, %v742_v4  ;;  %v1376_v40 = vsel %vm1363_vm0, %v1349_v31, %v1350_v20  ;;  %v743_v58 = vmul.f32 0.1, %v695_v2 }
 0x199   : > { %2563 = vst [vmem:[#allocation2 + $0x210] sm:$0xf] %v2531_v17  ;;  %v1545_v31 = vpack.c.bf16 %v1376_v40, %v1376_v40 }
 0x19a   : > { %2723 = vst [vmem:[#allocation2 + $0x214] sm:$0xf] %v1702_v46  ;;  %v2087_v46 = vsel %vm8652_vm14, %v1377_v3, 0.0  ;;  %v6469_v17 = vld [vmem:[#allocation2 + $0x288] sm:$0xf]  ;;  %v970_v3 = vand.u32 15, %v808_v37 }
 0x19b   : > { %2914 = vst [vmem:[#allocation2 + $0x1f4] sm:$0xf] %v2882_v36  ;;  %v2119_v11 = vpack.c.bf16 %v2087_v46, %v2087_v46  ;;  %v7215_v13 = vld [vmem:[#allocation2 + $0x28c] sm:$0xf]  ;;  %v2533_v36 = vpack.c.bf16 %v2501_v32, %v2501_v32  ;;  %v1768_v57 = vrot.slane %v8739_v18, 1 }
 0x19c   : > { %1575 = vst [vmem:[#allocation2 + $0x2ac] sm:$0xf] %v1543_v22  ;;  %vm8773_vm5 = vcmp.le.s32.totalorder %v970_v3, 14  ;;  %v699_v46 = vpop.f32.mrf.mxu0 }
 0x19d   : > { %1735 = vst [vmem:[#allocation2 + $0x2b0] sm:$0xf] %v1703_v35  ;;  %v1792_v16 = vsel %vm1780_vm1, %v1767_v41, %v1768_v57  ;;  %v700_v7 = vadd.f32 %v8572_v51, %v699_v46 }
 0x19e   : > { %1991 = vst [vmem:[#allocation2 + $0x290] sm:$0xf] %v1959_v52  ;;  %v1930_v54 = vsel %vm8773_vm5, %v1792_v16, 0.0 }
 0x19f   : > { %2150 = vst [vmem:[#allocation2 + $0x270] sm:$0xf] %v1543_v22 }
 0x1a0   : > { %2214 = vst [vmem:[#allocation2 + $0x274] sm:$0xf] %v1703_v35 }
 0x1a1   : > { %2373 = vst [vmem:[#allocation2 + $0x254] sm:$0xf] %v1959_v52 }
 0x1a2   : > { %2564 = vst [vmem:[#allocation2 + $0x234] sm:$0xf] %v1543_v22  ;;  %v977_v22 = vand.u32 15, %v809_v8 }
 0x1a3   : > { %2724 = vst [vmem:[#allocation2 + $0x238] sm:$0xf] %v1703_v35  ;;  %v7219_v62 = vld [vmem:[#allocation2 + $0x2a8] sm:$0xf0]  ;;  %v1351_v35 = vrot.slane %v8739_v18, 7 }
 0x1a4   : > { %2915 = vst [vmem:[#allocation2 + $0x218] sm:$0xf] %v1959_v52  ;;  %v6471_v21 = vld [vmem:[#allocation2 + $0x2ac] sm:$0xf0]  ;;  %v6470_v25 = vor.u32 %v7219_v62, %v6469_v17  ;;  %v4423_v1 = vpop.f32.mrf.mxu1  ;;  %v8755_v52 = vpop.f32.mrf.mxu2  ;;  %vm8760_vm4 = vcmp.ge.s32.totalorder %v977_v22, 1  ;;  %v1962_v17 = vpack.c.bf16 %v1930_v54, %v1930_v54 }
 0x1a5   : > { %1576 = vst [vmem:[#allocation2 + $0x2d0] sm:$0xf] %v1544_v39  ;;  %v6474_v5 = vor.u32 %v7215_v13, %v6471_v21  ;;  %v1375_v33 = vsel %vm1363_vm0, %v1350_v20, %v1351_v35  ;;  %v698_v39 = vadd.f32 %v8572_v51, %v697_v56  ;;  %v1706_v13 = vpack.c.bf16 %v8739_v18, %v8739_v18  ;;  %v702_v3 = vpop.f32.mrf.mxu0 }
 0x1a6   : > { %1736 = vst [vmem:[#allocation2 + $0x2d4] sm:$0xf] %v1704_v60  ;;  %v1514_v4 = vsel %vm8760_vm4, %v1375_v33, 0.0  ;;  %v2089_v62 = vsel %vm8702_vm2, %v1375_v33, 0.0  ;;  %v2312_v21 = vsel %vm8710_vm3, %v1792_v16, 0.0  ;;  %v2503_v41 = vsel %vm8652_vm14, %v1375_v33, 0.0 }
 0x1a7   : > { %1992 = vst [vmem:[#allocation2 + $0x2b4] sm:$0xf] %v1960_v6  ;;  %4551 = vmatmul.bf16.gmra.mxu2 %v6474_v5  ;;  %4462 = vmatmul.bf16.gmra.mxu1 %v6470_v25  ;;  %v4424_v6 = vadd.f32 %v8771_v38, %v4423_v1  ;;  %v1546_v20 = vpack.c.bf16 %v1514_v4, %v1514_v4  ;;  %v2854_v1 = vsel %vm8658_vm15, %v1792_v16, 0.0  ;;  %v7198_v4 = vld [vmem:[#allocation2 + $0x204] sm:$0xf] }
 0x1a8   : > { %2151 = vst [vmem:[#allocation2 + $0x294] sm:$0xf] %v2119_v11  ;;  %4714 = vmatmul.bf16.gmra.mxu0 %v6374_v63  ;;  %v744_v11 = vmul.f32 0.1, %v698_v39  ;;  %v2121_v56 = vpack.c.bf16 %v2089_v62, %v2089_v62  ;;  %v2344_v22 = vpack.c.bf16 %v2312_v21, %v2312_v21  ;;  %v745_v54 = vmul.f32 0.1, %v700_v7 }
 0x1a9   : > { %2215 = vst [vmem:[#allocation2 + $0x298] sm:$0xf] %v1704_v60  ;;  %v8803_v37 = vadd.f32 %v8691_v43, %v4424_v6 }
 0x1aa   : > { %2374 = vst [vmem:[#allocation2 + $0x278] sm:$0xf] %v2342_v47 }
 0x1ab   : > { %2565 = vst [vmem:[#allocation2 + $0x258] sm:$0xf] %v2533_v36 }
 0x1ac   : > { %2725 = vst [vmem:[#allocation2 + $0x25c] sm:$0xf] %v1704_v60  ;;  %v8784_v60 = vmax.f32 %v695_v2, %v743_v58  ;;  %v8789_v32 = vpop.f32.mrf.mxu1  ;;  %v8800_v8 = vpop.f32.mrf.mxu2  ;;  %v6505_v47 = vld [vmem:[#allocation2 + $0x2d0] sm:$0xf]  ;;  %v991_v58 = vand.u32 15, %v811_v59 }
 0x1ad   : > { %2916 = vst [vmem:[#allocation2 + $0x23c] sm:$0xf] %v2884_v0  ;;  %v7224_v25 = vld [vmem:[#allocation2 + $0x2d4] sm:$0xf]  ;;  %v8806_v0 = vmax.f32 %v698_v39, %v744_v11 }
 0x1ae   : > { %1577 = vst [vmem:[#allocation2 + $0x2f4] sm:$0xf] %v1545_v31  ;;  %v1352_v5 = vrot.slane %v8784_v60, 7  ;;  %v1769_v55 = vrot.slane %v8784_v60, 1  ;;  %v1707_v16 = vpack.c.bf16 %v8784_v60, %v8784_v60  ;;  %vm8827_vm6 = vcmp.ge.s32.totalorder %v991_v58, 1 }
 0x1af   : > { %1737 = vst [vmem:[#allocation2 + $0x2f8] sm:$0xf] %v1705_v50  ;;  %v1353_v33 = vrot.slane %v8806_v0, 7  ;;  %v1770_v46 = vrot.slane %v8806_v0, 1 }
 0x1b0   : > { %1993 = vst [vmem:[#allocation2 + $0x2d8] sm:$0xf] %v1961_v24  ;;  %v1374_v43 = vsel %vm1363_vm0, %v1351_v35, %v1352_v5  ;;  %v1791_v28 = vsel %vm1780_vm1, %v1768_v57, %v1769_v55  ;;  %v6410_v57 = vor.u32 %v7198_v4, %v6407_v61 }
 0x1b1   : > { %2152 = vst [vmem:[#allocation2 + $0x2b8] sm:$0xf] %v1545_v31  ;;  %v1547_v35 = vpack.c.bf16 %v1374_v43, %v1374_v43  ;;  %v1963_v18 = vpack.c.bf16 %v1791_v28, %v1791_v28  ;;  %v1373_v60 = vsel %vm1363_vm0, %v1352_v5, %v1353_v33  ;;  %v1790_v11 = vsel %vm1780_vm1, %v1769_v55, %v1770_v46 }
 0x1b2   : > { %2216 = vst [vmem:[#allocation2 + $0x2bc] sm:$0xf] %v1705_v50  ;;  %v1516_v21 = vsel %vm8827_vm6, %v1373_v60, 0.0  ;;  %v2314_v55 = vsel %vm8773_vm5, %v1790_v11, 0.0 }
 0x1b3   : > { %2375 = vst [vmem:[#allocation2 + $0x29c] sm:$0xf] %v1961_v24 }
 0x1b4   : > { %2566 = vst [vmem:[#allocation2 + $0x27c] sm:$0xf] %v1545_v31  ;;  %v2535_v31 = vpack.c.bf16 %v2503_v41, %v2503_v41  ;;  %v4428_v63 = vpop.f32.mrf.mxu1  ;;  %v8846_v41 = vmax.f32 %v700_v7, %v745_v54  ;;  %v812_v54 = vadd.s32 200, %v8132_v48 }
 0x1b5   : > { %2726 = vst [vmem:[#allocation2 + $0x280] sm:$0xf] %v1705_v50  ;;  %v7228_v29 = vld [vmem:[#allocation2 + $0x2f0] sm:$0xf0]  ;;  %v810_v50 = vadd.s32 184, %v8132_v48  ;;  %v4429_v5 = vadd.f32 %v8771_v38, %v4428_v63  ;;  %v813_v63 = vadd.s32 208, %v8132_v48 }
 0x1b6   : > { %2917 = vst [vmem:[#allocation2 + $0x260] sm:$0xf] %v1961_v24  ;;  %v6507_v36 = vld [vmem:[#allocation2 + $0x2f4] sm:$0xf0]  ;;  %v6506_v40 = vor.u32 %v7228_v29, %v6505_v47  ;;  %v2886_v24 = vpack.c.bf16 %v2854_v1, %v2854_v1  ;;  %v1354_v59 = vrot.slane %v8846_v41, 7  ;;  %v1771_v58 = vrot.slane %v8846_v41, 1 }
 0x1b7   : > { %1578 = vst [vmem:[#allocation2 + $0x318] sm:$0xf] %v1546_v20  ;;  %v6510_v2 = vor.u32 %v7224_v25, %v6507_v36  ;;  %v984_v39 = vand.u32 15, %v810_v50  ;;  %v7325_v29 = vld [vmem:[#allocation8 + $0x178] sm:$0xff]  ;;  %v1708_v25 = vpack.c.bf16 %v8806_v0, %v8806_v0  ;;  %v2091_v36 = vsel %vm8760_vm4, %v1373_v60, 0.0 }
 0x1b8   : > { %1738 = vst [vmem:[#allocation2 + $0x31c] sm:$0xf] %v1706_v13  ;;  %4467 = vmatmul.bf16.gmra.mxu1 %v6506_v40  ;;  %4719 = vmatmul.bf16.gmra.mxu0 %v6410_v57  ;;  %v2123_v7 = vpack.c.bf16 %v2091_v36, %v2091_v36  ;;  %v6443_v57 = vld [vmem:[#allocation2 + $0x26c] sm:$0xf0] }
 0x1b9   : > { %1994 = vst [vmem:[#allocation2 + $0x2fc] sm:$0xf] %v1962_v17  ;;  %4556 = vmatmul.bf16.gmra.mxu2 %v6510_v2  ;;  %vm8835_vm10 = vcmp.le.s32.totalorder %v984_v39, 14  ;;  %v704_v17 = vpop.f32.mrf.mxu0  ;;  %v2505_v2 = vsel %vm8702_vm2, %v1373_v60, 0.0  ;;  %v7324_v39 = vld [vmem:[#allocation8 + $0x170] sm:$0xff] }
 0x1ba   : > { %2153 = vst [vmem:[#allocation2 + $0x2dc] sm:$0xf] %v2121_v56  ;;  %v1932_v47 = vsel %vm8835_vm10, %v1790_v11, 0.0  ;;  %v1548_v56 = vpack.c.bf16 %v1516_v21, %v1516_v21  ;;  %4854 = vmatpush.bf16.msrb.mxu2 %v7325_v29  ;;  %v2537_v4 = vpack.c.bf16 %v2505_v2, %v2505_v2  ;;  %v705_v60 = vadd.f32 %v8572_v51, %v704_v17  ;;  %v7207_v21 = vld [vmem:[#allocation2 + $0x24c] sm:$0xf] }
 0x1bb   : > { %2217 = vst [vmem:[#allocation2 + $0x2e0] sm:$0xf] %v1706_v13  ;;  %v1964_v43 = vpack.c.bf16 %v1932_v47, %v1932_v47  ;;  %v7323_v29 = vld [vmem:[#allocation8 + $0x168] sm:$0xff]  ;;  %v6446_v36 = vor.u32 %v7207_v21, %v6443_v57  ;;  %v1709_v17 = vpack.c.bf16 %v8846_v41, %v8846_v41 }
 0x1bc   : > { %2376 = vst [vmem:[#allocation2 + $0x2c0] sm:$0xf] %v2344_v22  ;;  %v8862_v1 = vpop.f32.mrf.mxu1  ;;  %v747_v2 = vmul.f32 0.1, %v705_v60 }
 0x1bd   : > { %2567 = vst [vmem:[#allocation2 + $0x2a0] sm:$0xf] %v2535_v31  ;;  %v8865_v31 = vadd.f32 %v8755_v52, %v4429_v5  ;;  %v2346_v52 = vpack.c.bf16 %v2314_v55, %v2314_v55  ;;  %v1005_v5 = vand.u32 15, %v813_v63 }
 0x1be   : > { %2727 = vst [vmem:[#allocation2 + $0x2a4] sm:$0xf] %v1706_v13  ;;  %v8825_v6 = vpop.f32.mrf.mxu2  ;;  %v703_v13 = vadd.f32 %v8572_v51, %v702_v3  ;;  %v6541_v50 = vld [vmem:[#allocation2 + $0x318] sm:$0xf]  ;;  %4855 = vmatpush.bf16.msrb.mxu2 %v7324_v39 }
 0x1bf   : > { %2918 = vst [vmem:[#allocation2 + $0x284] sm:$0xf] %v2886_v24  ;;  %v7233_v24 = vld [vmem:[#allocation2 + $0x31c] sm:$0xf]  ;;  %vm8889_vm12 = vcmp.ge.s32.totalorder %v1005_v5, 1 }
 0x1c0   : > { %1579 = vst [vmem:[#allocation2 + $0x33c] sm:$0xf] %v1547_v35  ;;  %v746_v40 = vmul.f32 0.1, %v703_v13 }
 0x1c1   : > { %1739 = vst [vmem:[#allocation2 + $0x340] sm:$0xf] %v1707_v16  ;;  %v707_v47 = vpop.f32.mrf.mxu0 }
 0x1c2   : > { %1995 = vst [vmem:[#allocation2 + $0x320] sm:$0xf] %v1963_v18  ;;  %4856 = vmatpush.bf16.msrb.mxu2 %v7323_v29 }
 0x1c3   : > { %2154 = vst [vmem:[#allocation2 + $0x300] sm:$0xf] %v1547_v35 }
 0x1c4   : > { %2218 = vst [vmem:[#allocation2 + $0x304] sm:$0xf] %v1707_v16 }
 0x1c5   : > { %2377 = vst [vmem:[#allocation2 + $0x2e4] sm:$0xf] %v1963_v18 }
 0x1c6   : > { %2568 = vst [vmem:[#allocation2 + $0x2c4] sm:$0xf] %v1547_v35  ;;  %v8860_v22 = vpop.f32.mrf.mxu2  ;;  %v8868_v35 = vmax.f32 %v703_v13, %v746_v40  ;;  %v7317_v13 = vld [vmem:[#allocation8 + $0x138] sm:$0xff]  ;;  %v998_v40 = vand.u32 15, %v812_v54 }
 0x1c7   : > { %2728 = vst [vmem:[#allocation2 + $0x2c8] sm:$0xf] %v1707_v16  ;;  %v7237_v3 = vld [vmem:[#allocation2 + $0x338] sm:$0xf0]  ;;  %v2856_v16 = vsel %vm8710_vm3, %v1790_v11, 0.0  ;;  %v1789_v11 = vsel %vm1780_vm1, %v1770_v46, %v1771_v58  ;;  %4765 = vmatpush.bf16.msrb.mxu1 %v7317_v13 }
 0x1c8   : > { %2919 = vst [vmem:[#allocation2 + $0x2a8] sm:$0xf] %v1963_v18  ;;  %v6543_v28 = vld [vmem:[#allocation2 + $0x33c] sm:$0xf0]  ;;  %v6542_v53 = vor.u32 %v7237_v3, %v6541_v50  ;;  %v1372_v18 = vsel %vm1363_vm0, %v1353_v33, %v1354_v59  ;;  %v2888_v23 = vpack.c.bf16 %v2856_v16, %v2856_v16  ;;  %v1355_v33 = vrot.slane %v8868_v35, 7  ;;  %4724 = vmatmul.bf16.gmra.mxu0 %v6446_v36 }
 0x1c9   : > { %1580 = vst [vmem:[#allocation2 + $0x360] sm:$0xf] %v1548_v56  ;;  %v6546_v61 = vor.u32 %v7233_v24, %v6543_v28  ;;  %v1549_v56 = vpack.c.bf16 %v1372_v18, %v1372_v18  ;;  %v1772_v55 = vrot.slane %v8868_v35, 1  ;;  %v1965_v0 = vpack.c.bf16 %v1789_v11, %v1789_v11  ;;  %v709_v39 = vpop.f32.mrf.mxu0 }
 0x1ca   : > { %1740 = vst [vmem:[#allocation2 + $0x364] sm:$0xf] %v1708_v25  ;;  %4472 = vmatmul.bf16.gmra.mxu1 %v6542_v53  ;;  %v1371_v41 = vsel %vm1363_vm0, %v1354_v59, %v1355_v33  ;;  %vm8897_vm13 = vcmp.le.s32.totalorder %v998_v40, 14  ;;  %v8909_v59 = vmax.f32 %v705_v60, %v747_v2  ;;  %v7321_v40 = vld [vmem:[#allocation8 + $0x158] sm:$0xff] }
 0x1cb   : > { %1996 = vst [vmem:[#allocation2 + $0x344] sm:$0xf] %v1964_v43  ;;  %4561 = vmatmul.bf16.gmra.mxu2 %v6546_v61  ;;  %v4433_v43 = vpop.f32.mrf.mxu1  ;;  %v1788_v3 = vsel %vm1780_vm1, %v1771_v58, %v1772_v55  ;;  %v1518_v28 = vsel %vm8889_vm12, %v1371_v41, 0.0  ;;  %v2093_v58 = vsel %vm8827_vm6, %v1371_v41, 0.0  ;;  %v2507_v54 = vsel %vm8760_vm4, %v1371_v41, 0.0 }
 0x1cc   : > { %2155 = vst [vmem:[#allocation2 + $0x324] sm:$0xf] %v2123_v7  ;;  %v708_v7 = vadd.f32 %v8572_v51, %v707_v47  ;;  %v4434_v24 = vadd.f32 %v8771_v38, %v4433_v43  ;;  %v1934_v53 = vsel %vm8897_vm13, %v1788_v3, 0.0  ;;  %v1550_v61 = vpack.c.bf16 %v1518_v28, %v1518_v28  ;;  %v6479_v2 = vld [vmem:[#allocation2 + $0x2b4] sm:$0xf0] }
 0x1cd   : > { %2219 = vst [vmem:[#allocation2 + $0x328] sm:$0xf] %v1708_v25  ;;  %v2316_v18 = vsel %vm8835_vm10, %v1788_v3, 0.0  ;;  %v1356_v57 = vrot.slane %v8909_v59, 7  ;;  %v1966_v13 = vpack.c.bf16 %v1934_v53, %v1934_v53  ;;  %v1773_v29 = vrot.slane %v8909_v59, 1 }
 0x1ce   : > { %2378 = vst [vmem:[#allocation2 + $0x308] sm:$0xf] %v2346_v52  ;;  %v748_v63 = vmul.f32 0.1, %v708_v7  ;;  %v7322_v52 = vld [vmem:[#allocation8 + $0x160] sm:$0xff]  ;;  %v8916_v16 = vadd.f32 %v8825_v6, %v4434_v24  ;;  %v2858_v43 = vsel %vm8773_vm5, %v1788_v3, 0.0 }
 0x1cf   : > { %2569 = vst [vmem:[#allocation2 + $0x2e8] sm:$0xf] %v2537_v4  ;;  %v1710_v4 = vpack.c.bf16 %v8868_v35, %v8868_v35  ;;  %4857 = vmatpush.bf16.msrb.mxu2 %v7322_v52  ;;  %v1370_v41 = vsel %vm1363_vm0, %v1355_v33, %v1356_v57  ;;  %v7216_v24 = vld [vmem:[#allocation2 + $0x294] sm:$0xf]  ;;  %v1787_v26 = vsel %vm1780_vm1, %v1772_v55, %v1773_v29 }
 0x1d0   : > { %2729 = vst [vmem:[#allocation2 + $0x2ec] sm:$0xf] %v1708_v25  ;;  %v8887_v46 = vpop.f32.mrf.mxu2  ;;  %v6577_v21 = vld [vmem:[#allocation2 + $0x360] sm:$0xf]  ;;  %v8928_v45 = vmax.f32 %v708_v7, %v748_v63  ;;  %v710_v7 = vadd.f32 %v8572_v51, %v709_v39  ;;  %v6482_v53 = vor.u32 %v7216_v24, %v6479_v2  ;;  %v1551_v33 = vpack.c.bf16 %v1370_v41, %v1370_v41 }
 0x1d1   : > { %2920 = vst [vmem:[#allocation2 + $0x2cc] sm:$0xf] %v2888_v23  ;;  %v2125_v23 = vpack.c.bf16 %v2093_v58, %v2093_v58  ;;  %v7242_v11 = vld [vmem:[#allocation2 + $0x364] sm:$0xf]  ;;  %v7320_v58 = vld [vmem:[#allocation8 + $0x150] sm:$0xff]  ;;  %v1711_v51 = vpack.c.bf16 %v8909_v59, %v8909_v59  ;;  %v8946_v52 = vpop.f32.mrf.mxu0  ;;  %v1967_v35 = vpack.c.bf16 %v1787_v26, %v1787_v26 }
 0x1d2   : > { %1581 = vst [vmem:[#allocation2 + $0x384] sm:$0xf] %v1549_v56  ;;  %v1357_v3 = vrot.slane %v8928_v45, 7  ;;  %v1774_v63 = vrot.slane %v8928_v45, 1  ;;  %v749_v39 = vmul.f32 0.1, %v710_v7 }
 0x1d3   : > { %1741 = vst [vmem:[#allocation2 + $0x388] sm:$0xf] %v1709_v17  ;;  %v4435_v36 = vpop.f32.mrf.mxu1  ;;  %4858 = vmatpush.bf16.msrb.mxu2 %v7321_v40  ;;  %v6515_v2 = vld [vmem:[#allocation2 + $0x2fc] sm:$0xf0] }
 0x1d4   : > { %1997 = vst [vmem:[#allocation2 + $0x368] sm:$0xf] %v1965_v0  ;;  %v4436_v28 = vadd.f32 %v8771_v38, %v4435_v36 }
 0x1d5   : > { %2156 = vst [vmem:[#allocation2 + $0x348] sm:$0xf] %v1549_v56 }
 0x1d6   : > { %2220 = vst [vmem:[#allocation2 + $0x34c] sm:$0xf] %v1709_v17  ;;  %v8951_v55 = vadd.f32 %v8860_v22, %v4436_v28  ;;  %v1786_v22 = vsel %vm1780_vm1, %v1773_v29, %v1774_v63 }
 0x1d7   : > { %2379 = vst [vmem:[#allocation2 + $0x32c] sm:$0xf] %v1965_v0  ;;  %4859 = vmatpush.bf16.msrb.mxu2 %v7320_v58 }
 0x1d8   : > { %2570 = vst [vmem:[#allocation2 + $0x30c] sm:$0xf] %v1549_v56  ;;  %v8925_v60 = vpop.f32.mrf.mxu2  ;;  %4729 = vmatmul.bf16.gmra.mxu0 %v6482_v53 }
 0x1d9   : > { %2730 = vst [vmem:[#allocation2 + $0x310] sm:$0xf] %v1709_v17  ;;  %v7246_v6 = vld [vmem:[#allocation2 + $0x380] sm:$0xf0]  ;;  %v2348_v17 = vpack.c.bf16 %v2316_v18, %v2316_v18  ;;  %v8974_v40 = vpop.f32.mrf.mxu0 }
 0x1da   : > { %2921 = vst [vmem:[#allocation2 + $0x2f0] sm:$0xf] %v1965_v0  ;;  %v6579_v5 = vld [vmem:[#allocation2 + $0x384] sm:$0xf0]  ;;  %v6578_v47 = vor.u32 %v7246_v6, %v6577_v21  ;;  %v2539_v0 = vpack.c.bf16 %v2507_v54, %v2507_v54  ;;  %v1369_v54 = vsel %vm1363_vm0, %v1356_v57, %v1357_v3  ;;  %v7316_v6 = vld [vmem:[#allocation8 + $0x130] sm:$0xff] }
 0x1db   : > { %1582 = vst [vmem:[#allocation2 + $0x3a8] sm:$0xf] %v1550_v61  ;;  %v6582_v56 = vor.u32 %v7242_v11, %v6579_v5  ;;  %v2890_v61 = vpack.c.bf16 %v2858_v43, %v2858_v43  ;;  %v4438_v59 = vpop.f32.mrf.mxu1  ;;  %4766 = vmatpush.bf16.msrb.mxu1 %v7316_v6  ;;  %v7315_v57 = vld [vmem:[#allocation8 + $0x128] sm:$0xff]  ;;  %v7318_v5 = vld [vmem:[#allocation8 + $0x140] sm:$0xff]  ;;  %v2509_v43 = vsel %vm8827_vm6, %v1369_v54, 0.0 }
 0x1dc   : > { %1742 = vst [vmem:[#allocation2 + $0x3ac] sm:$0xf] %v1710_v4  ;;  %4477 = vmatmul.bf16.gmra.mxu1 %v6578_v47  ;;  %v4439_v21 = vadd.f32 %v8771_v38, %v4438_v59  ;;  %v1936_v47 = vsel %vm8282_vm11, %v1786_v22, 0.0 }
 0x1dd   : > { %1998 = vst [vmem:[#allocation2 + $0x38c] sm:$0xf] %v1966_v13  ;;  %4566 = vmatmul.bf16.gmra.mxu2 %v6582_v56  ;;  %v7319_v13 = vld [vmem:[#allocation8 + $0x148] sm:$0xff]  ;;  %v2095_v56 = vsel %vm8889_vm12, %v1369_v54, 0.0  ;;  %v1968_v24 = vpack.c.bf16 %v1936_v47, %v1936_v47 }
 0x1de   : > { %2157 = vst [vmem:[#allocation2 + $0x36c] sm:$0xf] %v2125_v23  ;;  %v1520_v23 = vsel %vm8253_vm8, %v1369_v54, 0.0  ;;  %v8967_v11 = vadd.f32 %v8887_v46, %v4439_v21  ;;  %4860 = vmatpush.bf16.msrb.mxu2 %v7319_v13  ;;  %v1712_v46 = vpack.c.bf16 %v8928_v45, %v8928_v45  ;;  %v2127_v26 = vpack.c.bf16 %v2095_v56, %v2095_v56 }
 0x1df   : > { %2221 = vst [vmem:[#allocation2 + $0x370] sm:$0xf] %v1710_v4  ;;  %v1552_v29 = vpack.c.bf16 %v1520_v23, %v1520_v23  ;;  %4767 = vmatpush.bf16.msrb.mxu1 %v7315_v57  ;;  %v2860_v21 = vsel %vm8835_vm10, %v1786_v22, 0.0  ;;  %v2541_v57 = vpack.c.bf16 %v2509_v43, %v2509_v43 }
 0x1e0   : > { %2380 = vst [vmem:[#allocation2 + $0x350] sm:$0xf] %v2348_v17  ;;  %v2318_v17 = vsel %vm8897_vm13, %v1786_v22, 0.0 }
 0x1e1   : > { %2571 = vst [vmem:[#allocation2 + $0x330] sm:$0xf] %v2539_v0  ;;  %v2350_v13 = vpack.c.bf16 %v2318_v17, %v2318_v17  ;;  %v7311_v17 = vld [vmem:[#allocation8 + $0x108] sm:$0xff] }
 0x1e2   : > { %2731 = vst [vmem:[#allocation2 + $0x334] sm:$0xf] %v1710_v4  ;;  %v8948_v18 = vpop.f32.mrf.mxu2  ;;  %v8962_v4 = vmax.f32 %v710_v7, %v749_v39  ;;  %v7314_v7 = vld [vmem:[#allocation8 + $0x120] sm:$0xff]  ;;  %4861 = vmatpush.bf16.msrb.mxu2 %v7318_v5  ;;  %v6613_v53 = vld [vmem:[#allocation2 + $0x3a8] sm:$0xf]  ;;  %v9005_v5 = vpop.f32.mrf.mxu0 }
 0x1e3   : > { %2922 = vst [vmem:[#allocation2 + $0x314] sm:$0xf] %v2890_v61  ;;  %v4440_v28 = vpop.f32.mrf.mxu1  ;;  %v7251_v58 = vld [vmem:[#allocation2 + $0x3ac] sm:$0xf]  ;;  %4768 = vmatpush.bf16.msrb.mxu1 %v7314_v7  ;;  %v7310_v7 = vld [vmem:[#allocation8 + $0x100] sm:$0xff] }
 0x1e4   : > { %1583 = vst [vmem:[#allocation2 + $0x3cc] sm:$0xf] %v1551_v33  ;;  %v1358_v36 = vrot.slane %v8962_v4, 7  ;;  %v1775_v0 = vrot.slane %v8962_v4, 1  ;;  %v4441_v39 = vadd.f32 %v8771_v38, %v4440_v28  ;;  %v1713_v56 = vpack.c.bf16 %v8962_v4, %v8962_v4  ;;  %v7136_v28 = vld [vmem:[#allocation2 + $0x14] sm:$0xf] }
 0x1e5   : > { %1743 = vst [vmem:[#allocation2 + $0x3d0] sm:$0xf] %v1711_v51 }
 0x1e6   : > { %1999 = vst [vmem:[#allocation2 + $0x3b0] sm:$0xf] %v1967_v35  ;;  %v1367_v20 = vsel %vm1363_vm0, %v1358_v36, %v1359_v10  ;;  %v8993_v23 = vadd.f32 %v8925_v60, %v4441_v39  ;;  %v1368_v10 = vsel %vm1363_vm0, %v1357_v3, %v1358_v36  ;;  %v1784_v22 = vsel %vm1780_vm1, %v1775_v0, %v1776_v14 }
 0x1e7   : > { %2158 = vst [vmem:[#allocation2 + $0x390] sm:$0xf] %v1551_v33  ;;  %v1522_v62 = vsel %vm8240_vm7, %v1367_v20, 0.0  ;;  %v2892_v60 = vpack.c.bf16 %v2860_v21, %v2860_v21  ;;  %v1553_v47 = vpack.c.bf16 %v1368_v10, %v1368_v10  ;;  %v1785_v3 = vsel %vm1780_vm1, %v1774_v63, %v1775_v0  ;;  %v6163_v0 = vld [vmem:[#allocation2 + $0x34] sm:$0xf0]  ;;  %v7300_v10 = vld [vmem:[#allocation8 + $0xb0] sm:$0xff] }
 0x1e8   : > { %2222 = vst [vmem:[#allocation2 + $0x394] sm:$0xf] %v1711_v51  ;;  %v1938_v49 = vsel %vm8257_vm9, %v1784_v22, 0.0  ;;  %v1969_v45 = vpack.c.bf16 %v1785_v3, %v1785_v3  ;;  %v2097_v48 = vsel %vm8253_vm8, %v1367_v20, 0.0  ;;  %v2320_v4 = vsel %vm8282_vm11, %v1784_v22, 0.0 }
 0x1e9   : > { %2381 = vst [vmem:[#allocation2 + $0x374] sm:$0xf] %v1967_v35  ;;  %v1970_v63 = vpack.c.bf16 %v1938_v49, %v1938_v49  ;;  %v2511_v42 = vsel %vm8889_vm12, %v1367_v20, 0.0  ;;  %v2862_v30 = vsel %vm8897_vm13, %v1784_v22, 0.0  ;;  %v6166_v39 = vor.u32 %v7136_v28, %v6163_v0  ;;  %v6197_v0 = vld [vmem:[#allocation2 + $0x58] sm:$0xf] }
 0x1ea   : > { %2572 = vst [vmem:[#allocation2 + $0x354] sm:$0xf] %v1551_v33  ;;  %v8983_v41 = vpop.f32.mrf.mxu2  ;;  %v9025_v43 = vpop.f32.mrf.mxu0  ;;  %v2543_v50 = vpack.c.bf16 %v2511_v42, %v2511_v42 }
 0x1eb   : > { %2732 = vst [vmem:[#allocation2 + $0x358] sm:$0xf] %v1711_v51  ;;  %v7255_v61 = vld [vmem:[#allocation2 + $0x3c8] sm:$0xf0]  ;;  %v7225_v51 = vld [vmem:[#allocation2 + $0x2dc] sm:$0xf]  ;;  %v4443_v14 = vpop.f32.mrf.mxu1 }
 0x1ec   : > { %2923 = vst [vmem:[#allocation2 + $0x338] sm:$0xf] %v1967_v35  ;;  %v6615_v33 = vld [vmem:[#allocation2 + $0x3cc] sm:$0xf0]  ;;  %v6614_v59 = vor.u32 %v7255_v61, %v6613_v53  ;;  %v7313_v35 = vld [vmem:[#allocation8 + $0x118] sm:$0xff]  ;;  %v6518_v6 = vor.u32 %v7225_v51, %v6515_v2  ;;  %v4444_v2 = vadd.f32 %v8771_v38, %v4443_v14 }
 0x1ed   : > { %1584 = vst [vmem:[#allocation2 + $0x3f0] sm:$0xf] %v1552_v29  ;;  %v6618_v54 = vor.u32 %v7251_v58, %v6615_v33  ;;  %4769 = vmatpush.bf16.msrb.mxu1 %v7313_v35  ;;  %v1554_v29 = vpack.c.bf16 %v1522_v62, %v1522_v62  ;;  %v6551_v61 = vld [vmem:[#allocation2 + $0x344] sm:$0xf0]  ;;  %v7234_v33 = vld [vmem:[#allocation2 + $0x324] sm:$0xf]  ;;  %v2894_v35 = vpack.c.bf16 %v2862_v30, %v2862_v30 }
 0x1ee   : > { %1744 = vst [vmem:[#allocation2 + $0x3f4] sm:$0xf] %v1712_v46  ;;  %4482 = vmatmul.bf16.gmra.mxu1 %v6614_v59  ;;  %4734 = vmatmul.bf16.gmra.mxu0 %v6518_v6  ;;  %v9021_v44 = vadd.f32 %v8948_v18, %v4444_v2  ;;  %v2352_v18 = vpack.c.bf16 %v2320_v4, %v2320_v4  ;;  %v6161_v51 = vld [vmem:[#allocation2 + $0x10] sm:$0xf]  ;;  %v7301_v6 = vld [vmem:[#allocation8 + $0xb8] sm:$0xff] }
 0x1ef   : > { %2000 = vst [vmem:[#allocation2 + $0x3d4] sm:$0xf] %v1968_v24  ;;  %4571 = vmatmul.bf16.gmra.mxu2 %v6618_v54  ;;  %v7140_v24 = vld [vmem:[#allocation2 + $0x30] sm:$0xf0]  ;;  %v7145_v2 = vld [vmem:[#allocation2 + $0x5c] sm:$0xf] }
 0x1f0   : > { %2159 = vst [vmem:[#allocation2 + $0x3b4] sm:$0xf] %v2127_v26  ;;  %v6162_v25 = vor.u32 %v7140_v24, %v6161_v51 }
 0x1f1   : > { %2223 = vst [vmem:[#allocation2 + $0x3b8] sm:$0xf] %v1712_v46  ;;  %4770 = vmatpush.bf16.msrb.mxu1 %v7312_v12  ;;  %v6199_v12 = vld [vmem:[#allocation2 + $0x7c] sm:$0xf0] }
 0x1f2   : > { %2382 = vst [vmem:[#allocation2 + $0x398] sm:$0xf] %v2350_v13  ;;  %v6554_v13 = vor.u32 %v7234_v33, %v6551_v61 }
 0x1f3   : > { %2573 = vst [vmem:[#allocation2 + $0x378] sm:$0xf] %v2541_v57  ;;  %v4445_v53 = vpop.f32.mrf.mxu1  ;;  %v9035_v57 = vpop.f32.mrf.mxu0 }
 0x1f4   : > { %2733 = vst [vmem:[#allocation2 + $0x37c] sm:$0xf] %v1712_v46  ;;  %v9015_v36 = vpop.f32.mrf.mxu2  ;;  %v2129_v46 = vpack.c.bf16 %v2097_v48, %v2097_v48  ;;  %v4446_v58 = vadd.f32 %v8771_v38, %v4445_v53  ;;  %v6649_v20 = vld [vmem:[#allocation2 + $0x3f0] sm:$0xf]  ;;  %v7149_v48 = vld [vmem:[#allocation2 + $0x78] sm:$0xf0] }
 0x1f5   : > { %2924 = vst [vmem:[#allocation2 + $0x35c] sm:$0xf] %v2892_v60  ;;  %4771 = vmatpush.bf16.msrb.mxu1 %v7311_v17  ;;  %v7299_v60 = vld [vmem:[#allocation8 + $0xa8] sm:$0xff]  ;;  %v7273_v17 = vld [vmem:[#allocation2 + $0x458] sm:$0xf0]  ;;  %v6198_v24 = vor.u32 %v7149_v48, %v6197_v0  ;;  %v7296_v53 = vld [vmem:[#allocation8 + $0x90] sm:$0xff] }
 0x1f6   : > { %1585 = vst [vmem:[#allocation2 + $0x414] sm:$0xf] %v1553_v47  ;;  %v9033_v21 = vadd.f32 %v8983_v41, %v4446_v58  ;;  %v7295_v58 = vld [vmem:[#allocation8 + $0x88] sm:$0xff] }
 0x1f7   : > { %1586 = vst [vmem:[#allocation2 + $0x438] sm:$0xf] %v1554_v29  ;;  %v7298_v29 = vld [vmem:[#allocation8 + $0xa0] sm:$0xff] }
 0x1f8   : > { %1745 = vst [vmem:[#allocation2 + $0x418] sm:$0xf] %v1713_v56 }
 0x1f9   : > { %2001 = vst [vmem:[#allocation2 + $0x3f8] sm:$0xf] %v1969_v45  ;;  %4772 = vmatpush.bf16.msrb.mxu1 %v7310_v7 }
 0x1fa   : > { %2002 = vst [vmem:[#allocation2 + $0x41c] sm:$0xf] %v1970_v63  ;;  %v6202_v63 = vor.u32 %v7145_v2, %v6199_v12 }
 0x1fb   : > { %2160 = vst [vmem:[#allocation2 + $0x3d8] sm:$0xf] %v1553_v47  ;;  %v4448_v62 = vpop.f32.mrf.mxu1  ;;  %v9041_v3 = vpop.f32.mrf.mxu0 }
 0x1fc   : > { %2161 = vst [vmem:[#allocation2 + $0x3fc] sm:$0xf] %v2129_v46  ;;  %v4539_v26 = vpop.f32.mrf.mxu2  ;;  %v4449_v41 = vadd.f32 %v8771_v38, %v4448_v62  ;;  %v7243_v46 = vld [vmem:[#allocation2 + $0x36c] sm:$0xf]  ;;  %v7252_v62 = vld [vmem:[#allocation2 + $0x3b4] sm:$0xf] }
 0x1fd   : > { %2224 = vst [vmem:[#allocation2 + $0x3dc] sm:$0xf] %v1713_v56  ;;  %v7264_v54 = vld [vmem:[#allocation2 + $0x410] sm:$0xf0] }
 0x1fe   : > { %2383 = vst [vmem:[#allocation2 + $0x3bc] sm:$0xf] %v1969_v45  ;;  %v6650_v59 = vor.u32 %v7264_v54, %v6649_v20  ;;  %4739 = vmatmul.bf16.gmra.mxu0 %v6554_v13  ;;  %4773 = vmatmul.bf16.vlgmr.msrb.gmra.mxu1 %v6162_v25  ;;  %v6685_v49 = vld [vmem:[#allocation2 + $0x438] sm:$0xf]  ;;  %v7294_v20 = vld [vmem:[#allocation8 + $0x80] sm:$0xff] }
 0x1ff   : > { %2384 = vst [vmem:[#allocation2 + $0x3e0] sm:$0xf] %v2352_v18  ;;  %4862 = vmatmul.bf16.vlgmr.msrb.gmra.mxu2 %v6166_v39  ;;  %v6686_v4 = vor.u32 %v7273_v17, %v6685_v49  ;;  %v7297_v18 = vld [vmem:[#allocation8 + $0x98] sm:$0xff]  ;;  %v6235_v39 = vld [vmem:[#allocation2 + $0xc4] sm:$0xf0] }
 0x200   : > { %2574 = vst [vmem:[#allocation2 + $0x39c] sm:$0xf] %v1553_v47  ;;  %4487 = vmatmul.bf16.vlgmr.msrb.gmra.mxu3 %v6650_v59  ;;  %v9039_v47 = vadd.f32 %v9015_v36, %v4449_v41  ;;  %v6651_v54 = vld [vmem:[#allocation2 + $0x414] sm:$0xf0]  ;;  %v7154_v13 = vld [vmem:[#allocation2 + $0xa4] sm:$0xf] }
 0x201   : > { %2575 = vst [vmem:[#allocation2 + $0x3c0] sm:$0xf] %v2543_v50  ;;  %4587 = vmatpush.bf16.msrb.mxu3 %v7301_v6  ;;  %v6238_v6 = vor.u32 %v7154_v13, %v6235_v39 }
 0x202   : > { %2734 = vst [vmem:[#allocation2 + $0x3a0] sm:$0xf] %v1713_v56  ;;  %v6587_v56 = vld [vmem:[#allocation2 + $0x38c] sm:$0xf0]  ;;  %v6623_v51 = vld [vmem:[#allocation2 + $0x3d4] sm:$0xf0] }
 0x203   : > { %2925 = vst [vmem:[#allocation2 + $0x380] sm:$0xf] %v1969_v45  ;;  %v4450_v14 = vpop.f32.mrf.mxu1  ;;  %v6590_v36 = vor.u32 %v7243_v46, %v6587_v56  ;;  %v9046_v28 = vpop.f32.mrf.mxu0  ;;  %v7269_v46 = vld [vmem:[#allocation2 + $0x43c] sm:$0xf] }
 0x204   : > { %2926 = vst [vmem:[#allocation2 + $0x3a4] sm:$0xf] %v2894_v35  ;;  %v4451_v45 = vadd.f32 %v8771_v38, %v4450_v14  ;;  %v7158_v35 = vld [vmem:[#allocation2 + $0xc0] sm:$0xf0]  ;;  %v7261_v0 = vld [vmem:[#allocation2 + $0x3fc] sm:$0xf] }
 0x205   : > { %4588 = vmatpush.bf16.msrb.mxu3 %v7300_v10  ;;  %v7260_v10 = vld [vmem:[#allocation2 + $0x3f4] sm:$0xf] }
 0x206   : > { %v4542_v22 = vpop.f32.mrf.mxu2  ;;  %v9044_v7 = vadd.f32 %v4539_v26, %v4451_v45  ;;  %v6654_v41 = vor.u32 %v7260_v10, %v6651_v54  ;;  %v7341_v54 = vld [vmem:[#allocation8 + $0x1f8] sm:$0xff]  ;;  %v6153_v10 = vld [vmem:[#allocation2 + $0x8] sm:$0xf] }
 0x207   : > { %5032 = vmatpush.bf16.msra.mxu0 %v7341_v54 }
 0x209   : > { %4589 = vmatpush.bf16.msrb.mxu3 %v7299_v60  ;;  %v6233_v60 = vld [vmem:[#allocation2 + $0xa0] sm:$0xf] }
 0x20b   : > { %v4453_v61 = vpop.f32.mrf.mxu1  ;;  %v9051_v26 = vpop.f32.mrf.mxu0 }
 0x20c   : > { %v4454_v30 = vadd.f32 %v8771_v38, %v4453_v61  ;;  %10220 = vst [vmem:[#allocation20_spill] sm:$0xff] %v9051_v26  ;;  %v6659_v61 = vld [vmem:[#allocation2 + $0x41c] sm:$0xf0] }
 0x20d   : > { %4590 = vmatpush.bf16.msrb.mxu3 %v7298_v29  ;;  %v6234_v29 = vor.u32 %v7158_v35, %v6233_v60  ;;  %v6662_v39 = vor.u32 %v7261_v0, %v6659_v61  ;;  %v7340_v35 = vld [vmem:[#allocation8 + $0x1f0] sm:$0xff]  ;;  %v6307_v60 = vld [vmem:[#allocation2 + $0x154] sm:$0xf0]  ;;  %v7338_v61 = vld [vmem:[#allocation8 + $0x1e0] sm:$0xff] }
 0x20e   : > { %v4544_v42 = vpop.f32.mrf.mxu2  ;;  %4744 = vmatmul.bf16.gmra.mxu0 %v6590_v36  ;;  %4778 = vmatmul.bf16.gmra.mxu1 %v6198_v24  ;;  %v9049_v33 = vadd.f32 %v4542_v22, %v4454_v30  ;;  %v6626_v22 = vor.u32 %v7252_v62, %v6623_v51  ;;  %v7163_v36 = vld [vmem:[#allocation2 + $0xec] sm:$0xf]  ;;  %v6305_v0 = vld [vmem:[#allocation2 + $0x130] sm:$0xf] }
 0x20f   : > { %4867 = vmatmul.bf16.gmra.mxu2 %v6202_v63  ;;  %v6271_v63 = vld [vmem:[#allocation2 + $0x10c] sm:$0xf0]  ;;  %5033 = vmatpush.bf16.msra.mxu0 %v7340_v35  ;;  %v7139_v62 = vld [vmem:[#allocation2 + $0x28] sm:$0xf0] }
 0x210   : > { %4492 = vmatmul.bf16.gmra.mxu3 %v6686_v4  ;;  %v6687_v4 = vld [vmem:[#allocation2 + $0x45c] sm:$0xf0] }
 0x211   : > { %4591 = vmatpush.bf16.msrb.mxu3 %v7297_v18  ;;  %v7167_v18 = vld [vmem:[#allocation2 + $0x108] sm:$0xf0]  ;;  %v6690_v30 = vor.u32 %v7269_v46, %v6687_v4  ;;  %v7176_v4 = vld [vmem:[#allocation2 + $0x150] sm:$0xf0] }
 0x213   : > { %v4455_v59 = vpop.f32.mrf.mxu1  ;;  %v9056_v14 = vpop.f32.mrf.mxu0 }
 0x214   : > { %v4456_v25 = vadd.f32 %v8771_v38, %v4455_v59  ;;  %10221 = vst [vmem:[#allocation21_spill] sm:$0xff] %v9056_v14  ;;  %v6351_v14 = vld [vmem:[#allocation2 + $0x1a4] sm:$0xf0] }
 0x215   : > { %4592 = vmatpush.bf16.msrb.mxu3 %v7296_v53  ;;  %v6274_v53 = vor.u32 %v7163_v36, %v6271_v63  ;;  %v6154_v63 = vor.u32 %v7139_v62, %v6153_v10  ;;  %v7181_v10 = vld [vmem:[#allocation2 + $0x17c] sm:$0xf] }
 0x216   : > { %v9054_v12 = vadd.f32 %v4544_v42, %v4456_v25  ;;  %v7185_v62 = vld [vmem:[#allocation2 + $0x198] sm:$0xf0] }
 0x218   : > { %v4547_v50 = vpop.f32.mrf.mxu2 }
 0x219   : > { %4593 = vmatpush.bf16.msrb.mxu3 %v7295_v58  ;;  %v6269_v58 = vld [vmem:[#allocation2 + $0xe8] sm:$0xf] }
 0x21b   : > { %v4458_v56 = vpop.f32.mrf.mxu1  ;;  %v9061_v48 = vpop.f32.mrf.mxu0 }
 0x21c   : > { %v4459_v2 = vadd.f32 %v8771_v38, %v4458_v56  ;;  %10222 = vst [vmem:[#allocation22_spill] sm:$0xff] %v9061_v48  ;;  %v7172_v56 = vld [vmem:[#allocation2 + $0x134] sm:$0xf]  ;;  %v6521_v48 = vld [vmem:[#allocation2 + $0x2e0] sm:$0xf] }
 0x21d   : > { %4594 = vmatpush.bf16.msrb.mxu3 %v7294_v20 }
 0x21e   : > { %4749 = vmatmul.bf16.gmra.mxu0 %v6626_v22  ;;  %4783 = vmatmul.bf16.gmra.mxu1 %v6234_v29  ;;  %v9059_v45 = vadd.f32 %v4547_v50, %v4459_v2  ;;  %v6270_v50 = vor.u32 %v7167_v18, %v6269_v58  ;;  %v7270_v29 = vld [vmem:[#allocation2 + $0x444] sm:$0xf]  ;;  %v7339_v18 = vld [vmem:[#allocation8 + $0x1e8] sm:$0xff]  ;;  %v7337_v58 = vld [vmem:[#allocation8 + $0x1d8] sm:$0xff] }
 0x21f   : > { %4872 = vmatmul.bf16.gmra.mxu2 %v6238_v6  ;;  %5034 = vmatpush.bf16.msra.mxu0 %v7339_v18 }
 0x220   : > { %4576 = vmatmul.bf16.vlgmr.msra.gmra.mxu3 %v6654_v41  ;;  %v4549_v49 = vpop.f32.mrf.mxu2 }
 0x223   : > { %v4460_v42 = vpop.f32.mrf.mxu1  ;;  %v9066_v59 = vpop.f32.mrf.mxu0  ;;  %5035 = vmatpush.bf16.msra.mxu0 %v7338_v61  ;;  %v7137_v61 = vld [vmem:[#allocation2 + $0x1c] sm:$0xf] }
 0x224   : > { %v4461_v24 = vadd.f32 %v8771_v38, %v4460_v42  ;;  %10223 = vst [vmem:[#allocation23_spill] sm:$0xff] %v9066_v59  ;;  %v6310_v42 = vor.u32 %v7172_v56, %v6307_v60  ;;  %v6341_v56 = vld [vmem:[#allocation2 + $0x178] sm:$0xf] }
 0x226   : > { %v9064_v20 = vadd.f32 %v4549_v49, %v4461_v24  ;;  %v6695_v49 = vld [vmem:[#allocation2 + $0x464] sm:$0xf0]  ;;  %v6306_v24 = vor.u32 %v7176_v4, %v6305_v0  ;;  %v9086_v4 = vld [vmem:[%s10134_s4] ss:$0 sm:$0xff] }
 0x227   : > { %v6698_v36 = vor.u32 %v7270_v29, %v6695_v49  ;;  %5036 = vmatpush.bf16.msra.mxu0 %v7337_v58  ;;  %v6189_v29 = vld [vmem:[#allocation2 + $0x50] sm:$0xf]  ;;  %v7334_v0 = vld [vmem:[#allocation8 + $0x1c0] sm:$0xff] }
 0x22a   : > { %v4552_v17 = vpop.f32.mrf.mxu2 }
 0x22b   : > { %v4463_v13 = vpop.f32.mrf.mxu1  ;;  %v9071_v41 = vpop.f32.mrf.mxu0 }
 0x22c   : > { %v4464_v25 = vadd.f32 %v8771_v38, %v4463_v13  ;;  %10224 = vst [vmem:[#allocation24_spill] sm:$0xff] %v9071_v41  ;;  %v6343_v13 = vld [vmem:[#allocation2 + $0x19c] sm:$0xf0] }
 0x22e   : > { %4754 = vmatmul.bf16.gmra.mxu0 %v6662_v39  ;;  %4788 = vmatmul.bf16.gmra.mxu1 %v6270_v50  ;;  %v9069_v6 = vadd.f32 %v4552_v17, %v4464_v25  ;;  %v7148_v25 = vld [vmem:[#allocation2 + $0x70] sm:$0xf0] }
 0x22f   : > { %4877 = vmatmul.bf16.gmra.mxu2 %v6274_v53  ;;  %v6190_v49 = vor.u32 %v7148_v25, %v6189_v29 }
 0x230   : > { %4581 = vmatmul.bf16.gmra.mxu3 %v6690_v30 }
 0x232   : > { %v4554_v51 = vpop.f32.mrf.mxu2 }
 0x233   : > { %v4465_v22 = vpop.f32.mrf.mxu1  ;;  %v9076_v53 = vpop.f32.mrf.mxu0 }
 0x234   : > { %v4466_v46 = vadd.f32 %v8771_v38, %v4465_v22  ;;  %10225 = vst [vmem:[#allocation25_spill] sm:$0xff] %v9076_v53  ;;  %v6346_v22 = vor.u32 %v7181_v10, %v6343_v13  ;;  %v7157_v13 = vld [vmem:[#allocation2 + $0xb8] sm:$0xf0]  ;;  %v6485_v53 = vld [vmem:[#allocation2 + $0x298] sm:$0xf] }
 0x236   : > { %v9074_v17 = vadd.f32 %v4554_v51, %v4466_v46  ;;  %v7336_v51 = vld [vmem:[#allocation8 + $0x1d0] sm:$0xff]  ;;  %v7335_v46 = vld [vmem:[#allocation8 + $0x1c8] sm:$0xff] }
 0x237   : > { %5037 = vmatpush.bf16.msra.mxu0 %v7336_v51  ;;  %v6379_v51 = vld [vmem:[#allocation2 + $0x1e4] sm:$0xf0] }
 0x23b   : > { %v4468_v30 = vpop.f32.mrf.mxu1  ;;  %v9079_v54 = vpop.f32.mrf.mxu0  ;;  %5038 = vmatpush.bf16.msra.mxu0 %v7335_v46 }
 0x23c   : > { %v4557_v2 = vpop.f32.mrf.mxu2  ;;  %v4469_v50 = vadd.f32 %v8771_v38, %v4468_v30  ;;  %10226 = vst [vmem:[#allocation26_spill] sm:$0xff] %v9079_v54 }
 0x23e   : > { %4759 = vmatmul.bf16.gmra.mxu0 %v6698_v36  ;;  %4793 = vmatmul.bf16.gmra.mxu1 %v6306_v24  ;;  %v9081_v60 = vadd.f32 %v4557_v2, %v4469_v50  ;;  %v6171_v24 = vld [vmem:[#allocation2 + $0x3c] sm:$0xf0] }
 0x23f   : > { %4882 = vmatmul.bf16.gmra.mxu2 %v6310_v42  ;;  %5039 = vmatpush.bf16.msra.mxu0 %v7334_v0  ;;  %v6174_v30 = vor.u32 %v7137_v61, %v6171_v24  ;;  %v6207_v0 = vld [vmem:[#allocation2 + $0x84] sm:$0xf0]  ;;  %v7146_v61 = vld [vmem:[#allocation2 + $0x64] sm:$0xf] }
 0x240   : > { %4595 = vmatmul.bf16.vlgmr.msrb.gmra.mxu3 %v6154_v63  ;;  %v6342_v63 = vor.u32 %v7185_v62, %v6341_v56  ;;  %v7194_v62 = vld [vmem:[#allocation2 + $0x1e0] sm:$0xf0]  ;;  %v6377_v56 = vld [vmem:[#allocation2 + $0x1c0] sm:$0xf] }
 0x243   : > { %v4470_v35 = vpop.f32.mrf.mxu1  ;;  %v9089_v2 = vpop.f32.mrf.mxu0 }
 0x244   : > { %v4559_v39 = vpop.f32.mrf.mxu2  ;;  %v4471_v42 = vadd.f32 %v9086_v4, %v4470_v35  ;;  %10227 = vst [vmem:[#allocation27_spill] sm:$0xff] %v9089_v2  ;;  %v7190_v35 = vld [vmem:[#allocation2 + $0x1c4] sm:$0xf] }
 0x245   : > { %v6382_v29 = vor.u32 %v7190_v35, %v6379_v51  ;;  %v6415_v51 = vld [vmem:[#allocation2 + $0x22c] sm:$0xf0] }
 0x246   : > { %v9091_v18 = vadd.f32 %v4559_v39, %v4471_v42 }
 0x24b   : > { %v4473_v36 = vpop.f32.mrf.mxu1  ;;  %v9094_v10 = vpop.f32.mrf.mxu0 }
 0x24c   : > { %v4474_v58 = vadd.f32 %v9086_v4, %v4473_v36  ;;  %10228 = vst [vmem:[#allocation28_spill] sm:$0xff] %v9094_v10  ;;  %v7155_v10 = vld [vmem:[#allocation2 + $0xac] sm:$0xf] }
 0x24e   : > { %v4562_v38 = vpop.f32.mrf.mxu2  ;;  %4798 = vmatmul.bf16.gmra.mxu1 %v6342_v63  ;;  %5040 = vmatmul.bf16.vlgmr.msra.gmra.mxu0 %v6174_v30  ;;  %v6378_v63 = vor.u32 %v7194_v62, %v6377_v56  ;;  %v7199_v62 = vld [vmem:[#allocation2 + $0x20c] sm:$0xf] }
 0x24f   : > { %4887 = vmatmul.bf16.gmra.mxu2 %v6346_v22  ;;  %v9096_v22 = vadd.f32 %v4562_v38, %v4474_v58  ;;  %v6210_v38 = vor.u32 %v7146_v61, %v6207_v0  ;;  %v6243_v61 = vld [vmem:[#allocation2 + $0xcc] sm:$0xf0] }
 0x250   : > { %4600 = vmatmul.bf16.gmra.mxu3 %v6190_v49  ;;  %v6225_v49 = vld [vmem:[#allocation2 + $0x98] sm:$0xf] }
 0x251   : > { %v6226_v39 = vor.u32 %v7157_v13, %v6225_v49  ;;  %v7166_v13 = vld [vmem:[#allocation2 + $0x100] sm:$0xf0] }
 0x253   : > { %v4475_v25 = vpop.f32.mrf.mxu1  ;;  %v9101_v30 = vpop.f32.mrf.mxu0 }
 0x254   : > { %v4476_v46 = vadd.f32 %v9086_v4, %v4475_v25  ;;  %10229 = vst [vmem:[#allocation29_spill] sm:$0xff] %v9101_v30  ;;  %v6418_v25 = vor.u32 %v7199_v62, %v6415_v51 }
 0x256   : > { %v4564_v50 = vpop.f32.mrf.mxu2 }
 0x257   : > { %v9099_v24 = vadd.f32 %v4564_v50, %v4476_v46  ;;  %v6413_v50 = vld [vmem:[#allocation2 + $0x208] sm:$0xf] }
 0x25b   : > { %v4478_v42 = vpop.f32.mrf.mxu1  ;;  %v9106_v30 = vpop.f32.mrf.mxu0 }
 0x25c   : > { %v4479_v58 = vadd.f32 %v9086_v4, %v4478_v42  ;;  %10230 = vst [vmem:[#allocation30_spill] sm:$0xff] %v9106_v30 }
 0x25e   : > { %4803 = vmatmul.bf16.gmra.mxu1 %v6378_v63  ;;  %5045 = vmatmul.bf16.gmra.mxu0 %v6210_v38 }
 0x25f   : > { %4892 = vmatmul.bf16.gmra.mxu2 %v6382_v29  ;;  %v7203_v29 = vld [vmem:[#allocation2 + $0x228] sm:$0xf0] }
 0x260   : > { %4605 = vmatmul.bf16.gmra.mxu3 %v6226_v39  ;;  %v4567_v36 = vpop.f32.mrf.mxu2  ;;  %v6261_v39 = vld [vmem:[#allocation2 + $0xe0] sm:$0xf]  ;;  %v6414_v46 = vor.u32 %v7203_v29, %v6413_v50  ;;  %v7175_v29 = vld [vmem:[#allocation2 + $0x148] sm:$0xf0] }
 0x261   : > { %v9104_v49 = vadd.f32 %v4567_v36, %v4479_v58  ;;  %v6262_v63 = vor.u32 %v7166_v13, %v6261_v39  ;;  %v6246_v36 = vor.u32 %v7155_v10, %v6243_v61  ;;  %v6451_v13 = vld [vmem:[#allocation2 + $0x274] sm:$0xf0]  ;;  %v7208_v39 = vld [vmem:[#allocation2 + $0x254] sm:$0xf] }
 0x263   : > { %v4480_v35 = vpop.f32.mrf.mxu1  ;;  %v9112_v62 = vpop.f32.mrf.mxu0 }
 0x264   : > { %v4481_v42 = vadd.f32 %v9086_v4, %v4480_v35  ;;  %10232 = vst [vmem:[#allocation32_spill] sm:$0xff] %v9112_v62  ;;  %v6454_v35 = vor.u32 %v7208_v39, %v6451_v13  ;;  %v6279_v62 = vld [vmem:[#allocation2 + $0x114] sm:$0xf0]  ;;  %v6487_v13 = vld [vmem:[#allocation2 + $0x2bc] sm:$0xf0] }
 0x265   : > { %v7184_v39 = vld [vmem:[#allocation2 + $0x190] sm:$0xf0] }
 0x268   : > { %v4569_v56 = vpop.f32.mrf.mxu2 }
 0x269   : > { %v9109_v38 = vadd.f32 %v4569_v56, %v4481_v42  ;;  %v6449_v56 = vld [vmem:[#allocation2 + $0x250] sm:$0xf] }
 0x26b   : > { %v4483_v0 = vpop.f32.mrf.mxu1  ;;  %10231 = vst [vmem:[#allocation31_spill] sm:$0xff] %v9109_v38  ;;  %v9119_v2 = vpop.f32.mrf.mxu0 }
 0x26c   : > { %v4484_v51 = vadd.f32 %v9086_v4, %v4483_v0  ;;  %10234 = vst [vmem:[#allocation34_spill] sm:$0xff] %v9119_v2 }
 0x26e   : > { %4808 = vmatmul.bf16.gmra.mxu1 %v6414_v46  ;;  %5050 = vmatmul.bf16.gmra.mxu0 %v6246_v36  ;;  %v6297_v46 = vld [vmem:[#allocation2 + $0x128] sm:$0xf] }
 0x26f   : > { %4897 = vmatmul.bf16.gmra.mxu2 %v6418_v25  ;;  %v6298_v30 = vor.u32 %v7175_v29, %v6297_v46  ;;  %v6333_v46 = vld [vmem:[#allocation2 + $0x170] sm:$0xf] }
 0x270   : > { %4610 = vmatmul.bf16.gmra.mxu3 %v6262_v63  ;;  %v7212_v63 = vld [vmem:[#allocation2 + $0x270] sm:$0xf0] }
 0x271   : > { %v6450_v42 = vor.u32 %v7212_v63, %v6449_v56  ;;  %v6334_v56 = vor.u32 %v7184_v39, %v6333_v46 }
 0x272   : > { %v4572_v58 = vpop.f32.mrf.mxu2 }
 0x273   : > { %v4485_v25 = vpop.f32.mrf.mxu1  ;;  %v9114_v50 = vadd.f32 %v4572_v58, %v4484_v51  ;;  %v7164_v58 = vld [vmem:[#allocation2 + $0xf4] sm:$0xf] }
 0x274   : > { %v4486_v10 = vadd.f32 %v9086_v4, %v4485_v25  ;;  %v6282_v51 = vor.u32 %v7164_v58, %v6279_v62  ;;  %v7221_v25 = vld [vmem:[#allocation2 + $0x2b8] sm:$0xf0]  ;;  %v6315_v58 = vld [vmem:[#allocation2 + $0x15c] sm:$0xf0] }
 0x275   : > { %10233 = vst [vmem:[#allocation33_spill] sm:$0xff] %v9114_v50  ;;  %v6486_v2 = vor.u32 %v7221_v25, %v6485_v53  ;;  %v7230_v53 = vld [vmem:[#allocation2 + $0x300] sm:$0xf0]  ;;  %v7349_v25 = vld [vmem:[#allocation8 + $0x238] sm:$0xff] }
 0x276   : > { %5121 = vmatpush.bf16.msra.mxu1 %v7349_v25 }
 0x27a   : > { %v4574_v0 = vpop.f32.mrf.mxu2 }
 0x27b   : > { %v9117_v36 = vpop.f32.mrf.mxu1  ;;  %v9121_v54 = vadd.f32 %v4574_v0, %v4486_v10  ;;  %v7333_v10 = vld [vmem:[#allocation8 + $0x1b8] sm:$0xff] }
 0x27c   : > { %4943 = vmatpush.bf16.msra.mxu3 %v7333_v10  ;;  %v6522_v10 = vor.u32 %v7230_v53, %v6521_v48  ;;  %v6559_v48 = vld [vmem:[#allocation2 + $0x34c] sm:$0xf0]  ;;  %v7202_v53 = vld [vmem:[#allocation2 + $0x220] sm:$0xf0] }
 0x27d   : > { %10235 = vst [vmem:[#allocation35_spill] sm:$0xff] %v9121_v54  ;;  %v7182_v54 = vld [vmem:[#allocation2 + $0x184] sm:$0xf] }
 0x27e   : > { %4813 = vmatmul.bf16.gmra.mxu1 %v6450_v42  ;;  %5055 = vmatmul.bf16.gmra.mxu0 %v6282_v51  ;;  %v9125_v42 = vpop.f32.mrf.mxu0  ;;  %v7173_v51 = vld [vmem:[#allocation2 + $0x13c] sm:$0xf] }
 0x27f   : > { %4902 = vmatmul.bf16.gmra.mxu2 %v6454_v35  ;;  %10236 = vst [vmem:[#allocation36_spill] sm:$0xff] %v9125_v42  ;;  %v6318_v41 = vor.u32 %v7173_v51, %v6315_v58 }
 0x280   : > { %4615 = vmatmul.bf16.gmra.mxu3 %v6298_v30  ;;  %v7217_v30 = vld [vmem:[#allocation2 + $0x29c] sm:$0xf] }
 0x281   : > { %v6490_v35 = vor.u32 %v7217_v30, %v6487_v13  ;;  %v6523_v13 = vld [vmem:[#allocation2 + $0x304] sm:$0xf0]  ;;  %v7193_v30 = vld [vmem:[#allocation2 + $0x1d8] sm:$0xf0] }
 0x283   : > { %v4488_v61 = vpop.f32.mrf.mxu3  ;;  %v9123_v63 = vpop.f32.mrf.mxu1 }
 0x284   : > { %v4489_v58 = vadd.f32 %v9086_v4, %v4488_v61 }
 0x286   : > { %v9129_v59 = vpop.f32.mrf.mxu0 }
 0x287   : > { %10237 = vst [vmem:[#allocation37_spill] sm:$0xff] %v9129_v59 }
 0x28b   : > { %v4490_v29 = vpop.f32.mrf.mxu3  ;;  %v9127_v0 = vpop.f32.mrf.mxu1 }
 0x28e   : > { %4818 = vmatmul.bf16.gmra.mxu1 %v6486_v2  ;;  %5060 = vmatmul.bf16.gmra.mxu0 %v6318_v41  ;;  %v9134_v41 = vpop.f32.mrf.mxu0 }
 0x28f   : > { %4907 = vmatmul.bf16.gmra.mxu2 %v6490_v35  ;;  %v7226_v35 = vld [vmem:[#allocation2 + $0x2e4] sm:$0xf]  ;;  %10238 = vst [vmem:[#allocation38_spill] sm:$0xff] %v9134_v41 }
 0x290   : > { %4620 = vmatmul.bf16.gmra.mxu3 %v6334_v56  ;;  %v6526_v2 = vor.u32 %v7226_v35, %v6523_v13  ;;  %v6369_v56 = vld [vmem:[#allocation2 + $0x1b8] sm:$0xf]  ;;  %v6354_v13 = vor.u32 %v7182_v54, %v6351_v14  ;;  %v9140_v35 = vpop.f32.mrf.mxu2  ;;  %v6557_v14 = vld [vmem:[#allocation2 + $0x328] sm:$0xf] }
 0x291   : > { %v6370_v42 = vor.u32 %v7193_v30, %v6369_v56  ;;  %v4491_v30 = vadd.f32 %v9086_v4, %v4490_v29  ;;  %v7235_v56 = vld [vmem:[#allocation2 + $0x32c] sm:$0xf] }
 0x293   : > { %v4493_v62 = vpop.f32.mrf.mxu3  ;;  %v9131_v46 = vpop.f32.mrf.mxu1 }
 0x296   : > { %v9145_v61 = vpop.f32.mrf.mxu0 }
 0x297   : > { %10240 = vst [vmem:[#allocation40_spill] sm:$0xff] %v9145_v61  ;;  %v7244_v61 = vld [vmem:[#allocation2 + $0x374] sm:$0xf] }
 0x298   : > { %v9149_v29 = vpop.f32.mrf.mxu2 }
 0x29b   : > { %v4495_v39 = vpop.f32.mrf.mxu3  ;;  %v9136_v59 = vpop.f32.mrf.mxu1 }
 0x29e   : > { %4823 = vmatmul.bf16.gmra.mxu1 %v6522_v10  ;;  %5065 = vmatmul.bf16.gmra.mxu0 %v6354_v13  ;;  %v7239_v10 = vld [vmem:[#allocation2 + $0x348] sm:$0xf0]  ;;  %v4494_v13 = vadd.f32 %v9086_v4, %v4493_v62 }
 0x29f   : > { %4912 = vmatmul.bf16.gmra.mxu2 %v6526_v2  ;;  %v6558_v54 = vor.u32 %v7239_v10, %v6557_v14  ;;  %v6595_v10 = vld [vmem:[#allocation2 + $0x394] sm:$0xf0] }
 0x2a0   : > { %4625 = vmatmul.bf16.gmra.mxu3 %v6370_v42  ;;  %v9161_v62 = vpop.f32.mrf.mxu2 }
 0x2a3   : > { %v4577_v51 = vpop.f32.mrf.mxu3  ;;  %v9143_v25 = vpop.f32.mrf.mxu1 }
 0x2a4   : > { %v9138_v26 = vadd.f32 %v4577_v51, %v4489_v58  ;;  %v6562_v58 = vor.u32 %v7235_v56, %v6559_v48  ;;  %v6405_v51 = vld [vmem:[#allocation2 + $0x200] sm:$0xf]  ;;  %v7191_v48 = vld [vmem:[#allocation2 + $0x1cc] sm:$0xf]  ;;  %v9156_v56 = vpop.f32.mrf.mxu0 }
 0x2a5   : > { %v6406_v41 = vor.u32 %v7202_v53, %v6405_v51  ;;  %10242 = vst [vmem:[#allocation42_spill] sm:$0xff] %v9156_v56  ;;  %v7211_v51 = vld [vmem:[#allocation2 + $0x268] sm:$0xf0]  ;;  %v4419_v56 = vadd.f32 %v9086_v4, %v8697_v34  ;;  %v4421_v34 = vadd.f32 %v9086_v4, %v8727_v9 }
 0x2a6   : > { %10239 = vst [vmem:[#allocation39_spill] sm:$0xff] %v9138_v26  ;;  %v7332_v26 = vld [vmem:[#allocation8 + $0x1b0] sm:$0xff] }
 0x2a7   : > { %4944 = vmatpush.bf16.msra.mxu3 %v7332_v26  ;;  %v6441_v26 = vld [vmem:[#allocation2 + $0x248] sm:$0xf] }
 0x2ab   : > { %v4579_v42 = vpop.f32.mrf.mxu3  ;;  %v9152_v38 = vpop.f32.mrf.mxu1 }
 0x2ac   : > { %v9147_v2 = vadd.f32 %v4579_v42, %v4491_v30  ;;  %v6387_v30 = vld [vmem:[#allocation2 + $0x1ec] sm:$0xf0] }
 0x2ad   : > { %v6390_v53 = vor.u32 %v7191_v48, %v6387_v30  ;;  %v6442_v30 = vor.u32 %v7211_v51, %v6441_v26  ;;  %v6593_v48 = vld [vmem:[#allocation2 + $0x370] sm:$0xf]  ;;  %v9174_v51 = vpop.f32.mrf.mxu2 }
 0x2ae   : > { %4828 = vmatmul.bf16.gmra.mxu1 %v6558_v54 }
 0x2af   : > { %4917 = vmatmul.bf16.gmra.mxu2 %v6562_v58  ;;  %5070 = vmatmul.bf16.gmra.mxu0 %v6390_v53  ;;  %v7348_v53 = vld [vmem:[#allocation8 + $0x230] sm:$0xff] }
 0x2b0   : > { %4630 = vmatmul.bf16.gmra.mxu3 %v6406_v41  ;;  %v4496_v41 = vadd.f32 %v9086_v4, %v4495_v39  ;;  %5122 = vmatpush.bf16.msra.mxu1 %v7348_v53 }
 0x2b3   : > { %v4582_v50 = vpop.f32.mrf.mxu3  ;;  %v9159_v14 = vpop.f32.mrf.mxu1 }
 0x2b4   : > { %v9154_v42 = vadd.f32 %v4582_v50, %v4494_v13  ;;  %10243 = vst [vmem:[#allocation43_spill] sm:$0xff] %v9159_v14  ;;  %v7248_v50 = vld [vmem:[#allocation2 + $0x390] sm:$0xf0]  ;;  %v6598_v13 = vor.u32 %v7244_v61, %v6595_v10  ;;  %v6423_v61 = vld [vmem:[#allocation2 + $0x234] sm:$0xf0] }
 0x2b5   : > { %v6594_v39 = vor.u32 %v7248_v50, %v6593_v48  ;;  %v6631_v48 = vld [vmem:[#allocation2 + $0x3dc] sm:$0xf0] }
 0x2b6   : > { %10241 = vst [vmem:[#allocation41_spill] sm:$0xff] %v9154_v42  ;;  %v9167_v42 = vpop.f32.mrf.mxu0 }
 0x2b7   : > { %10245 = vst [vmem:[#allocation45_spill] sm:$0xff] %v9167_v42  ;;  %v7257_v42 = vld [vmem:[#allocation2 + $0x3d8] sm:$0xf0] }
 0x2bb   : > { %v4584_v58 = vpop.f32.mrf.mxu3  ;;  %v9170_v14 = vpop.f32.mrf.mxu1 }
 0x2bc   : > { %v9163_v54 = vadd.f32 %v4584_v58, %v4496_v41  ;;  %v4508_v41 = vadd.f32 %v8640_v15, %v4419_v56  ;;  %v4510_v15 = vadd.f32 %v8667_v27, %v4421_v34  ;;  %v7253_v56 = vld [vmem:[#allocation2 + $0x3bc] sm:$0xf]  ;;  %v4873_v27 = vpop.f32.mrf.mxu2 }
 0x2be   : > { %10244 = vst [vmem:[#allocation44_spill] sm:$0xff] %v9163_v54  ;;  %4833 = vmatmul.bf16.gmra.mxu1 %v6594_v39  ;;  %v7200_v54 = vld [vmem:[#allocation2 + $0x214] sm:$0xf] }
 0x2bf   : > { %4922 = vmatmul.bf16.gmra.mxu2 %v6598_v13  ;;  %v6426_v13 = vor.u32 %v7200_v54, %v6423_v61  ;;  %v6477_v54 = vld [vmem:[#allocation2 + $0x290] sm:$0xf] }
 0x2c0   : > { %4635 = vmatmul.bf16.gmra.mxu3 %v6442_v30  ;;  %v9178_v30 = vpop.f32.mrf.mxu0 }
 0x2c1   : > { %5075 = vmatmul.bf16.gmra.mxu0 %v6426_v13  ;;  %10246 = vst [vmem:[#allocation46_spill] sm:$0xff] %v9178_v30 }
 0x2c3   : > { %v4596_v58 = vpop.f32.mrf.mxu3  ;;  %v9184_v9 = vpop.f32.mrf.mxu1 }
 0x2c4   : > { %v4597_v10 = vadd.f32 %v4596_v58, %v4508_v41  ;;  %v7220_v41 = vld [vmem:[#allocation2 + $0x2b0] sm:$0xf0] }
 0x2c6   : > { %v4686_v50 = vadd.f32 %v8946_v52, %v4597_v10  ;;  %v6634_v52 = vor.u32 %v7253_v56, %v6631_v48  ;;  %v6629_v10 = vld [vmem:[#allocation2 + $0x3b8] sm:$0xf]  ;;  %v6459_v56 = vld [vmem:[#allocation2 + $0x27c] sm:$0xf0] }
 0x2c8   : > { %v4775_v26 = vadd.f32 %v9117_v36, %v4686_v50  ;;  %v6478_v36 = vor.u32 %v7220_v41, %v6477_v54  ;;  %v6630_v50 = vor.u32 %v7257_v42, %v6629_v10  ;;  %v9193_v48 = vpop.f32.mrf.mxu0  ;;  %v4426_v42 = vadd.f32 %v9086_v4, %v8789_v32  ;;  %v7262_v54 = vld [vmem:[#allocation2 + $0x404] sm:$0xf]  ;;  %v7229_v10 = vld [vmem:[#allocation2 + $0x2f8] sm:$0xf0] }
 0x2c9   : > { %10247 = vst [vmem:[#allocation47_spill] sm:$0xff] %v9193_v48  ;;  %v7150_v48 = vld [vmem:[#allocation2 + $0x80] sm:$0xf0] }
 0x2ca   : > { %v9182_v53 = vadd.f32 %v9140_v35, %v4775_v26  ;;  %v7331_v35 = vld [vmem:[#allocation8 + $0x1a8] sm:$0xff] }
 0x2cb   : > { %v4598_v39 = vpop.f32.mrf.mxu3  ;;  %4945 = vmatpush.bf16.msra.mxu3 %v7331_v35 }
 0x2cc   : > { %v4599_v58 = vadd.f32 %v4598_v39, %v4510_v15  ;;  %v9191_v15 = vpop.f32.mrf.mxu1  ;;  %v7209_v39 = vld [vmem:[#allocation2 + $0x25c] sm:$0xf] }
 0x2cd   : > { %v6462_v41 = vor.u32 %v7209_v39, %v6459_v56 }
 0x2ce   : > { %v4688_v61 = vadd.f32 %v8974_v40, %v4599_v58  ;;  %4838 = vmatmul.bf16.gmra.mxu1 %v6630_v50  ;;  %v9200_v58 = vpop.f32.mrf.mxu2 }
 0x2cf   : > { %4927 = vmatmul.bf16.gmra.mxu2 %v6634_v52  ;;  %v4515_v52 = vadd.f32 %v8725_v19, %v4426_v42  ;;  %v7347_v19 = vld [vmem:[#allocation8 + $0x228] sm:$0xff] }
 0x2d0   : > { %4640 = vmatmul.bf16.gmra.mxu3 %v6478_v36  ;;  %v4777_v34 = vadd.f32 %v9123_v63, %v4688_v61  ;;  %v6667_v61 = vld [vmem:[#allocation2 + $0x424] sm:$0xf0]  ;;  %v9208_v56 = vpop.f32.mrf.mxu0  ;;  %5123 = vmatpush.bf16.msra.mxu1 %v7347_v19  ;;  %v7275_v19 = vld [vmem:[#allocation2 + $0x468] sm:$0xf0] }
 0x2d1   : > { %5080 = vmatmul.bf16.gmra.mxu0 %v6462_v41  ;;  %v6670_v35 = vor.u32 %v7262_v54, %v6667_v61  ;;  %10248 = vst [vmem:[#allocation48_spill] sm:$0xff] %v9208_v56  ;;  %v4431_v61 = vadd.f32 %v9086_v4, %v8862_v1  ;;  %v6701_v4 = vld [vmem:[#allocation2 + $0x448] sm:$0xf] }
 0x2d2   : > { %v9189_v13 = vadd.f32 %v9149_v29, %v4777_v34  ;;  %v6665_v34 = vld [vmem:[#allocation2 + $0x400] sm:$0xf] }
 0x2d3   : > { %v4601_v26 = vpop.f32.mrf.mxu3 }
 0x2d4   : > { %v4602_v40 = vadd.f32 %v4601_v26, %v8803_v37  ;;  %v9206_v50 = vpop.f32.mrf.mxu1  ;;  %v6513_v26 = vld [vmem:[#allocation2 + $0x2d8] sm:$0xf] }
 0x2d6   : > { %v4691_v63 = vadd.f32 %v9005_v5, %v4602_v40  ;;  %v7266_v5 = vld [vmem:[#allocation2 + $0x420] sm:$0xf0]  ;;  %v6514_v40 = vor.u32 %v7229_v10, %v6513_v26  ;;  %v4878_v54 = vpop.f32.mrf.mxu2 }
 0x2d7   : > { %v6666_v39 = vor.u32 %v7266_v5, %v6665_v34  ;;  %v7346_v10 = vld [vmem:[#allocation8 + $0x220] sm:$0xff]  ;;  %v4520_v34 = vadd.f32 %v8800_v8, %v4431_v61  ;;  %v7271_v5 = vld [vmem:[#allocation2 + $0x44c] sm:$0xf] }
 0x2d8   : > { %v4780_v29 = vadd.f32 %v9127_v0, %v4691_v63  ;;  %5124 = vmatpush.bf16.msra.mxu1 %v7346_v10  ;;  %v7343_v61 = vld [vmem:[#allocation8 + $0x208] sm:$0xff] }
 0x2da   : > { %v9204_v36 = vadd.f32 %v9161_v62, %v4780_v29  ;;  %v6495_v29 = vld [vmem:[#allocation2 + $0x2c4] sm:$0xf0] }
 0x2db   : > { %v4603_v37 = vpop.f32.mrf.mxu3 }
 0x2dc   : > { %v4604_v32 = vadd.f32 %v4603_v37, %v4515_v52  ;;  %v9215_v41 = vpop.f32.mrf.mxu1 }
 0x2de   : > { %v4693_v0 = vadd.f32 %v9025_v43, %v4604_v32  ;;  %4843 = vmatmul.bf16.gmra.mxu1 %v6666_v39  ;;  %v7218_v43 = vld [vmem:[#allocation2 + $0x2a4] sm:$0xf]  ;;  %v9230_v8 = vpop.f32.mrf.mxu2 }
 0x2df   : > { %4932 = vmatmul.bf16.gmra.mxu2 %v6670_v35  ;;  %v6498_v32 = vor.u32 %v7218_v43, %v6495_v29  ;;  %v6703_v35 = vld [vmem:[#allocation2 + $0x46c] sm:$0xf0] }
 0x2e0   : > { %4645 = vmatmul.bf16.gmra.mxu3 %v6514_v40  ;;  %v4782_v62 = vadd.f32 %v9131_v46, %v4693_v0  ;;  %v9221_v46 = vpop.f32.mrf.mxu0  ;;  %v7238_v40 = vld [vmem:[#allocation2 + $0x340] sm:$0xf0]  ;;  %v6706_v39 = vor.u32 %v7271_v5, %v6703_v35  ;;  %v7344_v29 = vld [vmem:[#allocation8 + $0x210] sm:$0xff]  ;;  %v7227_v5 = vld [vmem:[#allocation2 + $0x2ec] sm:$0xf] }
 0x2e1   : > { %10249 = vst [vmem:[#allocation49_spill] sm:$0xff] %v9221_v46  ;;  %5085 = vmatmul.bf16.gmra.mxu0 %v6498_v32 }
 0x2e2   : > { %v9213_v42 = vadd.f32 %v9174_v51, %v4782_v62  ;;  %v6549_v62 = vld [vmem:[#allocation2 + $0x320] sm:$0xf] }
 0x2e3   : > { %v4606_v63 = vpop.f32.mrf.mxu3 }
 0x2e4   : > { %v4607_v52 = vadd.f32 %v4606_v63, %v8865_v31  ;;  %v7345_v31 = vld [vmem:[#allocation8 + $0x218] sm:$0xff]  ;;  %v9227_v1 = vpop.f32.mrf.mxu1 }
 0x2e5   : > { %5125 = vmatpush.bf16.msra.mxu1 %v7345_v31 }
 0x2e6   : > { %v4696_v37 = vadd.f32 %v9035_v57, %v4607_v52  ;;  %v6702_v52 = vor.u32 %v7275_v19, %v6701_v4 }
 0x2e8   : > { %v4785_v51 = vadd.f32 %v9136_v59, %v4696_v37  ;;  %v6550_v59 = vor.u32 %v7238_v40, %v6549_v62  ;;  %v9233_v43 = vpop.f32.mrf.mxu0  ;;  %v7330_v37 = vld [vmem:[#allocation8 + $0x1a0] sm:$0xff]  ;;  %v6585_v62 = vld [vmem:[#allocation2 + $0x368] sm:$0xf] }
 0x2e9   : > { %5126 = vmatpush.bf16.msra.mxu1 %v7344_v29  ;;  %10250 = vst [vmem:[#allocation50_spill] sm:$0xff] %v9233_v43  ;;  %4946 = vmatpush.bf16.msra.mxu3 %v7330_v37 }
 0x2ea   : > { %v9225_v26 = vadd.f32 %v4873_v27, %v4785_v51  ;;  %v6531_v51 = vld [vmem:[#allocation2 + $0x30c] sm:$0xf0] }
 0x2eb   : > { %v4608_v0 = vpop.f32.mrf.mxu3  ;;  %v6534_v31 = vor.u32 %v7227_v5, %v6531_v51  ;;  %v7151_v5 = vld [vmem:[#allocation2 + $0x88] sm:$0xf0] }
 0x2ec   : > { %v4609_v57 = vadd.f32 %v4608_v0, %v4520_v34 }
 0x2ed   : > { %5127 = vmatpush.bf16.msra.mxu1 %v7343_v61 }
 0x2ee   : > { %v4698_v63 = vadd.f32 %v9041_v3, %v4609_v57  ;;  %4848 = vmatmul.bf16.gmra.mxu1 %v6702_v52  ;;  %v9238_v3 = vpop.f32.mrf.mxu1  ;;  %v7247_v57 = vld [vmem:[#allocation2 + $0x388] sm:$0xf0] }
 0x2ef   : > { %4937 = vmatmul.bf16.gmra.mxu2 %v6706_v39  ;;  %v7142_v39 = vld [vmem:[#allocation2 + $0x40] sm:$0xf0] }
 0x2f0   : > { %4650 = vmatmul.bf16.gmra.mxu3 %v6550_v59  ;;  %v4787_v27 = vadd.f32 %v9143_v25, %v4698_v63  ;;  %v7342_v25 = vld [vmem:[#allocation8 + $0x200] sm:$0xff]  ;;  %v9247_v19 = vpop.f32.mrf.mxu0 }
 0x2f1   : > { %5128 = vmatpush.bf16.msra.mxu1 %v7342_v25  ;;  %5090 = vmatmul.bf16.gmra.mxu0 %v6534_v31  ;;  %10251 = vst [vmem:[#allocation51_spill] sm:$0xff] %v9247_v19  ;;  %v6177_v63 = vld [vmem:[#allocation2 + $0x20] sm:$0xf]  ;;  %v6213_v31 = vld [vmem:[#allocation2 + $0x68] sm:$0xf] }
 0x2f2   : > { %v9236_v10 = vadd.f32 %v9200_v58, %v4787_v27  ;;  %v6178_v59 = vor.u32 %v7142_v39, %v6177_v63  ;;  %v7236_v27 = vld [vmem:[#allocation2 + $0x334] sm:$0xf]  ;;  %v6285_v19 = vld [vmem:[#allocation2 + $0xf8] sm:$0xf] }
 0x2f3   : > { %v4611_v32 = vpop.f32.mrf.mxu3  ;;  %v7328_v63 = vld [vmem:[#allocation8 + $0x190] sm:$0xff] }
 0x2f4   : > { %v4612_v34 = vadd.f32 %v4611_v32, %v8916_v16  ;;  %v7256_v32 = vld [vmem:[#allocation2 + $0x3d0] sm:$0xf0] }
 0x2f6   : > { %v4701_v35 = vadd.f32 %v9046_v28, %v4612_v34  ;;  %v9245_v4 = vpop.f32.mrf.mxu1  ;;  %v6586_v28 = vor.u32 %v7247_v57, %v6585_v62  ;;  %v6603_v62 = vld [vmem:[#allocation2 + $0x39c] sm:$0xf0] }
 0x2f8   : > { %v4790_v0 = vadd.f32 %v9152_v38, %v4701_v35  ;;  %v9257_v61 = vpop.f32.mrf.mxu0  ;;  %v6621_v35 = vld [vmem:[#allocation2 + $0x3b0] sm:$0xf] }
 0x2f9   : > { %v6622_v25 = vor.u32 %v7256_v32, %v6621_v35  ;;  %v7160_v35 = vld [vmem:[#allocation2 + $0xd0] sm:$0xf0] }
 0x2fa   : > { %v9243_v40 = vadd.f32 %v4878_v54, %v4790_v0  ;;  %v6567_v54 = vld [vmem:[#allocation2 + $0x354] sm:$0xf0]  ;;  %v6214_v0 = vor.u32 %v7151_v5, %v6213_v31  ;;  %v7326_v31 = vld [vmem:[#allocation8 + $0x180] sm:$0xff] }
 0x2fb   : > { %v4613_v58 = vpop.f32.mrf.mxu3  ;;  %v6570_v37 = vor.u32 %v7236_v27, %v6567_v54  ;;  %v7327_v54 = vld [vmem:[#allocation8 + $0x188] sm:$0xff] }
 0x2fc   : > { %v9250_v16 = vadd.f32 %v4613_v58, %v8951_v55 }
 0x2fe   : > { %5129 = vmatmul.bf16.vlgmr.msra.gmra.mxu1 %v6178_v59  ;;  %v9252_v38 = vpop.f32.mrf.mxu1 }
 0x2ff   : > { %10252 = vst [vmem:[#allocation52_spill] sm:$0xff] %v9252_v38 }
 0x300   : > { %4655 = vmatmul.bf16.gmra.mxu3 %v6586_v28  ;;  %v9264_v58 = vpop.f32.mrf.mxu0 }
 0x301   : > { %5095 = vmatmul.bf16.gmra.mxu0 %v6570_v37  ;;  %v6657_v37 = vld [vmem:[#allocation2 + $0x3f8] sm:$0xf] }
 0x303   : > { %v4616_v29 = vpop.f32.mrf.mxu3 }
 0x304   : > { %v9255_v52 = vadd.f32 %v4616_v29, %v8967_v11  ;;  %v7329_v11 = vld [vmem:[#allocation8 + $0x198] sm:$0xff] }
 0x305   : > { %4947 = vmatpush.bf16.msra.mxu3 %v7329_v11 }
 0x306   : > { %v9259_v51 = vpop.f32.mrf.mxu1 }
 0x307   : > { %10253 = vst [vmem:[#allocation53_spill] sm:$0xff] %v9259_v51  ;;  %v7222_v51 = vld [vmem:[#allocation2 + $0x2c0] sm:$0xf0] }
 0x308   : > { %v9271_v29 = vpop.f32.mrf.mxu0 }
 0x309   : > { %4948 = vmatpush.bf16.msra.mxu3 %v7328_v63 }
 0x30b   : > { %v4618_v55 = vpop.f32.mrf.mxu3 }
 0x30c   : > { %v9262_v34 = vadd.f32 %v4618_v55, %v8993_v23  ;;  %v7245_v23 = vld [vmem:[#allocation2 + $0x37c] sm:$0xf] }
 0x30d   : > { %v6606_v59 = vor.u32 %v7245_v23, %v6603_v62  ;;  %v7265_v55 = vld [vmem:[#allocation2 + $0x418] sm:$0xf0]  ;;  %4949 = vmatpush.bf16.msra.mxu3 %v7327_v54  ;;  %v7254_v62 = vld [vmem:[#allocation2 + $0x3c4] sm:$0xf]  ;;  %v6639_v23 = vld [vmem:[#allocation2 + $0x3e4] sm:$0xf0] }
 0x30e   : > { %5134 = vmatmul.bf16.gmra.mxu1 %v6214_v0  ;;  %v9266_v39 = vpop.f32.mrf.mxu1  ;;  %v7357_v54 = vld [vmem:[#allocation9 + $0x38] sm:$0xff] }
 0x30f   : > { %10254 = vst [vmem:[#allocation54_spill] sm:$0xff] %v9266_v39  ;;  %5358 = vmatpush.bf16.msra.mxu2 %v7357_v54  ;;  %v10288_v39 = vld [vmem:[#allocation44_spill] sm:$0xff] }
 0x310   : > { %4660 = vmatmul.bf16.gmra.mxu3 %v6622_v25  ;;  %v6249_v25 = vld [vmem:[#allocation2 + $0xb0] sm:$0xf]  ;;  %v9280_v63 = vpop.f32.mrf.mxu0 }
 0x311   : > { %5100 = vmatmul.bf16.gmra.mxu0 %v6606_v59  ;;  %v6250_v0 = vor.u32 %v7160_v35, %v6249_v25  ;;  %4950 = vmatpush.bf16.msra.mxu3 %v7326_v31  ;;  %v7169_v25 = vld [vmem:[#allocation2 + $0x118] sm:$0xf0] }
 0x312   : > { %v6286_v43 = vor.u32 %v7169_v25, %v6285_v19  ;;  %v6321_v25 = vld [vmem:[#allocation2 + $0x140] sm:$0xf] }
 0x313   : > { %v4621_v57 = vpop.f32.mrf.mxu3 }
 0x314   : > { %v9269_v28 = vadd.f32 %v4621_v57, %v9021_v44  ;;  %v6658_v44 = vor.u32 %v7265_v55, %v6657_v37  ;;  %v6693_v37 = vld [vmem:[#allocation2 + $0x440] sm:$0xf]  ;;  %v7274_v55 = vld [vmem:[#allocation2 + $0x460] sm:$0xf0] }
 0x316   : > { %v9273_v32 = vpop.f32.mrf.mxu1 }
 0x317   : > { %10255 = vst [vmem:[#allocation55_spill] sm:$0xff] %v9273_v32 }
 0x318   : > { %v9290_v31 = vpop.f32.mrf.mxu0 }
 0x31b   : > { %v4623_v27 = vpop.f32.mrf.mxu3 }
 0x31c   : > { %v9276_v5 = vadd.f32 %v4623_v27, %v9033_v21  ;;  %v6642_v21 = vor.u32 %v7254_v62, %v6639_v23  ;;  %v7263_v62 = vld [vmem:[#allocation2 + $0x40c] sm:$0xf]  ;;  %v6675_v23 = vld [vmem:[#allocation2 + $0x42c] sm:$0xf0] }
 0x31d   : > { %v6678_v46 = vor.u32 %v7263_v62, %v6675_v23 }
 0x31e   : > { %5139 = vmatmul.bf16.gmra.mxu1 %v6250_v0  ;;  %v9278_v57 = vpop.f32.mrf.mxu1  ;;  %v6694_v0 = vor.u32 %v7274_v55, %v6693_v37  ;;  %v6169_v37 = vld [vmem:[#allocation2 + $0x18] sm:$0xf] }
 0x31f   : > { %10256 = vst [vmem:[#allocation56_spill] sm:$0xff] %v9278_v57 }
 0x320   : > { %4665 = vmatmul.bf16.gmra.mxu3 %v6658_v44 }
 0x321   : > { %5105 = vmatmul.bf16.gmra.mxu0 %v6642_v21 }
 0x323   : > { %v4626_v11 = vpop.f32.mrf.mxu3 }
 0x324   : > { %v9283_v59 = vadd.f32 %v4626_v11, %v9039_v47 }
 0x326   : > { %v9285_v35 = vpop.f32.mrf.mxu1 }
 0x327   : > { %10257 = vst [vmem:[#allocation57_spill] sm:$0xff] %v9285_v35  ;;  %v7195_v35 = vld [vmem:[#allocation2 + $0x1e8] sm:$0xf0] }
 0x32b   : > { %v4628_v27 = vpop.f32.mrf.mxu3 }
 0x32c   : > { %v9288_v44 = vadd.f32 %v4628_v27, %v9044_v7  ;;  %v9297_v7 = vpop.f32.mrf.mxu0  ;;  %v7141_v27 = vld [vmem:[#allocation2 + $0x38] sm:$0xf0] }
 0x32d   : > { %v6170_v55 = vor.u32 %v7141_v27, %v6169_v37  ;;  %v6205_v27 = vld [vmem:[#allocation2 + $0x60] sm:$0xf]  ;;  %v6357_v37 = vld [vmem:[#allocation2 + $0x188] sm:$0xf] }
 0x32e   : > { %5144 = vmatmul.bf16.gmra.mxu1 %v6286_v43  ;;  %v9292_v11 = vpop.f32.mrf.mxu1  ;;  %v7178_v43 = vld [vmem:[#allocation2 + $0x160] sm:$0xf0] }
 0x32f   : > { %10258 = vst [vmem:[#allocation58_spill] sm:$0xff] %v9292_v11 }
 0x330   : > { %4670 = vmatmul.bf16.gmra.mxu3 %v6694_v0  ;;  %v6322_v0 = vor.u32 %v7178_v43, %v6321_v25  ;;  %v6206_v43 = vor.u32 %v7150_v48, %v6205_v27  ;;  %v6393_v27 = vld [vmem:[#allocation2 + $0x1d0] sm:$0xf] }
 0x331   : > { %5110 = vmatmul.bf16.gmra.mxu0 %v6678_v46  ;;  %v7356_v46 = vld [vmem:[#allocation9 + $0x30] sm:$0xff] }
 0x332   : > { %5359 = vmatpush.bf16.msra.mxu2 %v7356_v46  ;;  %v7196_v46 = vld [vmem:[#allocation2 + $0x1f0] sm:$0xf0] }
 0x333   : > { %v4631_v47 = vpop.f32.mrf.mxu3 }
 0x334   : > { %v9295_v21 = vadd.f32 %v4631_v47, %v9049_v33 }
 0x336   : > { %v9299_v56 = vpop.f32.mrf.mxu1 }
 0x337   : > { %10259 = vst [vmem:[#allocation59_spill] sm:$0xff] %v9299_v56  ;;  %v6313_v56 = vld [vmem:[#allocation2 + $0x138] sm:$0xf] }
 0x33b   : > { %v4633_v54 = vpop.f32.mrf.mxu3 }
 0x33c   : > { %v9302_v19 = vadd.f32 %v4633_v54, %v9054_v12  ;;  %v7187_v54 = vld [vmem:[#allocation2 + $0x1a8] sm:$0xf0] }
 0x33e   : > { %5149 = vmatmul.bf16.gmra.mxu1 %v6322_v0  ;;  %v9304_v47 = vpop.f32.mrf.mxu1 }
 0x33f   : > { %10260 = vst [vmem:[#allocation60_spill] sm:$0xff] %v9304_v47  ;;  %v7159_v47 = vld [vmem:[#allocation2 + $0xc8] sm:$0xf0] }
 0x340   : > { %4951 = vmatmul.bf16.vlgmr.msra.gmra.mxu3 %v6170_v55  ;;  %v6358_v55 = vor.u32 %v7187_v54, %v6357_v37  ;;  %v6394_v54 = vor.u32 %v7196_v46, %v6393_v27  ;;  %v6277_v46 = vld [vmem:[#allocation2 + $0xf0] sm:$0xf]  ;;  %v6429_v27 = vld [vmem:[#allocation2 + $0x218] sm:$0xf] }
 0x343   : > { %v4636_v33 = vpop.f32.mrf.mxu3 }
 0x344   : > { %v9307_v62 = vadd.f32 %v4636_v33, %v9059_v45 }
 0x346   : > { %v9309_v30 = vpop.f32.mrf.mxu1 }
 0x347   : > { %10261 = vst [vmem:[#allocation61_spill] sm:$0xff] %v9309_v30 }
 0x34b   : > { %v4638_v23 = vpop.f32.mrf.mxu3 }
 0x34c   : > { %v9312_v12 = vadd.f32 %v4638_v23, %v9064_v20  ;;  %v6241_v23 = vld [vmem:[#allocation2 + $0xa8] sm:$0xf] }
 0x34d   : > { %v6242_v48 = vor.u32 %v7159_v47, %v6241_v23  ;;  %v7205_v47 = vld [vmem:[#allocation2 + $0x238] sm:$0xf0]  ;;  %v9334_v23 = vpop.f32.mrf.mxu2 }
 0x34e   : > { %10262 = vst [vmem:[#allocation62_spill] sm:$0xff] %v9312_v12  ;;  %5154 = vmatmul.bf16.gmra.mxu1 %v6358_v55  ;;  %v9314_v0 = vpop.f32.mrf.mxu1  ;;  %v7355_v55 = vld [vmem:[#allocation9 + $0x28] sm:$0xff] }
 0x34f   : > { %10263 = vst [vmem:[#allocation63_spill] sm:$0xff] %v9314_v0  ;;  %5360 = vmatpush.bf16.msra.mxu2 %v7355_v55  ;;  %v7214_v0 = vld [vmem:[#allocation2 + $0x280] sm:$0xf0] }
 0x350   : > { %4956 = vmatmul.bf16.gmra.mxu3 %v6206_v43 }
 0x353   : > { %v4641_v25 = vpop.f32.mrf.mxu3 }
 0x354   : > { %v9317_v45 = vadd.f32 %v4641_v25, %v9069_v6 }
 0x356   : > { %10264 = vst [vmem:[#allocation64_spill] sm:$0xff] %v9317_v45  ;;  %v9319_v30 = vpop.f32.mrf.mxu1 }
 0x357   : > { %10265 = vst [vmem:[#allocation65_spill] sm:$0xff] %v9319_v30  ;;  %v7168_v30 = vld [vmem:[#allocation2 + $0x110] sm:$0xf0] }
 0x35b   : > { %v4643_v33 = vpop.f32.mrf.mxu3 }
 0x35c   : > { %v9322_v20 = vadd.f32 %v4643_v33, %v9074_v17 }
 0x35e   : > { %10266 = vst [vmem:[#allocation66_spill] sm:$0xff] %v9322_v20  ;;  %5159 = vmatmul.bf16.gmra.mxu1 %v6394_v54  ;;  %v9324_v37 = vpop.f32.mrf.mxu1  ;;  %v6430_v54 = vor.u32 %v7205_v47, %v6429_v27  ;;  %v7352_v20 = vld [vmem:[#allocation9 + $0x10] sm:$0xff] }
 0x35f   : > { %10267 = vst [vmem:[#allocation67_spill] sm:$0xff] %v9324_v37  ;;  %v9341_v37 = vpop.f32.mrf.mxu2 }
 0x360   : > { %4961 = vmatmul.bf16.gmra.mxu3 %v6242_v48  ;;  %v6278_v48 = vor.u32 %v7168_v30, %v6277_v46  ;;  %v6465_v46 = vld [vmem:[#allocation2 + $0x260] sm:$0xf] }
 0x361   : > { %v6466_v47 = vor.u32 %v7214_v0, %v6465_v46  ;;  %v6349_v46 = vld [vmem:[#allocation2 + $0x180] sm:$0xf] }
 0x363   : > { %v4646_v43 = vpop.f32.mrf.mxu3 }
 0x364   : > { %v9327_v6 = vadd.f32 %v4646_v43, %v9081_v60 }
 0x366   : > { %10268 = vst [vmem:[#allocation68_spill] sm:$0xff] %v9327_v6  ;;  %v9332_v33 = vpop.f32.mrf.mxu1  ;;  %v6421_v6 = vld [vmem:[#allocation2 + $0x210] sm:$0xf] }
 0x367   : > { %10270 = vst [vmem:[#allocation70_spill] sm:$0xff] %v9332_v33  ;;  %v9348_v27 = vpop.f32.mrf.mxu2 }
 0x36b   : > { %v4648_v25 = vpop.f32.mrf.mxu3 }
 0x36c   : > { %v9330_v17 = vadd.f32 %v4648_v25, %v9091_v18  ;;  %v7177_v25 = vld [vmem:[#allocation2 + $0x158] sm:$0xf0] }
 0x36d   : > { %v6314_v30 = vor.u32 %v7177_v25, %v6313_v56  ;;  %v7186_v56 = vld [vmem:[#allocation2 + $0x1a0] sm:$0xf0]  ;;  %v10276_v25 = vld [vmem:[#allocation31_spill] sm:$0xff] }
 0x36e   : > { %10269 = vst [vmem:[#allocation69_spill] sm:$0xff] %v9330_v17  ;;  %5164 = vmatmul.bf16.gmra.mxu1 %v6430_v54  ;;  %v9339_v55 = vpop.f32.mrf.mxu1  ;;  %v10280_v17 = vld [vmem:[#allocation35_spill] sm:$0xff] }
 0x36f   : > { %10272 = vst [vmem:[#allocation72_spill] sm:$0xff] %v9339_v55 }
 0x370   : > { %4966 = vmatmul.bf16.gmra.mxu3 %v6278_v48 }
 0x373   : > { %v4651_v60 = vpop.f32.mrf.mxu3 }
 0x374   : > { %v9337_v43 = vadd.f32 %v4651_v60, %v9096_v22  ;;  %v7354_v60 = vld [vmem:[#allocation9 + $0x20] sm:$0xff] }
 0x375   : > { %5361 = vmatpush.bf16.msra.mxu2 %v7354_v60 }
 0x376   : > { %10271 = vst [vmem:[#allocation71_spill] sm:$0xff] %v9337_v43  ;;  %v9346_v48 = vpop.f32.mrf.mxu1 }
 0x377   : > { %10274 = vst [vmem:[#allocation74_spill] sm:$0xff] %v9346_v48  ;;  %v6350_v48 = vor.u32 %v7186_v56, %v6349_v46 }
 0x37b   : > { %v4653_v18 = vpop.f32.mrf.mxu3 }
 0x37c   : > { %v9344_v33 = vadd.f32 %v4653_v18, %v9099_v24  ;;  %v9355_v24 = vpop.f32.mrf.mxu2 }
 0x37e   : > { %10273 = vst [vmem:[#allocation73_spill] sm:$0xff] %v9344_v33  ;;  %5169 = vmatmul.bf16.gmra.mxu1 %v6466_v47  ;;  %v9353_v55 = vpop.f32.mrf.mxu1  ;;  %v6501_v33 = vld [vmem:[#allocation2 + $0x2a8] sm:$0xf] }
 0x380   : > { %4971 = vmatmul.bf16.gmra.mxu3 %v6314_v30  ;;  %v7223_v30 = vld [vmem:[#allocation2 + $0x2c8] sm:$0xf0] }
 0x381   : > { %v6502_v47 = vor.u32 %v7223_v30, %v6501_v33  ;;  %v6537_v33 = vld [vmem:[#allocation2 + $0x2f0] sm:$0xf] }
 0x383   : > { %v4656_v22 = vpop.f32.mrf.mxu3 }
 0x384   : > { %v9351_v54 = vadd.f32 %v4656_v22, %v9104_v49  ;;  %v10278_v22 = vld [vmem:[#allocation33_spill] sm:$0xff]  ;;  %v9365_v11 = vpop.f32.mrf.mxu2 }
 0x386   : > { %10275 = vst [vmem:[#allocation75_spill] sm:$0xff] %v9351_v54  ;;  %v9363_v60 = vpop.f32.mrf.mxu1 }
 0x38b   : > { %v4658_v18 = vpop.f32.mrf.mxu3 }
 0x38c   : > { %v9358_v0 = vadd.f32 %v4658_v18, %v10276_v25  ;;  %v7232_v25 = vld [vmem:[#allocation2 + $0x310] sm:$0xf0] }
 0x38d   : > { %v6538_v30 = vor.u32 %v7232_v25, %v6537_v33  ;;  %v6573_v25 = vld [vmem:[#allocation2 + $0x338] sm:$0xf] }
 0x38e   : > { %10277 = vst [vmem:[#allocation31_spill] sm:$0xff] %v9358_v0  ;;  %5174 = vmatmul.bf16.gmra.mxu1 %v6502_v47  ;;  %v6385_v0 = vld [vmem:[#allocation2 + $0x1c8] sm:$0xf]  ;;  %v9370_v46 = vpop.f32.mrf.mxu1 }
 0x38f   : > { %v6386_v56 = vor.u32 %v7195_v35, %v6385_v0  ;;  %v7241_v0 = vld [vmem:[#allocation2 + $0x358] sm:$0xf0] }
 0x390   : > { %4976 = vmatmul.bf16.gmra.mxu3 %v6350_v48  ;;  %v9372_v48 = vpop.f32.mrf.mxu2 }
 0x393   : > { %v4661_v49 = vpop.f32.mrf.mxu3 }
 0x394   : > { %v9361_v54 = vadd.f32 %v4661_v49, %v10278_v22  ;;  %v10282_v49 = vld [vmem:[#allocation39_spill] sm:$0xff] }
 0x396   : > { %10279 = vst [vmem:[#allocation33_spill] sm:$0xff] %v9361_v54  ;;  %v9377_v54 = vpop.f32.mrf.mxu1 }
 0x398   : > { %v9379_v57 = vpop.f32.mrf.mxu2 }
 0x39b   : > { %v4663_v43 = vpop.f32.mrf.mxu3 }
 0x39c   : > { %v9368_v18 = vadd.f32 %v4663_v43, %v10280_v17  ;;  %v7204_v43 = vld [vmem:[#allocation2 + $0x230] sm:$0xf0] }
 0x39d   : > { %v6422_v32 = vor.u32 %v7204_v43, %v6421_v6  ;;  %v6609_v43 = vld [vmem:[#allocation2 + $0x380] sm:$0xf] }
 0x39e   : > { %10281 = vst [vmem:[#allocation35_spill] sm:$0xff] %v9368_v18  ;;  %5179 = vmatmul.bf16.gmra.mxu1 %v6538_v30  ;;  %v7353_v18 = vld [vmem:[#allocation9 + $0x18] sm:$0xff]  ;;  %v9384_v33 = vpop.f32.mrf.mxu1 }
 0x39f   : > { %5362 = vmatpush.bf16.msra.mxu2 %v7353_v18 }
 0x3a0   : > { %4981 = vmatmul.bf16.gmra.mxu3 %v6386_v56  ;;  %v6574_v56 = vor.u32 %v7241_v0, %v6573_v25  ;;  %v9386_v30 = vpop.f32.mrf.mxu2  ;;  %v7250_v0 = vld [vmem:[#allocation2 + $0x3a0] sm:$0xf0] }
 0x3a1   : > { %10285 = vst [vmem:[#allocation77_spill] sm:$0xff] %v9386_v30 }
 0x3a3   : > { %v4666_v47 = vpop.f32.mrf.mxu3  ;;  %5363 = vmatpush.bf16.msra.mxu2 %v7352_v20 }
 0x3a4   : > { %v9375_v22 = vadd.f32 %v4666_v47, %v10282_v49  ;;  %v10286_v49 = vld [vmem:[#allocation41_spill] sm:$0xff] }
 0x3a6   : > { %10283 = vst [vmem:[#allocation39_spill] sm:$0xff] %v9375_v22  ;;  %v9394_v18 = vpop.f32.mrf.mxu1 }
 0x3a8   : > { %v9396_v25 = vpop.f32.mrf.mxu2 }
 0x3a9   : > { %10290 = vst [vmem:[#allocation78_spill] sm:$0xff] %v9396_v25 }
 0x3ab   : > { %v4668_v17 = vpop.f32.mrf.mxu3 }
 0x3ac   : > { %v9382_v35 = vadd.f32 %v4668_v17, %v9147_v2  ;;  %v7351_v2 = vld [vmem:[#allocation9 + $0x8] sm:$0xff] }
 0x3ad   : > { %5364 = vmatpush.bf16.msra.mxu2 %v7351_v2 }
 0x3ae   : > { %10284 = vst [vmem:[#allocation76_spill] sm:$0xff] %v9382_v35  ;;  %5184 = vmatmul.bf16.gmra.mxu1 %v6574_v56  ;;  %v7213_v35 = vld [vmem:[#allocation2 + $0x278] sm:$0xf0]  ;;  %v6457_v56 = vld [vmem:[#allocation2 + $0x258] sm:$0xf] }
 0x3af   : > { %v6458_v45 = vor.u32 %v7213_v35, %v6457_v56 }
 0x3b0   : > { %4986 = vmatmul.bf16.gmra.mxu3 %v6422_v32  ;;  %v7350_v32 = vld [vmem:[#allocation9] sm:$0xff] }
 0x3b1   : > { %5365 = vmatpush.bf16.msra.mxu2 %v7350_v32  ;;  %v7259_v32 = vld [vmem:[#allocation2 + $0x3e8] sm:$0xf0] }
 0x3b3   : > { %v4671_v47 = vpop.f32.mrf.mxu3 }
 0x3b4   : > { %v9389_v22 = vadd.f32 %v4671_v47, %v10286_v49  ;;  %v6610_v47 = vor.u32 %v7250_v0, %v6609_v43  ;;  %v9398_v49 = vpop.f32.mrf.mxu0  ;;  %v6493_v43 = vld [vmem:[#allocation2 + $0x2a0] sm:$0xf] }
 0x3b6   : > { %10287 = vst [vmem:[#allocation41_spill] sm:$0xff] %v9389_v22 }
 0x3bb   : > { %v4673_v17 = vpop.f32.mrf.mxu3 }
 0x3bc   : > { %v9392_v6 = vadd.f32 %v4673_v17, %v10288_v39  ;;  %v9401_v17 = vpop.f32.mrf.mxu1  ;;  %v9408_v0 = vpop.f32.mrf.mxu0 }
 0x3be   : > { %10289 = vst [vmem:[#allocation44_spill] sm:$0xff] %v9392_v6  ;;  %5189 = vmatmul.bf16.gmra.mxu1 %v6610_v47  ;;  %v9403_v6 = vpop.f32.mrf.mxu2 }
 0x3bf   : > { %10291 = vst [vmem:[#allocation79_spill] sm:$0xff] %v9403_v6 }
 0x3c0   : > { %4991 = vmatmul.bf16.gmra.mxu3 %v6458_v45  ;;  %v6645_v45 = vld [vmem:[#allocation2 + $0x3c8] sm:$0xf] }
 0x3c1   : > { %v6646_v47 = vor.u32 %v7259_v32, %v6645_v45  ;;  %v7231_v45 = vld [vmem:[#allocation2 + $0x308] sm:$0xf0] }
 0x3c3   : > { %v4952_v20 = vpop.f32.mrf.mxu3 }
 0x3c4   : > { %v4953_v39 = vadd.f32 %v4952_v20, %v9182_v53  ;;  %v6494_v53 = vor.u32 %v7222_v51, %v6493_v43  ;;  %v9412_v12 = vpop.f32.mrf.mxu1  ;;  %v9417_v30 = vpop.f32.mrf.mxu0 }
 0x3c6   : > { %v5042_v2 = vadd.f32 %v9257_v61, %v4953_v39  ;;  %v9414_v61 = vpop.f32.mrf.mxu2 }
 0x3c8   : > { %v5131_v25 = vadd.f32 %v9353_v55, %v5042_v2 }
 0x3ca   : > { %v5210_v20 = vmul.f32 0.1, %v5131_v25 }
 0x3cb   : > { %v4954_v22 = vpop.f32.mrf.mxu3 }
 0x3cc   : > { %v4955_v35 = vadd.f32 %v4954_v22, %v9189_v13  ;;  %v5242_v22 = vmax.f32 %v5131_v25, %v5210_v20  ;;  %v6681_v25 = vld [vmem:[#allocation2 + $0x410] sm:$0xf] }
 0x3ce   : > { %v5044_v56 = vadd.f32 %v9264_v58, %v4955_v35  ;;  %5194 = vmatmul.bf16.gmra.mxu1 %v6646_v47  ;;  %v9420_v58 = vpop.f32.mrf.mxu1 }
 0x3d0   : > { %v5133_v6 = vadd.f32 %v9363_v60, %v5044_v56  ;;  %4996 = vmatmul.bf16.gmra.mxu3 %v6494_v53  ;;  %v9422_v60 = vpop.f32.mrf.mxu2  ;;  %v6529_v56 = vld [vmem:[#allocation2 + $0x2e8] sm:$0xf] }
 0x3d1   : > { %v6530_v53 = vor.u32 %v7231_v45, %v6529_v56 }
 0x3d2   : > { %v5211_v55 = vmul.f32 0.1, %v5133_v6 }
 0x3d3   : > { %v4957_v13 = vpop.f32.mrf.mxu3 }
 0x3d4   : > { %v5243_v39 = vmax.f32 %v5133_v6, %v5211_v55  ;;  %v4958_v2 = vadd.f32 %v4957_v13, %v9204_v36  ;;  %v7268_v6 = vld [vmem:[#allocation2 + $0x430] sm:$0xf0] }
 0x3d5   : > { %v6682_v47 = vor.u32 %v7268_v6, %v6681_v25  ;;  %v6565_v6 = vld [vmem:[#allocation2 + $0x330] sm:$0xf] }
 0x3d6   : > { %v5274_v38 = vpack.c.bf16 %v5243_v39, %v5242_v22  ;;  %v5047_v51 = vadd.f32 %v9271_v29, %v4958_v2  ;;  %v9428_v29 = vpop.f32.mrf.mxu0  ;;  %v9430_v22 = vpop.f32.mrf.mxu1 }
 0x3d8   : > { %5366 = vmatmul.bf16.vlgmr.msra.gmra.mxu2 %v5274_v38  ;;  %v5136_v32 = vadd.f32 %v9370_v46, %v5047_v51  ;;  %v9433_v2 = vpop.f32.mrf.mxu2 }
 0x3da   : > { %v5212_v20 = vmul.f32 0.1, %v5136_v32 }
 0x3db   : > { %v4959_v35 = vpop.f32.mrf.mxu3 }
 0x3dc   : > { %v4960_v43 = vadd.f32 %v4959_v35, %v9213_v42  ;;  %v5244_v46 = vmax.f32 %v5136_v32, %v5212_v20 }
 0x3de   : > { %v5049_v36 = vadd.f32 %v9280_v63, %v4960_v43  ;;  %5199 = vmatmul.bf16.gmra.mxu1 %v6682_v47  ;;  %v9436_v45 = vpop.f32.mrf.mxu0  ;;  %v9440_v56 = vpop.f32.mrf.mxu1  ;;  %v10292_v47 = vld [vmem:[#allocation20_spill] sm:$0xff] }
 0x3df   : > { %v4703_v20 = vadd.f32 %v10292_v47, %v9250_v16  ;;  %v10294_v16 = vld [vmem:[#allocation21_spill] sm:$0xff] }
 0x3e0   : > { %v5138_v38 = vadd.f32 %v9377_v54, %v5049_v36  ;;  %5001 = vmatmul.bf16.gmra.mxu3 %v6530_v53  ;;  %v7240_v54 = vld [vmem:[#allocation2 + $0x350] sm:$0xf0]  ;;  %v9443_v36 = vpop.f32.mrf.mxu2 }
 0x3e1   : > { %v6566_v32 = vor.u32 %v7240_v54, %v6565_v6 }
 0x3e2   : > { %v5213_v55 = vmul.f32 0.1, %v5138_v38 }
 0x3e3   : > { %v4962_v13 = vpop.f32.mrf.mxu3 }
 0x3e4   : > { %v4963_v42 = vadd.f32 %v4962_v13, %v9225_v26  ;;  %v5245_v39 = vmax.f32 %v5138_v38, %v5213_v55 }
 0x3e6   : > { %v5275_v63 = vpack.c.bf16 %v5245_v39, %v5244_v46  ;;  %v5052_v51 = vadd.f32 %v9290_v31, %v4963_v42  ;;  %v9449_v42 = vpop.f32.mrf.mxu0 }
 0x3e8   : > { %5371 = vmatmul.bf16.gmra.mxu2 %v5275_v63  ;;  %v5141_v43 = vadd.f32 %v9384_v33, %v5052_v51  ;;  %v9452_v63 = vpop.f32.mrf.mxu1 }
 0x3ea   : > { %v5214_v53 = vmul.f32 0.1, %v5141_v43 }
 0x3eb   : > { %v4964_v35 = vpop.f32.mrf.mxu3 }
 0x3ec   : > { %v4965_v25 = vadd.f32 %v4964_v35, %v9236_v10  ;;  %v5246_v10 = vmax.f32 %v5141_v43, %v5214_v53  ;;  %v4706_v35 = vadd.f32 %v10294_v16, %v9255_v52  ;;  %v7249_v43 = vld [vmem:[#allocation2 + $0x398] sm:$0xf0]  ;;  %v10295_v52 = vld [vmem:[#allocation22_spill] sm:$0xff] }
 0x3ee   : > { %v5054_v26 = vadd.f32 %v9297_v7, %v4965_v25  ;;  %v10293_v7 = vld [vmem:[#allocation43_spill] sm:$0xff] }
 0x3ef   : > { %v4792_v39 = vadd.f32 %v10293_v7, %v4703_v20 }
 0x3f0   : > { %v5143_v31 = vadd.f32 %v9394_v18, %v5054_v26  ;;  %5006 = vmatmul.bf16.gmra.mxu3 %v6566_v32  ;;  %v9455_v18 = vpop.f32.mrf.mxu2  ;;  %v6601_v26 = vld [vmem:[#allocation2 + $0x378] sm:$0xf] }
 0x3f1   : > { %v4881_v54 = vadd.f32 %v9230_v8, %v4792_v39  ;;  %v6602_v53 = vor.u32 %v7249_v43, %v6601_v26  ;;  %v4708_v8 = vadd.f32 %v10295_v52, %v9262_v34  ;;  %v10296_v39 = vld [vmem:[#allocation23_spill] sm:$0xff] }
 0x3f2   : > { %v5215_v38 = vmul.f32 0.1, %v5143_v31  ;;  %v4711_v34 = vadd.f32 %v10296_v39, %v9269_v28 }
 0x3f3   : > { %v4967_v55 = vpop.f32.mrf.mxu3  ;;  %v4797_v7 = vadd.f32 %v9184_v9, %v4708_v8  ;;  %v7258_v9 = vld [vmem:[#allocation2 + $0x3e0] sm:$0xf0] }
 0x3f4   : > { %v4968_v33 = vadd.f32 %v4967_v55, %v9243_v40  ;;  %v5247_v13 = vmax.f32 %v5143_v31, %v5215_v38  ;;  %v4795_v31 = vadd.f32 %v9170_v14, %v4706_v35  ;;  %v9468_v38 = vpop.f32.mrf.mxu1  ;;  %v6637_v35 = vld [vmem:[#allocation2 + $0x3c0] sm:$0xf]  ;;  %v4800_v26 = vadd.f32 %v9191_v15, %v4711_v34  ;;  %v6717_v34 = vld [vmem:[#allocation2 + $0x458] sm:$0xf] }
 0x3f5   : > { %v4886_v16 = vadd.f32 %v9341_v37, %v4797_v7  ;;  %v10297_v37 = vld [vmem:[#allocation24_spill] sm:$0xff] }
 0x3f6   : > { %v5276_v46 = vpack.c.bf16 %v5247_v13, %v5246_v10  ;;  %v5057_v51 = vadd.f32 %v9398_v49, %v4968_v33  ;;  %v9463_v49 = vpop.f32.mrf.mxu0 }
 0x3f8   : > { %5376 = vmatmul.bf16.gmra.mxu2 %v5276_v46  ;;  %v5146_v25 = vadd.f32 %v9401_v17, %v5057_v51  ;;  %v4884_v17 = vadd.f32 %v9334_v23, %v4795_v31  ;;  %v9471_v33 = vpop.f32.mrf.mxu2 }
 0x3fa   : > { %v5216_v47 = vmul.f32 0.1, %v5146_v25 }
 0x3fb   : > { %v4969_v40 = vpop.f32.mrf.mxu3 }
 0x3fc   : > { %v4970_v6 = vadd.f32 %v4969_v40, %v4881_v54  ;;  %v5248_v13 = vmax.f32 %v5146_v25, %v5216_v47  ;;  %v9480_v54 = vpop.f32.mrf.mxu1  ;;  %v4889_v47 = vadd.f32 %v9348_v27, %v4800_v26  ;;  %v10299_v26 = vld [vmem:[#allocation26_spill] sm:$0xff] }
 0x3fe   : > { %v5059_v32 = vadd.f32 %v9408_v0, %v4970_v6  ;;  %v9477_v51 = vpop.f32.mrf.mxu0  ;;  %v6638_v6 = vor.u32 %v7258_v9, %v6637_v35 }
 0x400   : > { %v5148_v20 = vadd.f32 %v9412_v12, %v5059_v32  ;;  %5011 = vmatmul.bf16.gmra.mxu3 %v6602_v53  ;;  %v9483_v25 = vpop.f32.mrf.mxu2  ;;  %v4713_v53 = vadd.f32 %v10297_v37, %v9276_v5  ;;  %v10298_v5 = vld [vmem:[#allocation25_spill] sm:$0xff] }
 0x402   : > { %v5217_v55 = vmul.f32 0.1, %v5148_v20  ;;  %v4802_v15 = vadd.f32 %v9206_v50, %v4713_v53 }
 0x403   : > { %v4972_v0 = vpop.f32.mrf.mxu3 }
 0x404   : > { %v4973_v10 = vadd.f32 %v4972_v0, %v4884_v17  ;;  %v5249_v14 = vmax.f32 %v5148_v20, %v5217_v55  ;;  %v4891_v27 = vadd.f32 %v9355_v24, %v4802_v15 }
 0x406   : > { %v5277_v46 = vpack.c.bf16 %v5249_v14, %v5248_v13  ;;  %v5062_v12 = vadd.f32 %v9417_v30, %v4973_v10  ;;  %v9491_v20 = vpop.f32.mrf.mxu0  ;;  %v4716_v10 = vadd.f32 %v10298_v5, %v9283_v59  ;;  %v6673_v13 = vld [vmem:[#allocation2 + $0x408] sm:$0xf]  ;;  %v7272_v14 = vld [vmem:[#allocation2 + $0x454] sm:$0xf] }
 0x408   : > { %5381 = vmatmul.bf16.gmra.mxu2 %v5277_v46  ;;  %v5151_v40 = vadd.f32 %v9420_v58, %v5062_v12  ;;  %v9496_v0 = vpop.f32.mrf.mxu2  ;;  %v6711_v46 = vld [vmem:[#allocation2 + $0x474] sm:$0xf0]  ;;  %v7267_v12 = vld [vmem:[#allocation2 + $0x428] sm:$0xf0]  ;;  %v4805_v59 = vadd.f32 %v9215_v41, %v4716_v10 }
 0x409   : > { %v6714_v39 = vor.u32 %v7272_v14, %v6711_v46 }
 0x40a   : > { %v5218_v28 = vmul.f32 0.1, %v5151_v40 }
 0x40b   : > { %v4974_v23 = vpop.f32.mrf.mxu3  ;;  %5115 = vmatmul.bf16.gmra.mxu0 %v6714_v39 }
 0x40c   : > { %v4975_v43 = vadd.f32 %v4974_v23, %v4886_v16  ;;  %v5250_v8 = vmax.f32 %v5151_v40, %v5218_v28  ;;  %v7277_v16 = vld [vmem:[#allocation2 + $0x478] sm:$0xf0] }
 0x40d   : > { %v6718_v35 = vor.u32 %v7277_v16, %v6717_v34 }
 0x40e   : > { %v5064_v30 = vadd.f32 %v9428_v29, %v4975_v43  ;;  %v9493_v29 = vpop.f32.mrf.mxu1  ;;  %v6674_v43 = vor.u32 %v7267_v12, %v6673_v13 }
 0x40f   : > { %5204 = vmatmul.bf16.gmra.mxu1 %v6718_v35  ;;  %v10302_v35 = vld [vmem:[#allocation29_spill] sm:$0xff] }
 0x410   : > { %v5153_v32 = vadd.f32 %v9430_v22, %v5064_v30  ;;  %5016 = vmatmul.bf16.gmra.mxu3 %v6638_v6  ;;  %v9506_v6 = vpop.f32.mrf.mxu2 }
 0x412   : > { %v5219_v31 = vmul.f32 0.1, %v5153_v32 }
 0x413   : > { %v4977_v58 = vpop.f32.mrf.mxu3 }
 0x414   : > { %v4978_v52 = vadd.f32 %v4977_v58, %v4889_v47  ;;  %v5251_v55 = vmax.f32 %v5153_v32, %v5219_v31  ;;  %v4894_v32 = vadd.f32 %v9365_v11, %v4805_v59 }
 0x416   : > { %v5278_v17 = vpack.c.bf16 %v5251_v55, %v5250_v8  ;;  %v5067_v22 = vadd.f32 %v9436_v45, %v4978_v52  ;;  %v5078_v45 = vpop.f32.mrf.mxu0  ;;  %v5167_v24 = vpop.f32.mrf.mxu1  ;;  %v7276_v8 = vld [vmem:[#allocation2 + $0x470] sm:$0xf0]  ;;  %v10300_v55 = vld [vmem:[#allocation27_spill] sm:$0xff] }
 0x418   : > { %5386 = vmatmul.bf16.gmra.mxu2 %v5278_v17  ;;  %v5156_v50 = vadd.f32 %v9440_v56, %v5067_v22  ;;  %v4718_v56 = vadd.f32 %v10299_v26, %v9288_v44  ;;  %v4721_v17 = vadd.f32 %v10300_v55, %v9295_v21  ;;  %v9516_v11 = vpop.f32.mrf.mxu2  ;;  %v10301_v21 = vld [vmem:[#allocation28_spill] sm:$0xff] }
 0x419   : > { %v4723_v46 = vadd.f32 %v10301_v21, %v9302_v19  ;;  %v4726_v19 = vadd.f32 %v10302_v35, %v9307_v62  ;;  %v10307_v62 = vld [vmem:[#allocation78_spill] sm:$0xff] }
 0x41a   : > { %v5220_v9 = vmul.f32 0.1, %v5156_v50  ;;  %v4807_v41 = vadd.f32 %v9227_v1, %v4718_v56 }
 0x41b   : > { %v4979_v7 = vpop.f32.mrf.mxu3 }
 0x41c   : > { %v4980_v23 = vadd.f32 %v4979_v7, %v4891_v27  ;;  %v4896_v15 = vadd.f32 %v9372_v48, %v4807_v41 }
 0x41e   : > { %v5069_v40 = vadd.f32 %v9449_v42, %v4980_v23  ;;  %v5252_v42 = vmax.f32 %v5156_v50, %v5220_v9  ;;  %v5081_v58 = vpop.f32.mrf.mxu0  ;;  %v5170_v44 = vpop.f32.mrf.mxu1 }
 0x420   : > { %v5158_v30 = vadd.f32 %v9452_v63, %v5069_v40  ;;  %5021 = vmatmul.bf16.gmra.mxu3 %v6674_v43  ;;  %v6709_v63 = vld [vmem:[#allocation2 + $0x450] sm:$0xf]  ;;  %v9525_v23 = vpop.f32.mrf.mxu2  ;;  %v10303_v40 = vld [vmem:[#allocation77_spill] sm:$0xff] }
 0x421   : > { %v6710_v27 = vor.u32 %v7276_v8, %v6709_v63 }
 0x422   : > { %v5221_v28 = vmul.f32 0.1, %v5158_v30 }
 0x423   : > { %v4982_v37 = vpop.f32.mrf.mxu3 }
 0x424   : > { %v4983_v53 = vadd.f32 %v4982_v37, %v4894_v32  ;;  %v5253_v31 = vmax.f32 %v5158_v30, %v5221_v28  ;;  %v10304_v28 = vld [vmem:[#allocation52_spill] sm:$0xff] }
 0x425   : > { %v4815_v32 = vadd.f32 %v10304_v28, %v4726_v19 }
 0x426   : > { %v5279_v47 = vpack.c.bf16 %v5253_v31, %v5252_v42  ;;  %v5072_v52 = vadd.f32 %v9463_v49, %v4983_v53  ;;  %v4810_v49 = vadd.f32 %v9238_v3, %v4721_v17  ;;  %v5083_v7 = vpop.f32.mrf.mxu0  ;;  %v5172_v34 = vpop.f32.mrf.mxu1  ;;  %v4812_v3 = vadd.f32 %v9245_v4, %v4723_v46  ;;  %v10306_v42 = vld [vmem:[#allocation30_spill] sm:$0xff] }
 0x427   : > { %v4904_v41 = vadd.f32 %v10307_v62, %v4815_v32  ;;  %v10316_v32 = vld [vmem:[#allocation68_spill] sm:$0xff] }
 0x428   : > { %5391 = vmatmul.bf16.gmra.mxu2 %v5279_v47  ;;  %v5161_v5 = vadd.f32 %v9468_v38, %v5072_v52  ;;  %v4899_v12 = vadd.f32 %v9379_v57, %v4810_v49  ;;  %v4901_v43 = vadd.f32 %v10303_v40, %v4812_v3  ;;  %v9534_v37 = vpop.f32.mrf.mxu2  ;;  %v10311_v49 = vld [vmem:[#allocation79_spill] sm:$0xff]  ;;  %v10314_v3 = vld [vmem:[#allocation34_spill] sm:$0xff] }
 0x42a   : > { %v5222_v13 = vmul.f32 0.1, %v5161_v5 }
 0x42b   : > { %v4984_v22 = vpop.f32.mrf.mxu3 }
 0x42c   : > { %v4985_v10 = vadd.f32 %v4984_v22, %v4896_v15  ;;  %v5254_v16 = vmax.f32 %v5161_v5, %v5222_v13  ;;  %v10308_v15 = vld [vmem:[#allocation53_spill] sm:$0xff] }
 0x42e   : > { %v5074_v1 = vadd.f32 %v9477_v51, %v4985_v10  ;;  %v5086_v57 = vpop.f32.mrf.mxu0  ;;  %v5175_v26 = vpop.f32.mrf.mxu1 }
 0x430   : > { %v5163_v14 = vadd.f32 %v9480_v54, %v5074_v1  ;;  %5026 = vmatmul.bf16.gmra.mxu3 %v6710_v27  ;;  %v9540_v10 = vpop.f32.mrf.mxu2  ;;  %v10310_v27 = vld [vmem:[#allocation32_spill] sm:$0xff] }
 0x432   : > { %v5223_v48 = vmul.f32 0.1, %v5163_v14 }
 0x433   : > { %v4987_v39 = vpop.f32.mrf.mxu3 }
 0x434   : > { %v4988_v38 = vadd.f32 %v4987_v39, %v4899_v12  ;;  %v5255_v50 = vmax.f32 %v5163_v14, %v5223_v48  ;;  %v10312_v12 = vld [vmem:[#allocation54_spill] sm:$0xff] }
 0x436   : > { %v5280_v51 = vpack.c.bf16 %v5255_v50, %v5254_v16  ;;  %v5077_v54 = vadd.f32 %v9491_v20, %v4988_v38  ;;  %v10305_v20 = vld [vmem:[#allocation62_spill] sm:$0xff]  ;;  %v5177_v22 = vpop.f32.mrf.mxu1 }
 0x437   : > { %v4728_v31 = vadd.f32 %v10306_v42, %v10305_v20 }
 0x438   : > { %5396 = vmatmul.bf16.gmra.mxu2 %v5280_v51  ;;  %v5166_v9 = vadd.f32 %v9493_v29, %v5077_v54  ;;  %v5088_v29 = vpop.f32.mrf.mxu0  ;;  %v10313_v51 = vld [vmem:[#allocation66_spill] sm:$0xff]  ;;  %v9549_v40 = vpop.f32.mrf.mxu2 }
 0x43a   : > { %v5224_v4 = vmul.f32 0.1, %v5166_v9 }
 0x43b   : > { %v4989_v59 = vpop.f32.mrf.mxu3 }
 0x43c   : > { %v4990_v30 = vadd.f32 %v4989_v59, %v4901_v43  ;;  %v5256_v8 = vmax.f32 %v5166_v9, %v5224_v4 }
 0x43e   : > { %v5079_v56 = vadd.f32 %v5078_v45, %v4990_v30  ;;  %v4817_v45 = vadd.f32 %v10308_v15, %v4728_v31  ;;  %v5180_v54 = vpop.f32.mrf.mxu1 }
 0x440   : > { %v5168_v53 = vadd.f32 %v5167_v24, %v5079_v56  ;;  %v10309_v24 = vld [vmem:[#allocation64_spill] sm:$0xff]  ;;  %v4906_v13 = vadd.f32 %v10311_v49, %v4817_v45  ;;  %v5091_v38 = vpop.f32.mrf.mxu0 }
 0x441   : > { %v4731_v1 = vadd.f32 %v10310_v27, %v10309_v24 }
 0x442   : > { %v5225_v47 = vmul.f32 0.1, %v5168_v53 }
 0x443   : > { %v4992_v52 = vpop.f32.mrf.mxu3  ;;  %v4820_v39 = vadd.f32 %v10312_v12, %v4731_v1 }
 0x444   : > { %v4993_v63 = vadd.f32 %v4992_v52, %v4904_v41  ;;  %v5257_v55 = vmax.f32 %v5168_v53, %v5225_v47  ;;  %v10318_v52 = vld [vmem:[#allocation56_spill] sm:$0xff] }
 0x445   : > { %v4909_v19 = vadd.f32 %v9414_v61, %v4820_v39 }
 0x446   : > { %v5281_v17 = vpack.c.bf16 %v5257_v55, %v5256_v8  ;;  %v5082_v5 = vadd.f32 %v5081_v58, %v4993_v63  ;;  %v4733_v58 = vadd.f32 %v10314_v3, %v10313_v51  ;;  %v5182_v61 = vpop.f32.mrf.mxu1 }
 0x448   : > { %5401 = vmatmul.bf16.gmra.mxu2 %v5281_v17  ;;  %v5171_v21 = vadd.f32 %v5170_v44, %v5082_v5  ;;  %v5093_v53 = vpop.f32.mrf.mxu0  ;;  %v10319_v17 = vld [vmem:[#allocation69_spill] sm:$0xff] }
 0x44a   : > { %v5226_v16 = vmul.f32 0.1, %v5171_v21 }
 0x44b   : > { %v4994_v14 = vpop.f32.mrf.mxu3 }
 0x44c   : > { %v4995_v46 = vadd.f32 %v4994_v14, %v4906_v13  ;;  %v5258_v9 = vmax.f32 %v5171_v21, %v5226_v16 }
 0x44e   : > { %v5084_v48 = vadd.f32 %v5083_v7, %v4995_v46  ;;  %v10315_v7 = vld [vmem:[#allocation55_spill] sm:$0xff] }
 0x44f   : > { %v4822_v56 = vadd.f32 %v10315_v7, %v4733_v58 }
 0x450   : > { %v5173_v50 = vadd.f32 %v5172_v34, %v5084_v48  ;;  %v10317_v34 = vld [vmem:[#allocation36_spill] sm:$0xff]  ;;  %v10323_v48 = vld [vmem:[#allocation38_spill] sm:$0xff] }
 0x451   : > { %v4736_v4 = vadd.f32 %v10317_v34, %v10316_v32  ;;  %v4911_v20 = vadd.f32 %v9422_v60, %v4822_v56  ;;  %v5096_v60 = vpop.f32.mrf.mxu0 }
 0x452   : > { %v5227_v35 = vmul.f32 0.1, %v5173_v50 }
 0x453   : > { %v4997_v43 = vpop.f32.mrf.mxu3  ;;  %v4825_v63 = vadd.f32 %v10318_v52, %v4736_v4 }
 0x454   : > { %v4998_v59 = vadd.f32 %v4997_v43, %v4909_v19  ;;  %v5259_v44 = vmax.f32 %v5173_v50, %v5227_v35  ;;  %v10324_v35 = vld [vmem:[#allocation58_spill] sm:$0xff] }
 0x455   : > { %v4914_v5 = vadd.f32 %v9433_v2, %v4825_v63 }
 0x456   : > { %v5282_v30 = vpack.c.bf16 %v5259_v44, %v5258_v9  ;;  %v5087_v28 = vadd.f32 %v5086_v57, %v4998_v59  ;;  %v10320_v57 = vld [vmem:[#allocation37_spill] sm:$0xff] }
 0x457   : > { %v4738_v15 = vadd.f32 %v10320_v57, %v10319_v17  ;;  %v10325_v44 = vld [vmem:[#allocation73_spill] sm:$0xff] }
 0x458   : > { %5406 = vmatmul.bf16.gmra.mxu2 %v5282_v30  ;;  %v5176_v47 = vadd.f32 %v5175_v26, %v5087_v28  ;;  %v5185_v26 = vpop.f32.mrf.mxu1 }
 0x459   : > { %v5098_v3 = vpop.f32.mrf.mxu0 }
 0x45a   : > { %v5228_v8 = vmul.f32 0.1, %v5176_v47 }
 0x45b   : > { %v4999_v42 = vpop.f32.mrf.mxu3  ;;  %v9555_v31 = vpop.f32.mrf.mxu2 }
 0x45c   : > { %v5000_v62 = vadd.f32 %v4999_v42, %v4911_v20  ;;  %v5260_v49 = vmax.f32 %v5176_v47, %v5228_v8  ;;  %v10327_v20 = vld [vmem:[#allocation59_spill] sm:$0xff] }
 0x45e   : > { %v5089_v41 = vadd.f32 %v5088_v29, %v5000_v62  ;;  %v10321_v29 = vld [vmem:[#allocation57_spill] sm:$0xff]  ;;  %v10328_v62 = vld [vmem:[#allocation75_spill] sm:$0xff] }
 0x45f   : > { %v4827_v21 = vadd.f32 %v10321_v29, %v4738_v15  ;;  %v10330_v15 = vld [vmem:[#allocation60_spill] sm:$0xff] }
 0x460   : > { %v5178_v55 = vadd.f32 %v5177_v22, %v5089_v41  ;;  %v10322_v22 = vld [vmem:[#allocation71_spill] sm:$0xff]  ;;  %v5187_v43 = vpop.f32.mrf.mxu1 }
 0x461   : > { %v4741_v12 = vadd.f32 %v10323_v48, %v10322_v22  ;;  %v4916_v39 = vadd.f32 %v9443_v36, %v4827_v21  ;;  %v5101_v42 = vpop.f32.mrf.mxu0 }
 0x462   : > { %v5229_v45 = vmul.f32 0.1, %v5178_v55 }
 0x463   : > { %v5002_v24 = vpop.f32.mrf.mxu3  ;;  %v9561_v27 = vpop.f32.mrf.mxu2  ;;  %v4830_v19 = vadd.f32 %v10324_v35, %v4741_v12 }
 0x464   : > { %v5003_v1 = vadd.f32 %v5002_v24, %v4914_v5  ;;  %v5261_v13 = vmax.f32 %v5178_v55, %v5229_v45 }
 0x465   : > { %v4919_v56 = vadd.f32 %v9455_v18, %v4830_v19 }
 0x466   : > { %v5283_v14 = vpack.c.bf16 %v5261_v13, %v5260_v49  ;;  %v5092_v46 = vadd.f32 %v5091_v38, %v5003_v1  ;;  %v10326_v38 = vld [vmem:[#allocation40_spill] sm:$0xff]  ;;  %v10331_v1 = vld [vmem:[#allocation31_spill] sm:$0xff]  ;;  %v10332_v49 = vld [vmem:[#allocation45_spill] sm:$0xff] }
 0x467   : > { %v4743_v30 = vadd.f32 %v10326_v38, %v10325_v44 }
 0x468   : > { %5411 = vmatmul.bf16.gmra.mxu2 %v5283_v14  ;;  %v5181_v50 = vadd.f32 %v5180_v54, %v5092_v46  ;;  %v5190_v52 = vpop.f32.mrf.mxu1 }
 0x469   : > { %v5103_v13 = vpop.f32.mrf.mxu0 }
 0x46a   : > { %v5230_v59 = vmul.f32 0.1, %v5181_v50 }
 0x46b   : > { %v5004_v16 = vpop.f32.mrf.mxu3  ;;  %v9567_v2 = vpop.f32.mrf.mxu2 }
 0x46c   : > { %v5005_v51 = vadd.f32 %v5004_v16, %v4916_v39  ;;  %v5262_v34 = vmax.f32 %v5181_v50, %v5230_v59  ;;  %v10333_v39 = vld [vmem:[#allocation61_spill] sm:$0xff] }
 0x46e   : > { %v5094_v58 = vadd.f32 %v5093_v53, %v5005_v51  ;;  %v4832_v53 = vadd.f32 %v10327_v20, %v4743_v30  ;;  %v10334_v51 = vld [vmem:[#allocation33_spill] sm:$0xff]  ;;  %v10336_v30 = vld [vmem:[#allocation63_spill] sm:$0xff] }
 0x470   : > { %v5183_v9 = vadd.f32 %v5182_v61, %v5094_v58  ;;  %v10329_v61 = vld [vmem:[#allocation42_spill] sm:$0xff]  ;;  %v4921_v63 = vadd.f32 %v9471_v33, %v4832_v53  ;;  %v5192_v33 = vpop.f32.mrf.mxu1 }
 0x471   : > { %v4746_v41 = vadd.f32 %v10329_v61, %v10328_v62 }
 0x472   : > { %v5231_v7 = vmul.f32 0.1, %v5183_v9 }
 0x473   : > { %v5007_v28 = vpop.f32.mrf.mxu3  ;;  %v9573_v36 = vpop.f32.mrf.mxu2  ;;  %v4835_v45 = vadd.f32 %v10330_v15, %v4746_v41 }
 0x474   : > { %v5008_v32 = vadd.f32 %v5007_v28, %v4919_v56  ;;  %v5263_v54 = vmax.f32 %v5183_v9, %v5231_v7 }
 0x475   : > { %v4924_v29 = vadd.f32 %v9483_v25, %v4835_v45  ;;  %v5106_v25 = vpop.f32.mrf.mxu0 }
 0x476   : > { %v5284_v4 = vpack.c.bf16 %v5263_v54, %v5262_v34  ;;  %v5097_v47 = vadd.f32 %v5096_v60, %v5008_v32  ;;  %v4748_v60 = vadd.f32 %v10332_v49, %v10331_v1  ;;  %v10337_v32 = vld [vmem:[#allocation35_spill] sm:$0xff] }
 0x477   : > { %v10338_v34 = vld [vmem:[#allocation47_spill] sm:$0xff] }
 0x478   : > { %5416 = vmatmul.bf16.gmra.mxu2 %v5284_v4  ;;  %v5186_v55 = vadd.f32 %v5185_v26, %v5097_v47  ;;  %v4837_v16 = vadd.f32 %v10333_v39, %v4748_v60  ;;  %v5195_v44 = vpop.f32.mrf.mxu1  ;;  %v4753_v54 = vadd.f32 %v10338_v34, %v10337_v32  ;;  %v10342_v60 = vld [vmem:[#allocation67_spill] sm:$0xff] }
 0x47a   : > { %v5232_v5 = vmul.f32 0.1, %v5186_v55  ;;  %v4926_v35 = vadd.f32 %v9496_v0, %v4837_v16 }
 0x47b   : > { %v5009_v8 = vpop.f32.mrf.mxu3  ;;  %v9579_v18 = vpop.f32.mrf.mxu2 }
 0x47c   : > { %v5010_v17 = vadd.f32 %v5009_v8, %v4921_v63  ;;  %v5264_v48 = vmax.f32 %v5186_v55, %v5232_v5 }
 0x47d   : > { %v5108_v61 = vpop.f32.mrf.mxu0 }
 0x47e   : > { %v5099_v57 = vadd.f32 %v5098_v3, %v5010_v17  ;;  %v10335_v3 = vld [vmem:[#allocation46_spill] sm:$0xff]  ;;  %v10340_v17 = vld [vmem:[#allocation39_spill] sm:$0xff] }
 0x47f   : > { %v4751_v58 = vadd.f32 %v10335_v3, %v10334_v51 }
 0x480   : > { %v5188_v24 = vadd.f32 %v5187_v43, %v5099_v57  ;;  %v5197_v8 = vpop.f32.mrf.mxu1  ;;  %v10341_v57 = vld [vmem:[#allocation48_spill] sm:$0xff] }
 0x481   : > { %v4840_v7 = vadd.f32 %v10336_v30, %v4751_v58  ;;  %v4756_v15 = vadd.f32 %v10341_v57, %v10340_v17 }
 0x482   : > { %v5233_v14 = vmul.f32 0.1, %v5188_v24 }
 0x483   : > { %v5012_v21 = vpop.f32.mrf.mxu3  ;;  %v9585_v46 = vpop.f32.mrf.mxu2  ;;  %v4929_v20 = vadd.f32 %v9506_v6, %v4840_v7 }
 0x484   : > { %v5013_v22 = vadd.f32 %v5012_v21, %v4924_v29  ;;  %v5265_v26 = vmax.f32 %v5188_v24, %v5233_v14 }
 0x485   : > { %v5111_v14 = vpop.f32.mrf.mxu0 }
 0x486   : > { %v5285_v12 = vpack.c.bf16 %v5265_v26, %v5264_v48  ;;  %v5102_v50 = vadd.f32 %v5101_v42, %v5013_v22  ;;  %v10344_v22 = vld [vmem:[#allocation49_spill] sm:$0xff] }
 0x488   : > { %5421 = vmatmul.bf16.gmra.mxu2 %v5285_v12  ;;  %v5191_v59 = vadd.f32 %v5190_v52, %v5102_v50  ;;  %v10339_v52 = vld [vmem:[#allocation65_spill] sm:$0xff]  ;;  %v5200_v26 = vpop.f32.mrf.mxu1 }
 0x489   : > { %v4842_v63 = vadd.f32 %v10339_v52, %v4753_v54  ;;  %v10348_v54 = vld [vmem:[#allocation72_spill] sm:$0xff] }
 0x48a   : > { %v5234_v56 = vmul.f32 0.1, %v5191_v59 }
 0x48b   : > { %v5014_v19 = vpop.f32.mrf.mxu3  ;;  %v9591_v43 = vpop.f32.mrf.mxu2  ;;  %v4931_v45 = vadd.f32 %v9516_v11, %v4842_v63 }
 0x48c   : > { %v5015_v9 = vadd.f32 %v5014_v19, %v4926_v35  ;;  %v5266_v47 = vmax.f32 %v5191_v59, %v5234_v56  ;;  %v10345_v35 = vld [vmem:[#allocation70_spill] sm:$0xff]  ;;  %v10346_v59 = vld [vmem:[#allocation41_spill] sm:$0xff] }
 0x48e   : > { %v5104_v38 = vadd.f32 %v5103_v13, %v5015_v9  ;;  %v4845_v13 = vadd.f32 %v10342_v60, %v4756_v15  ;;  %v10347_v9 = vld [vmem:[#allocation50_spill] sm:$0xff] }
 0x490   : > { %v5193_v28 = vadd.f32 %v5192_v33, %v5104_v38  ;;  %v10343_v33 = vld [vmem:[#allocation76_spill] sm:$0xff]  ;;  %v4934_v39 = vadd.f32 %v9525_v23, %v4845_v13  ;;  %v5113_v38 = vpop.f32.mrf.mxu0  ;;  %v5202_v32 = vpop.f32.mrf.mxu1 }
 0x491   : > { %v4758_v48 = vadd.f32 %v10344_v22, %v10343_v33 }
 0x492   : > { %v5235_v4 = vmul.f32 0.1, %v5193_v28 }
 0x493   : > { %v5017_v53 = vpop.f32.mrf.mxu3  ;;  %v9597_v0 = vpop.f32.mrf.mxu2  ;;  %v4847_v19 = vadd.f32 %v10345_v35, %v4758_v48 }
 0x494   : > { %v5018_v42 = vadd.f32 %v5017_v53, %v4929_v20  ;;  %v5267_v62 = vmax.f32 %v5193_v28, %v5235_v4 }
 0x495   : > { %v4936_v30 = vadd.f32 %v9534_v37, %v4847_v19 }
 0x496   : > { %v5286_v41 = vpack.c.bf16 %v5267_v62, %v5266_v47  ;;  %v5107_v55 = vadd.f32 %v5106_v25, %v5018_v42  ;;  %v10349_v42 = vld [vmem:[#allocation44_spill] sm:$0xff]  ;;  %v10350_v47 = vld [vmem:[#allocation51_spill] sm:$0xff] }
 0x497   : > { %v4763_v62 = vadd.f32 %v10350_v47, %v10349_v42 }
 0x498   : > { %5426 = vmatmul.bf16.gmra.mxu2 %v5286_v41  ;;  %v5196_v24 = vadd.f32 %v5195_v44, %v5107_v55  ;;  %v4761_v44 = vadd.f32 %v10347_v9, %v10346_v59  ;;  %v5116_v52 = vpop.f32.mrf.mxu0  ;;  %v5205_v57 = vpop.f32.mrf.mxu1 }
 0x49a   : > { %v5236_v29 = vmul.f32 0.1, %v5196_v24  ;;  %v4850_v4 = vadd.f32 %v10348_v54, %v4761_v44 }
 0x49b   : > { %v5019_v5 = vpop.f32.mrf.mxu3  ;;  %v9603_v6 = vpop.f32.mrf.mxu2 }
 0x49c   : > { %v5020_v1 = vadd.f32 %v5019_v5, %v4931_v45  ;;  %v5268_v51 = vmax.f32 %v5196_v24, %v5236_v29  ;;  %v4939_v41 = vadd.f32 %v9540_v10, %v4850_v4  ;;  %v10351_v45 = vld [vmem:[#allocation74_spill] sm:$0xff] }
 0x49d   : > { %v4852_v5 = vadd.f32 %v10351_v45, %v4763_v62 }
 0x49e   : > { %v5109_v49 = vadd.f32 %v5108_v61, %v5020_v1 }
 0x49f   : > { %v4941_v1 = vadd.f32 %v9549_v40, %v4852_v5  ;;  %v9624_v40 = vld [vmem:[%s10136_s6] ss:$0 sm:$0xff] }
 0x4a0   : > { %v5198_v21 = vadd.f32 %v5197_v8, %v5109_v49  ;;  %v5118_v29 = vpop.f32.mrf.mxu0  ;;  %v9682_v54 = vadd.f32 %v9624_v40, %v9573_v36  ;;  %v9698_v36 = vadd.f32 %v9624_v40, %v9555_v31 }
 0x4a2   : > { %v5237_v12 = vmul.f32 0.1, %v5198_v21 }
 0x4a3   : > { %v5022_v16 = vpop.f32.mrf.mxu3  ;;  %v9609_v11 = vpop.f32.mrf.mxu2 }
 0x4a4   : > { %v5023_v50 = vadd.f32 %v5022_v16, %v4934_v39  ;;  %v5269_v3 = vmax.f32 %v5198_v21, %v5237_v12  ;;  %v5207_v21 = vpop.f32.mrf.mxu1 }
 0x4a6   : > { %v5287_v58 = vpack.c.bf16 %v5269_v3, %v5268_v51  ;;  %v5112_v25 = vadd.f32 %v5111_v14, %v5023_v50 }
 0x4a8   : > { %5431 = vmatmul.bf16.gmra.mxu2 %v5287_v58  ;;  %v5201_v23 = vadd.f32 %v5200_v26, %v5112_v25 }
 0x4aa   : > { %v5238_v20 = vmul.f32 0.1, %v5201_v23 }
 0x4ab   : > { %v5024_v7 = vpop.f32.mrf.mxu3  ;;  %v5392_v56 = vpop.f32.mrf.mxu2 }
 0x4ac   : > { %v5025_v28 = vadd.f32 %v5024_v7, %v4936_v30  ;;  %v5270_v55 = vmax.f32 %v5201_v23, %v5238_v20  ;;  %v9652_v30 = vadd.f32 %v9624_v40, %v9609_v11  ;;  %v9658_v23 = vadd.f32 %v9624_v40, %v9603_v6 }
 0x4ad   : > { %v9668_v11 = vadd.f32 %v9624_v40, %v9591_v43  ;;  %v9692_v20 = vadd.f32 %v9624_v40, %v9561_v27 }
 0x4ae   : > { %v5114_v34 = vadd.f32 %v5113_v38, %v5025_v28  ;;  %v9648_v38 = vadd.f32 %v9624_v40, %v5392_v56  ;;  %v9662_v28 = vadd.f32 %v9624_v40, %v9597_v0  ;;  %v5451_v56 = vpack.c.bf16 %v9652_v30, %v9658_v23 }
 0x4af   : > { %v9678_v0 = vadd.f32 %v9624_v40, %v9579_v18 }
 0x4b0   : > { %v5203_v53 = vadd.f32 %v5202_v32, %v5114_v34  ;;  %v9672_v34 = vadd.f32 %v9624_v40, %v9585_v46  ;;  %v5450_v6 = vpack.c.bf16 %v9662_v28, %v9668_v11  ;;  %v9688_v46 = vadd.f32 %v9624_v40, %v9567_v2 }
 0x4b2   : > { %v5239_v61 = vmul.f32 0.1, %v5203_v53  ;;  %v5449_v43 = vpack.c.bf16 %v9672_v34, %v9678_v0  ;;  %v5448_v18 = vpack.c.bf16 %v9682_v54, %v9688_v46 }
 0x4b3   : > { %v5027_v63 = vpop.f32.mrf.mxu3  ;;  %v5394_v8 = vpop.f32.mrf.mxu2 }
 0x4b4   : > { %v5028_v37 = vadd.f32 %v5027_v63, %v4939_v41  ;;  %v5271_v17 = vmax.f32 %v5203_v53, %v5239_v61  ;;  %v9641_v59 = vadd.f32 %v9624_v40, %v5394_v8  ;;  %v5447_v53 = vpack.c.bf16 %v9692_v20, %v9698_v36 }
 0x4b6   : > { %v5288_v15 = vpack.c.bf16 %v5271_v17, %v5270_v55  ;;  %v5117_v24 = vadd.f32 %v5116_v52, %v5028_v37  ;;  %v5452_v7 = vpack.c.bf16 %v9641_v59, %v9648_v38  ;;  %v7874_v55 = vmov 1065369472  }
 0x4b8   : > { %5436 = vmatmul.bf16.gmra.mxu2 %v5288_v15  ;;  %v5206_v13 = vadd.f32 %v5205_v57, %v5117_v24 }
 0x4ba   : > { %v5240_v33 = vmul.f32 0.1, %v5206_v13 }
 0x4bb   : > { %v5029_v49 = vpop.f32.mrf.mxu3  ;;  %v5397_v60 = vpop.f32.mrf.mxu2 }
 0x4bc   : > { %v5030_v14 = vadd.f32 %v5029_v49, %v4941_v1  ;;  %v5272_v12 = vmax.f32 %v5206_v13, %v5240_v33  ;;  %v9638_v25 = vadd.f32 %v9624_v40, %v5397_v60 }
 0x4be   : > { %v5119_v10 = vadd.f32 %v5118_v29, %v5030_v14 }
 0x4c0   : > { %v5208_v22 = vadd.f32 %v5207_v21, %v5119_v10 }
 0x4c2   : > { %v5241_v48 = vmul.f32 0.1, %v5208_v22 }
 0x4c3   : > { %v5399_v26 = vpop.f32.mrf.mxu2 }
 0x4c4   : > { %v5273_v39 = vmax.f32 %v5208_v22, %v5241_v48  ;;  %v9633_v35 = vadd.f32 %v9624_v40, %v5399_v26 }
 0x4c6   : > { %v5289_v16 = vpack.c.bf16 %v5273_v39, %v5272_v12  ;;  %v5453_v9 = vpack.c.bf16 %v9633_v35, %v9638_v25 }
 0x4c8   : > { %5441 = vmatmul.bf16.gmra.mxu2 %v5289_v16 }
 0x4cb   : > { %v5402_v50 = vpop.f32.mrf.mxu2 }
 0x4cc   : > { %v9627_v3 = vadd.f32 %v9624_v40, %v5402_v50 }
 0x4d3   : > { %v5404_v51 = vpop.f32.mrf.mxu2 }
 0x4d4   : > { %v9630_v58 = vadd.f32 %v9624_v40, %v5404_v51 }
 0x4d6   : > { %v5454_v19 = vpack.c.bf16 %v9630_v58, %v9627_v3 }
 0x4d8   : > { %5463 = vmatpush.bf16.msrb.mxu3 %v5454_v19 }
 0x4db   : > { %v9645_v44 = vpop.f32.mrf.mxu2 }
 0x4dc   : > { %5464 = vmatpush.bf16.msrb.mxu3 %v5453_v9  ;;  %v9763_v19 = vadd.f32 %v9624_v40, %v9645_v44  ;;  %v7365_v9 = vld [vmem:[#allocation11 + $0x38] sm:$0xff] }
 0x4e0   : > { %5465 = vmatpush.bf16.msrb.mxu3 %v5452_v7 }
 0x4e3   : > { %v5409_v32 = vpop.f32.mrf.mxu2 }
 0x4e4   : > { %5466 = vmatpush.bf16.msrb.mxu3 %v5451_v56  ;;  %v9757_v50 = vadd.f32 %v9624_v40, %v5409_v32  ;;  %v7364_v56 = vld [vmem:[#allocation11 + $0x30] sm:$0xff]  ;;  %v7362_v32 = vld [vmem:[#allocation11 + $0x20] sm:$0xff] }
 0x4e6   : > { %v5455_v7 = vpack.c.bf16 %v9757_v50, %v9763_v19 }
 0x4e8   : > { %5467 = vmatpush.bf16.msrb.mxu3 %v5450_v6  ;;  %v7363_v6 = vld [vmem:[#allocation11 + $0x28] sm:$0xff] }
 0x4eb   : > { %v5412_v4 = vpop.f32.mrf.mxu2 }
 0x4ec   : > { %5468 = vmatpush.bf16.msrb.mxu3 %v5449_v43  ;;  %v9754_v16 = vadd.f32 %v9624_v40, %v5412_v4  ;;  %v7361_v43 = vld [vmem:[#allocation11 + $0x18] sm:$0xff]  ;;  %v7360_v4 = vld [vmem:[#allocation11 + $0x10] sm:$0xff] }
 0x4f0   : > { %5469 = vmatpush.bf16.msrb.mxu3 %v5448_v18  ;;  %v7359_v18 = vld [vmem:[#allocation11 + $0x8] sm:$0xff] }
 0x4f3   : > { %v5414_v42 = vpop.f32.mrf.mxu2 }
 0x4f4   : > { %5470 = vmatpush.bf16.msrb.mxu3 %v5447_v53  ;;  %v9749_v12 = vadd.f32 %v9624_v40, %v5414_v42  ;;  %v7358_v53 = vld [vmem:[#allocation11] sm:$0xff]  ;;  %v7373_v42 = vld [vmem:[#allocation12 + $0x38] sm:$0xff] }
 0x4f6   : > { %v5456_v51 = vpack.c.bf16 %v9749_v12, %v9754_v16 }
 0x4f7   : > { %5471 = vmatmul.bf16.vlgmr.msrb.gmra.mxu3 %v7874_v55 }
 0x4fb   : > { %v5417_v2 = vpop.f32.mrf.mxu2 }
 0x4fc   : > { %v9746_v26 = vadd.f32 %v9624_v40, %v5417_v2  ;;  %v7372_v2 = vld [vmem:[#allocation12 + $0x30] sm:$0xff] }
 0x503   : > { %v5419_v47 = vpop.f32.mrf.mxu2 }
 0x504   : > { %v9741_v22 = vadd.f32 %v9624_v40, %v5419_v47  ;;  %v7371_v47 = vld [vmem:[#allocation12 + $0x28] sm:$0xff] }
 0x506   : > { %v5457_v39 = vpack.c.bf16 %v9741_v22, %v9746_v26 }
 0x50b   : > { %v5422_v62 = vpop.f32.mrf.mxu2 }
 0x50c   : > { %v9738_v33 = vadd.f32 %v9624_v40, %v5422_v62  ;;  %v7370_v62 = vld [vmem:[#allocation12 + $0x20] sm:$0xff] }
 0x513   : > { %v5424_v61 = vpop.f32.mrf.mxu2 }
 0x514   : > { %v9733_v10 = vadd.f32 %v9624_v40, %v5424_v61  ;;  %v7369_v61 = vld [vmem:[#allocation12 + $0x18] sm:$0xff] }
 0x516   : > { %v5458_v48 = vpack.c.bf16 %v9733_v10, %v9738_v33 }
 0x51b   : > { %v5427_v41 = vpop.f32.mrf.mxu2 }
 0x51c   : > { %v9730_v29 = vadd.f32 %v9624_v40, %v5427_v41  ;;  %v7368_v41 = vld [vmem:[#allocation12 + $0x10] sm:$0xff] }
 0x523   : > { %v5429_v27 = vpop.f32.mrf.mxu2 }
 0x524   : > { %v9725_v13 = vadd.f32 %v9624_v40, %v5429_v27 }
 0x526   : > { %v5459_v21 = vpack.c.bf16 %v9725_v13, %v9730_v29 }
 0x52b   : > { %v5432_v52 = vpop.f32.mrf.mxu2 }
 0x52c   : > { %v9722_v60 = vadd.f32 %v9624_v40, %v5432_v52  ;;  %v7367_v52 = vld [vmem:[#allocation12 + $0x8] sm:$0xff] }
 0x533   : > { %v5434_v63 = vpop.f32.mrf.mxu2 }
 0x534   : > { %v9717_v1 = vadd.f32 %v9624_v40, %v5434_v63 }
 0x536   : > { %v5460_v14 = vpack.c.bf16 %v9717_v1, %v9722_v60 }
 0x53b   : > { %v5437_v8 = vpop.f32.mrf.mxu2 }
 0x53c   : > { %v9714_v24 = vadd.f32 %v9624_v40, %v5437_v8 }
 0x543   : > { %v5439_v37 = vpop.f32.mrf.mxu2 }
 0x544   : > { %v9709_v45 = vadd.f32 %v9624_v40, %v5439_v37 }
 0x546   : > { %v5461_v49 = vpack.c.bf16 %v9709_v45, %v9714_v24 }
 0x54b   : > { %v5442_v31 = vpop.f32.mrf.mxu2 }
 0x54c   : > { %v9703_v57 = vadd.f32 %v9624_v40, %v5442_v31  ;;  %v7366_v31 = vld [vmem:[#allocation12] sm:$0xff] }
 0x553   : > { %v5444_v17 = vpop.f32.mrf.mxu2 }
 0x554   : > { %v9706_v15 = vadd.f32 %v9624_v40, %v5444_v17 }
 0x556   : > { %v5462_v5 = vpack.c.bf16 %v9706_v15, %v9703_v57 }
 0x558   : > { %5476 = vmatpush.bf16.msra.mxu3 %v5462_v5 }
 0x55c   : > { %5477 = vmatpush.bf16.msra.mxu3 %v5461_v49 }
 0x560   : > { %5478 = vmatpush.bf16.msra.mxu3 %v5460_v14 }
 0x564   : > { %5479 = vmatpush.bf16.msra.mxu3 %v5459_v21 }
 0x568   : > { %5480 = vmatpush.bf16.msra.mxu3 %v5458_v48 }
 0x56c   : > { %5481 = vmatpush.bf16.msra.mxu3 %v5457_v39 }
 0x570   : > { %5482 = vmatpush.bf16.msra.mxu3 %v5456_v51 }
 0x574   : > { %5483 = vmatpush.bf16.msra.mxu3 %v5455_v7 }
 0x577   : > { %5484 = vmatmul.bf16.vlgmr.msra.gmra.mxu3 %v7874_v55 }
 0x578   : > { %5555 = vmatpush.bf16.msrb.mxu3 %v7365_v9 }
 0x57a   : > { %v5472_v40 = vpop.f32.mrf.mxu3 }
 0x57c   : > { %5556 = vmatpush.bf16.msrb.mxu3 %v7364_v56 }
 0x580   : > { %5557 = vmatpush.bf16.msrb.mxu3 %v7363_v6 }
 0x582   : > { %v5474_v44 = vpop.f32.mrf.mxu3 }
 0x584   : > { %5558 = vmatpush.bf16.msrb.mxu3 %v7362_v32 }
 0x588   : > { %5559 = vmatpush.bf16.msrb.mxu3 %v7361_v43 }
 0x58c   : > { %5560 = vmatpush.bf16.msrb.mxu3 %v7360_v4  ;;  %v9768_v4 = vld [vmem:[%s8067_s26] sm:$0xff]  }
 0x590   : > { %5561 = vmatpush.bf16.msrb.mxu3 %v7359_v18 }
 0x594   : > { %5562 = vmatpush.bf16.msrb.mxu3 %v7358_v53  ;;  %v9774_v53 = vld [vmem:[%s8067_s26 + $0x10] sm:$0xff]  }
 0x598   : > { %5634 = vmatpush.bf16.msra.mxu3 %v7373_v42 }
 0x59c   : > { %5635 = vmatpush.bf16.msra.mxu3 %v7372_v2  ;;  %v9781_v2 = vld [vmem:[%s8067_s26 + $0x18] sm:$0xff]  }
 0x5a0   : > { %5636 = vmatpush.bf16.msra.mxu3 %v7371_v47  ;;  %v9784_v47 = vld [vmem:[%s8067_s26 + $0x20] sm:$0xff]  }
 0x5a4   : > { %5637 = vmatpush.bf16.msra.mxu3 %v7370_v62 }
 0x5a8   : > { %5638 = vmatpush.bf16.msra.mxu3 %v7369_v61  ;;  %v5699_v61 = vunpack.c.l.bf16 %v9768_v4 }
 0x5ac   : > { %5639 = vmatpush.bf16.msra.mxu3 %v7368_v41  ;;  %v5700_v41 = vunpack.c.h.bf16 %v9768_v4 }
 0x5b0   : > { %5640 = vmatpush.bf16.msra.mxu3 %v7367_v52  ;;  %v9792_v52 = vld [vmem:[%s8067_s26 + $0x28] sm:$0xff]  }
 0x5b4   : > { %5641 = vmatpush.bf16.msra.mxu3 %v7366_v31 }
 0x5fa   : > { %v5485_v27 = vpop.f32.mrf.mxu3 }
 0x5fb   : > { %v5486_v63 = vadd.f32 %v5485_v27, %v5472_v40  ;;  %v9771_v40 = vld [vmem:[%s8067_s26 + $0x8] sm:$0xff]  }
 0x5fc   : > { %v5701_v27 = vunpack.c.l.bf16 %v9771_v40 }
 0x5fd   : > { %v5489_v8 = vmul.f32 0.00390625, %v5486_v63  ;;  %v9795_v63 = vld [vmem:[%s8067_s26 + $0x30] sm:$0xff]  }
 0x5ff   : > { %v5490_v37 = vpack.c.bf16 %v5489_v8, %v5489_v8 }
 0x601   : > { %5563 = vmatmul.bf16.vlgmr.msrb.gmra.mxu3 %v5490_v37  ;;  %v5702_v37 = vunpack.c.h.bf16 %v9771_v40  ;;  %v10357_v40 = vunpack.c.l.bf16 %v9784_v47 }
 0x602   : > { %v5487_v55 = vpop.f32.mrf.mxu3 }
 0x603   : > { %v5703_v55 = vunpack.c.l.bf16 %v9774_v53 }
 0x684   : > { %v5564_v17 = vpop.f32.mrf.mxu3 }
 0x685   : > { %v5568_v5 = vmax.f32 %v5564_v17, 0.0  ;;  %v9801_v17 = vld [vmem:[%s8067_s26 + $0x38] sm:$0xff]  }
 0x687   : > { %v5569_v49 = vpack.c.bf16 %v5568_v5, %v5568_v5  ;;  %v9804_v5 = vld [vmem:[%s8067_s26 + $0x40] sm:$0xff]  }
 0x689   : > { %5642 = vmatmul.bf16.vlgmr.msra.gmra.mxu3 %v5569_v49 }
 0x68c   : > { %v5566_v14 = vpop.f32.mrf.mxu3 }
 0x70c   : > { %v5643_v21 = vpop.f32.mrf.mxu3 }
 0x70d   : > { %v7103_v48 = vmul.f32 -1.442695, %v5643_v21  ;;  %v9839_v21 = vld [vmem:[%s8067_s26 + $0x78] sm:$0xff]  }
 0x70f   : > { %7600 = vpow2.f32 %v7103_v48  ;;  %v9810_v48 = vld [vmem:[%s8067_s26 + $0x48] sm:$0xff]  }
 0x714   : > { %v5645_v39 = vpop.f32.mrf.mxu3 }
 0x715   : > { %v7601_v51 = vpop.eup %7600 }
 0x716   : > { %v5650_v9 = vadd.f32 1.0, %v7601_v51  ;;  %v9836_v51 = vld [vmem:[%s8067_s26 + $0x70] sm:$0xff]  }
 0x718   : > { %7602 = vrcp.f32 %v5650_v9  ;;  %v5662_v43 = vand.u32 2147483648, %v5650_v9  ;;  %vm5656_vm1 = vweird.f32 %v5650_v9  ;;  %v5660_v18 = vand.u32 2147483647, %v5650_v9 }
 0x71a   : > { %v5663_v8 = vor.u32 1.1754944e-38, %v5662_v43  ;;  %vm5661_vm8 = vcmp.eq.f32.partialorder %v5660_v18, 8.507059e+37 }
 0x71e   : > { %v7603_v7 = vpop.eup %7602 }
 0x71f   : > { %v5652_v56 = vmul.f32 %v7603_v7, %v5650_v9  ;;  %vm5657_vm0 = vweird.f32 %v7603_v7 }
 0x720   : > { %vm9776_vm7 = vmor %vm5656_vm1, %vm5657_vm0 }
 0x721   : > { %v5653_v6 = vsub.f32 1.0, %v5652_v56 }
 0x723   : > { %v5654_v32 = vmul.f32 %v7603_v7, %v5653_v6  ;;  %v9817_v6 = vld [vmem:[%s8067_s26 + $0x50] sm:$0xff]  }
 0x725   : > { %v5655_v44 = vadd.f32 %v7603_v7, %v5654_v32  ;;  %v9820_v32 = vld [vmem:[%s8067_s26 + $0x58] sm:$0xff]  }
 0x727   : > { %v5659_v62 = vsel %vm9776_vm7, %v7603_v7, %v5655_v44 }
 0x728   : > { %v5664_v39 = vsel %vm5661_vm8, %v5663_v8, %v5659_v62  ;;  %v9827_v62 = vld [vmem:[%s8067_s26 + $0x60] sm:$0xff]   ;;  %v9830_v8 = vld [vmem:[%s8067_s26 + $0x68] sm:$0xff]   ;;  %s5903_s26 = scalar_lea.hbm %s10139_s9, %s7374_s3 }
 0x729   : > { %v5666_v43 = vperm.slane %v5664_v39, 0  ;;  %s5906_s17 = sshll.u32 %s5903_s26, 4  ;;  %s5907_s17 = int_to_ptr.hbm [resolvable:$true] %s5906_s17 }
 0x72a   : > { %s7800_s23 = sshra.s32 %s5907_s17, 4  ;;  %s7801_s23 = int_to_ptr.hbm [resolvable:$true] %s7800_s23 }
 0x72b   : > { %v5667_v42 = vmul.f32 %v5666_v43, %v9698_v36  ;;  %v5668_v14 = vmul.f32 %v5666_v43, %v9692_v20  ;;  %v5669_v49 = vmul.f32 %v5666_v43, %v9688_v46  ;;  %v5670_v7 = vmul.f32 %v5666_v43, %v9682_v54  ;;  %s7802_s24 = scalar_lea.hbm %s7801_s23, 128  ;;  %p7807_p5 = scmp.lt.s32.totalorder %s7801_s23, %s10139_s9 }
 0x72c   : > { %v5671_v56 = vmul.f32 %v5666_v43, %v9678_v0  ;;  %v5672_v9 = vmul.f32 %v5666_v43, %v9672_v34  ;;  %v5673_v31 = vmul.f32 %v5666_v43, %v9668_v11  ;;  %v5674_v39 = vmul.f32 %v5666_v43, %v9662_v28  ;;  %p7803_p1 = scmp.ne.s32.totalorder %s7801_s23, %s7802_s24  ;;  %p7808_p6 = scmp.lt.s32.totalorder %s7806_s25, %s7802_s24 }
 0x72d   : > { %v5675_v44 = vmul.f32 %v5666_v43, %v9658_v23  ;;  %v5676_v18 = vmul.f32 %v5666_v43, %v9652_v30  ;;  %v5677_v36 = vmul.f32 %v5666_v43, %v9648_v38  ;;  %v5678_v20 = vmul.f32 %v5666_v43, %v9641_v59 }
 0x72e   : > { %v5679_v46 = vmul.f32 %v5666_v43, %v9638_v25  ;;  %v5680_v54 = vmul.f32 %v5666_v43, %v9633_v35  ;;  %v5681_v0 = vmul.f32 %v5666_v43, %v9627_v3  ;;  %v5682_v34 = vmul.f32 %v5666_v43, %v9630_v58  ;;  %p7804_p3 = pnand %p7803_p1, %p8027_p12  ;;  %p7809_p7 = por %p7808_p6, %p7807_p5 }
 0x72f   : > { %v5683_v11 = vmul.f32 %v5666_v43, %v9763_v19  ;;  %v5684_v28 = vmul.f32 %v5666_v43, %v9757_v50  ;;  %v5685_v23 = vmul.f32 %v5666_v43, %v9754_v16  ;;  %v5686_v30 = vmul.f32 %v5666_v43, %v9749_v12 }
 0x730   : > { %v5687_v38 = vmul.f32 %v5666_v43, %v9746_v26  ;;  %v5688_v59 = vmul.f32 %v5666_v43, %v9741_v22  ;;  %v5689_v25 = vmul.f32 %v5666_v43, %v9738_v33  ;;  %v5690_v35 = vmul.f32 %v5666_v43, %v9733_v10  ;;  %p7805_p11 = pneg %p7804_p3 }
 0x731   : > { %v5691_v3 = vmul.f32 %v5666_v43, %v9730_v29  ;;  %v5692_v58 = vmul.f32 %v5666_v43, %v9725_v13  ;;  %v5693_v19 = vmul.f32 %v5666_v43, %v9722_v60  ;;  %v5694_v50 = vmul.f32 %v5666_v43, %v9717_v1 }
 0x732   : > { %v5695_v16 = vmul.f32 %v5666_v43, %v9714_v24  ;;  %v5696_v12 = vmul.f32 %v5666_v43, %v9709_v45  ;;  %v5697_v26 = vmul.f32 %v5666_v43, %v9703_v57  ;;  %v5698_v22 = vmul.f32 %v5666_v43, %v9706_v15  ;;  %p7810_p8 = pnand %p7809_p7, %p7805_p11 }
 0x733   : > { %v9887_v33 = vadd.f32 %v5699_v61, %v5667_v42  ;;  %v9891_v29 = vadd.f32 %v5700_v41, %v5668_v14  ;;  %v9895_v60 = vadd.f32 %v5701_v27, %v5669_v49  ;;  %v9899_v24 = vadd.f32 %v5702_v37, %v5670_v7 }
 0x734   : > { %v9903_v57 = vadd.f32 %v5703_v55, %v5671_v56  ;;  %v10354_v15 = vunpack.c.h.bf16 %v9774_v53  ;;  %v10355_v1 = vunpack.c.l.bf16 %v9781_v2  ;;  %v10356_v10 = vunpack.c.h.bf16 %v9781_v2 }
 0x735   : > { %v9919_v61 = vadd.f32 %v10357_v40, %v5675_v44  ;;  %v10358_v41 = vunpack.c.h.bf16 %v9784_v47  ;;  %v10359_v53 = vunpack.c.l.bf16 %v9792_v52  ;;  %v10360_v55 = vunpack.c.h.bf16 %v9792_v52 }
 0x736   : > { %v9907_v45 = vadd.f32 %v10354_v15, %v5672_v9  ;;  %v9911_v13 = vadd.f32 %v10355_v1, %v5673_v31  ;;  %v9915_v4 = vadd.f32 %v10356_v10, %v5674_v39  ;;  %v10361_v2 = vunpack.c.l.bf16 %v9795_v63 }
 0x737   : > { %v9923_v27 = vadd.f32 %v10358_v41, %v5676_v18  ;;  %v9927_v37 = vadd.f32 %v10359_v53, %v5677_v36  ;;  %v9931_v31 = vadd.f32 %v10360_v55, %v5678_v20  ;;  %v10362_v14 = vunpack.c.h.bf16 %v9795_v63 }
 0x738   : > { %v9935_v49 = vadd.f32 %v10361_v2, %v5679_v46  ;;  %v10363_v47 = vunpack.c.l.bf16 %v9801_v17  ;;  %v10364_v56 = vunpack.c.h.bf16 %v9801_v17  ;;  %v10365_v52 = vunpack.c.l.bf16 %v9804_v5 }
 0x739   : > { %v9939_v9 = vadd.f32 %v10362_v14, %v5680_v54  ;;  %v10366_v18 = vunpack.c.h.bf16 %v9804_v5  ;;  %v10367_v63 = vunpack.c.l.bf16 %v9810_v48  ;;  %v10368_v36 = vunpack.c.h.bf16 %v9810_v48 }
 0x73a   : > { %v9943_v7 = vadd.f32 %v10363_v47, %v5681_v0  ;;  %v9947_v43 = vadd.f32 %v10364_v56, %v5682_v34  ;;  %v9951_v44 = vadd.f32 %v10365_v52, %v5683_v11  ;;  %v10369_v17 = vunpack.c.l.bf16 %v9817_v6 }
 0x73b   : > { %v9955_v42 = vadd.f32 %v10366_v18, %v5684_v28  ;;  %v9959_v39 = vadd.f32 %v10367_v63, %v5685_v23  ;;  %v9963_v20 = vadd.f32 %v10368_v36, %v5686_v30  ;;  %v10370_v54 = vunpack.c.h.bf16 %v9817_v6 }
 0x73c   : > { %v9967_v46 = vadd.f32 %v10369_v17, %v5687_v38  ;;  %v10371_v5 = vunpack.c.l.bf16 %v9820_v32  ;;  %v10372_v11 = vunpack.c.h.bf16 %v9820_v32  ;;  %v10373_v48 = vunpack.c.l.bf16 %v9827_v62 }
 0x73d   : > { %v9971_v0 = vadd.f32 %v10370_v54, %v5688_v59  ;;  %v10374_v30 = vunpack.c.h.bf16 %v9827_v62  ;;  %v10375_v6 = vunpack.c.l.bf16 %v9830_v8  ;;  %v5763_v15 = vmul.f32 0.1, %v9887_v33 }
 0x73e   : > { %v9975_v34 = vadd.f32 %v10371_v5, %v5689_v25  ;;  %v9979_v28 = vadd.f32 %v10372_v11, %v5690_v35  ;;  %v9983_v23 = vadd.f32 %v10373_v48, %v5691_v3  ;;  %v10376_v25 = vunpack.c.h.bf16 %v9830_v8 }
 0x73f   : > { %v9987_v38 = vadd.f32 %v10374_v30, %v5692_v58  ;;  %v9991_v59 = vadd.f32 %v10375_v6, %v5693_v19  ;;  %v10377_v32 = vunpack.c.l.bf16 %v9836_v51  ;;  %v10378_v3 = vunpack.c.h.bf16 %v9836_v51 }
 0x740   : > { %v9996_v1 = vadd.f32 %v10376_v25, %v5694_v50  ;;  %v5764_v62 = vmul.f32 0.1, %v9891_v29  ;;  %v10379_v58 = vunpack.c.l.bf16 %v9839_v21  ;;  %v5765_v40 = vmul.f32 0.1, %v9895_v60 }
 0x741   : > { %v10000_v35 = vadd.f32 %v10377_v32, %v5695_v16  ;;  %v10004_v10 = vadd.f32 %v10378_v3, %v5696_v12  ;;  %v5766_v8 = vmul.f32 0.1, %v9899_v24  ;;  %v5767_v50 = vmul.f32 0.1, %v9903_v57 }
 0x742   : > { %v10009_v19 = vadd.f32 %v10379_v58, %v5697_v26  ;;  %v10380_v41 = vunpack.c.h.bf16 %v9839_v21  ;;  %v5768_v51 = vmul.f32 0.1, %v9907_v45  ;;  %v5769_v12 = vmul.f32 0.1, %v9911_v13 }
 0x743   : > { %v5770_v53 = vmul.f32 0.1, %v9915_v4  ;;  %v5771_v55 = vmul.f32 0.1, %v9919_v61  ;;  %v5772_v26 = vmul.f32 0.1, %v9923_v27  ;;  %v5795_v14 = vmax.f32 %v9887_v33, %v5763_v15 }
 0x744   : > { %v10016_v16 = vadd.f32 %v10380_v41, %v5698_v22  ;;  %v5773_v2 = vmul.f32 0.1, %v9927_v37  ;;  %v5774_v47 = vmul.f32 0.1, %v9931_v31  ;;  %v5775_v21 = vmul.f32 0.1, %v9935_v49 }
 0x745   : > { %v5776_v22 = vmul.f32 0.1, %v9939_v9  ;;  %v5796_v56 = vmax.f32 %v9891_v29, %v5764_v62  ;;  %v5777_v52 = vmul.f32 0.1, %v9943_v7  ;;  %v5778_v18 = vmul.f32 0.1, %v9947_v43 }
 0x746   : > { %v5779_v63 = vmul.f32 0.1, %v9951_v44  ;;  %v5797_v36 = vmax.f32 %v9895_v60, %v5765_v40  ;;  %v5780_v17 = vmul.f32 0.1, %v9955_v42  ;;  %v5781_v33 = vmul.f32 0.1, %v9959_v39 }
 0x747   : > { %v5782_v54 = vmul.f32 0.1, %v9963_v20  ;;  %v5798_v5 = vmax.f32 %v9899_v24, %v5766_v8  ;;  %v5783_v11 = vmul.f32 0.1, %v9967_v46  ;;  %v5784_v29 = vmul.f32 0.1, %v9971_v0 }
 0x748   : > { %v5785_v48 = vmul.f32 0.1, %v9975_v34  ;;  %v5799_v30 = vmax.f32 %v9903_v57, %v5767_v50  ;;  %v5786_v6 = vmul.f32 0.1, %v9979_v28  ;;  %v5800_v60 = vmax.f32 %v9907_v45, %v5768_v51 }
 0x749   : > { %v5801_v15 = vmax.f32 %v9911_v13, %v5769_v12  ;;  %v5802_v25 = vmax.f32 %v9915_v4, %v5770_v53  ;;  %v5787_v32 = vmul.f32 0.1, %v9983_v23  ;;  %v5788_v24 = vmul.f32 0.1, %v9987_v38 }
 0x74a   : > { %v5803_v3 = vmax.f32 %v9919_v61, %v5771_v55  ;;  %v5804_v62 = vmax.f32 %v9923_v27, %v5772_v26  ;;  %v5789_v58 = vmul.f32 0.1, %v9991_v59  ;;  %v5790_v57 = vmul.f32 0.1, %v9996_v1 }
 0x74b   : > { %v5805_v40 = vmax.f32 %v9927_v37, %v5773_v2  ;;  %v5806_v45 = vmax.f32 %v9931_v31, %v5774_v47  ;;  %v5807_v13 = vmax.f32 %v9935_v49, %v5775_v21  ;;  %v5808_v4 = vmax.f32 %v9939_v9, %v5776_v22 }
 0x74c   : > { %v7378_v8 = vpack.c.bf16 %v5796_v56, %v5795_v14  ;;  %v7383_v50 = vpack.c.bf16 %v5798_v5, %v5797_v36  ;;  %v5809_v41 = vmax.f32 %v9943_v7, %v5777_v52  ;;  %v5810_v61 = vmax.f32 %v9947_v43, %v5778_v18 }
 0x74d   : > { %v7388_v27 = vpack.c.bf16 %v5800_v60, %v5799_v30  ;;  %v7393_v51 = vpack.c.bf16 %v5802_v25, %v5801_v15  ;;  %v5791_v12 = vmul.f32 0.1, %v10000_v35  ;;  %v5811_v53 = vmax.f32 %v9951_v44, %v5779_v63 }
 0x74e   : > { %v5812_v37 = vmax.f32 %v9955_v42, %v5780_v17  ;;  %7379 = vst [vmem:[%s10062_s21] sm:$0xff] %v7378_v8   ;;  %v7398_v31 = vpack.c.bf16 %v5804_v62, %v5803_v3  ;;  %v5792_v49 = vmul.f32 0.1, %v10004_v10  ;;  %v5813_v9 = vmax.f32 %v9959_v39, %v5781_v33 }
 0x74f   : > { %v5814_v7 = vmax.f32 %v9963_v20, %v5782_v54  ;;  %7455 = vst [vmem:[%s10062_s21 + $0x8] sm:$0xff] %v7383_v50   ;;  %v7403_v43 = vpack.c.bf16 %v5806_v45, %v5805_v40  ;;  %v5793_v44 = vmul.f32 0.1, %v10009_v19  ;;  %v5815_v42 = vmax.f32 %v9967_v46, %v5783_v11 }
 0x750   : > { %v5816_v55 = vmax.f32 %v9971_v0, %v5784_v29  ;;  %7456 = vst [vmem:[%s10062_s21 + $0x10] sm:$0xff] %v7388_v27   ;;  %v7408_v26 = vpack.c.bf16 %v5808_v4, %v5807_v13  ;;  %v5794_v2 = vmul.f32 0.1, %v10016_v16  ;;  %v5817_v14 = vmax.f32 %v9975_v34, %v5785_v48 }
 0x751   : > { %v5818_v39 = vmax.f32 %v9979_v28, %v5786_v6  ;;  %7457 = vst [vmem:[%s10062_s21 + $0x18] sm:$0xff] %v7393_v51   ;;  %v7413_v20 = vpack.c.bf16 %v5810_v61, %v5809_v41  ;;  %v5819_v47 = vmax.f32 %v9983_v23, %v5787_v32  ;;  %v5820_v46 = vmax.f32 %v9987_v38, %v5788_v24 }
 0x752   : > { %7458 = vst [vmem:[%s10062_s21 + $0x20] sm:$0xff] %v7398_v31   ;;  %v7418_v0 = vpack.c.bf16 %v5812_v37, %v5811_v53  ;;  %v5821_v21 = vmax.f32 %v9991_v59, %v5789_v58  ;;  %v5822_v22 = vmax.f32 %v9996_v1, %v5790_v57  ;;  %v7423_v34 = vpack.c.bf16 %v5814_v7, %v5813_v9 }
 0x753   : > { %7459 = vst [vmem:[%s10062_s21 + $0x28] sm:$0xff] %v7403_v43   ;;  %v5823_v28 = vmax.f32 %v10000_v35, %v5791_v12  ;;  %v5824_v56 = vmax.f32 %v10004_v10, %v5792_v49  ;;  %v7428_v23 = vpack.c.bf16 %v5816_v55, %v5815_v42  ;;  %v5825_v38 = vmax.f32 %v10009_v19, %v5793_v44 }
 0x754   : > { %7460 = vst [vmem:[%s10062_s21 + $0x30] sm:$0xff] %v7408_v26   ;;  %v5826_v59 = vmax.f32 %v10016_v16, %v5794_v2  ;;  %v7433_v1 = vpack.c.bf16 %v5818_v39, %v5817_v14  ;;  %v7438_v35 = vpack.c.bf16 %v5820_v46, %v5819_v47  ;;  %v7443_v10 = vpack.c.bf16 %v5822_v22, %v5821_v21 }
 0x755   : > { %7461 = vst [vmem:[%s10062_s21 + $0x38] sm:$0xff] %v7413_v20   ;;  %v7448_v52 = vpack.c.bf16 %v5824_v56, %v5823_v28 }
 0x756   : > { %7462 = vst [vmem:[%s10062_s21 + $0x40] sm:$0xff] %v7418_v0   ;;  %v7453_v18 = vpack.c.bf16 %v5826_v59, %v5825_v38 }
 0x757   : > { %7463 = vst [vmem:[%s10062_s21 + $0x48] sm:$0xff] %v7423_v34  }
 0x758   : > { %7464 = vst [vmem:[%s10062_s21 + $0x50] sm:$0xff] %v7428_v23  }
 0x759   : > { %7465 = vst [vmem:[%s10062_s21 + $0x58] sm:$0xff] %v7433_v1  }
 0x75a   : > { %7466 = vst [vmem:[%s10062_s21 + $0x60] sm:$0xff] %v7438_v35  }
 0x75b   : > { %7467 = vst [vmem:[%s10062_s21 + $0x68] sm:$0xff] %v7443_v10  }
 0x75c   : > { %7468 = vst [vmem:[%s10062_s21 + $0x70] sm:$0xff] %v7448_v52  }
 0x75d   : > { %7469 = vst [vmem:[%s10062_s21 + $0x78] sm:$0xff] %v7453_v18  }
 0x75e   : > { %7813 = shalt.err (!%p7810_p8)
}
 0x75f   : > { %s7875_s27 = smov 64   ;;  %s7876_s21 = smov 4  }
 0x760   : > { %7516 = dma.vmem_to_hbm [thread:$0]  (%p8027_p12), %s5905_s1, 2048, %s5907_s17, %s5892_s13, %s7875_s27, %s7875_s27, %s7876_s21  }
 0x761 PF: > { %p7553_p9 = scmp.ge.s32.totalorder %s7864_s12, 2  ;;  %s5921_s3 = sand.u32 1, %s7852_s30  }
 0x762   : > { %s5922_s16 = scalar_lea.sflag [#allocation5], %s5921_s3 }
 0x763   : > { %p7539_p10 = pnand %p7553_p9, %p8032_p2 }
 0x765   : > { %p7540_p13 = pneg %p7539_p10 }
 0x767   : > { %7847 = dma.done.wait (%p7540_p13), %s5922_s16, 2048  }
 0x768   : > { %7849 = vsyncadd (%p7540_p13), %s5922_s16, 4294965248  ;;  %p25_p0 = scmp.ge.s32.totalorder %s8007_s18, 6   ;;  %s10381_s30 = smov %s7856_s10 }
 0x769   : > { %s10382_s10 = smov %s7860_s11  ;;  %s10383_s11 = smov %s8019_s20 }
 0x76a   : > { %s10384_s12 = smov %s8007_s18  ;;  %27 = sbr.rel (!%p25_p0) target bundleno = 12 (0xc), region = 121 }
 0x76f   :  { %5928 = vsyncpa [#allocation4], 1 }
 0x770   :  { %5930 = vsyncpa [#allocation4 + $0x1], 1 }
 0x771   :  { %5931 = vsyncpa [#allocation7], 1 }
 0x772   :  { %5932 = vsyncpa [#allocation10], 1 }
 0x773   :  { %5933 = vsyncpa [#allocation13], 1 }
 0x774   :  { %5934 = vsyncpa [#allocation5], 1 }
 0x775   :  { %5936 = vsyncpa [#allocation5 + $0x1], 1 }

</bundles_post_ra>
